<compile_context>
chip_gen: v6e
topology: v6e:2x2x1
jax: 0.10.0
libtpu: 0.0.40
codegen_flags: <defaults>
</compile_context>

<pallas_src>
import functools

import jax
import jax.numpy as jnp
from jax.experimental import pallas as pl
from jax.experimental.pallas import tpu as pltpu


# ---------------------------------------------------------------------------
# Flat-layout conv(2->1, k x k, zero pad) + sigmoid helper
# ---------------------------------------------------------------------------
def _attention_from_pad(w_ref, rc_ref, pad_ref, H, W, ksize, pad):
    """Conv + sigmoid computed directly in the lane-dense flat (H*W) layout.

    pad_ref: VMEM (2, H*W + 2*(pad*W + pad)) f32 scratch whose *interior*
    [off0, off0 + H*W) holds the [channel-sum ; channel-max] maps. The halo is
    never zeroed: every tap that could read it (or bleed across a row
    boundary) is removed with a mask derived from precomputed (row, col)
    indices, so no per-batch zero-fill is required.
    """
    HW = H * W
    off0 = pad * W + pad
    row = rc_ref[0:1, :]                     # (1, HW) int32: h = q // W
    col = rc_ref[1:2, :]                     # (1, HW) int32: w = q %  W

    acc = jnp.zeros((1, HW), jnp.float32)
    for c in range(2):
        for kh in range(ksize):
            dr = kh - pad
            row_ok = jnp.logical_and(row + dr >= 0, row + dr < H)
            for kw in range(ksize):
                dc = kw - pad
                ok = jnp.logical_and(
                    row_ok, jnp.logical_and(col + dc >= 0, col + dc < W))
                start = off0 + dr * W + dc
                tap = pad_ref[c:c + 1, start:start + HW]      # (1, HW) f32
                wgt = w_ref[(c * ksize + kh) * ksize + kw]    # SMEM scalar
                acc = acc + jnp.where(ok, tap, 0.0) * wgt
    # TODO(synk): if this conv ever shows in a profile (large N, tiny H*W),
    # replace the 2*k*k unaligned tap slices with 2*k aligned row slabs plus
    # pltpu.roll lane shifts, and block the batch dim to amortize the scalar
    # weight broadcasts.
    return jax.nn.sigmoid(acc)


# ---------------------------------------------------------------------------
# Fused single-pass kernel: whole (C, HW) batch slab resident in VMEM
# ---------------------------------------------------------------------------
def _fused_kernel(w_ref, rc_ref, x_ref, o_ref, pad_ref, *, H, W, ksize, pad):
    HW = H * W
    off0 = pad * W + pad
    xf = x_ref[...].astype(jnp.float32)                      # (C, HW)
    pad_ref[0:1, off0:off0 + HW] = jnp.sum(xf, axis=0, keepdims=True)
    pad_ref[1:2, off0:off0 + HW] = jnp.max(xf, axis=0, keepdims=True)
    att = _attention_from_pad(w_ref, rc_ref, pad_ref,
                              H=H, W=W, ksize=ksize, pad=pad)  # (1, HW) f32
    # Multiply in f32, cast once at the store.
    o_ref[...] = (xf * att).astype(o_ref.dtype)


# ---------------------------------------------------------------------------
# Tiled path, phase A: channel sum / max (lane-dense over H*W)
# ---------------------------------------------------------------------------
def _reduce_kernel(x_ref, am_ref, *, c_total, need_mask):
    # x_ref : (c_blk, HW) one C tile of one batch element (input dtype)
    # am_ref: (2, HW) f32; row 0 = channel-sum, row 1 = channel-max.
    #         Resident across the C-tile grid axis (accumulator) -> that grid
    #         axis MUST stay "arbitrary".
    ct = pl.program_id(1)
    x = x_ref[...].astype(jnp.float32)
    if need_mask:                                   # static: only for a C tail
        c_blk = x_ref.shape[0]
        rows = ct * c_blk + jax.lax.broadcasted_iota(jnp.int32, x_ref.shape, 0)
        valid = rows < c_total
        x_sum = jnp.where(valid, x, 0.0)
        x_max = jnp.where(valid, x, -jnp.inf)
    else:
        x_sum = x_max = x
    psum = jnp.sum(x_sum, axis=0, keepdims=True)
    pmax = jnp.max(x_max, axis=0, keepdims=True)

    @pl.when(ct == 0)
    def _init():
        am_ref[0:1, :] = psum
        am_ref[1:2, :] = pmax

    @pl.when(ct > 0)
    def _accumulate():
        am_ref[0:1, :] = am_ref[0:1, :] + psum
        am_ref[1:2, :] = jnp.maximum(am_ref[1:2, :], pmax)


# ---------------------------------------------------------------------------
# Tiled path, phase B+C fused: conv+sigmoid once per batch, multiply per tile
# ---------------------------------------------------------------------------
def _convmul_kernel(w_ref, rc_ref, am_ref, x_ref, o_ref, att_ref, pad_ref,
                    *, H, W, ksize, pad):
    HW = H * W
    off0 = pad * W + pad
    ct = pl.program_id(1)

    # The attention map depends only on the batch element, not on the C tile:
    # compute it once per batch (ct == 0) into a persistent VMEM scratch and
    # let it hide under the prefetch of the next x tile.
    # NOTE: this is why the C grid axis MUST stay "arbitrary".
    @pl.when(ct == 0)
    def _compute_attention():
        pad_ref[:, off0:off0 + HW] = am_ref[...]
        att_ref[...] = _attention_from_pad(w_ref, rc_ref, pad_ref,
                                           H=H, W=W, ksize=ksize, pad=pad)

    # Multiply in f32, cast once at the store (v5e has no bf16 VPU path).
    o_ref[...] = (x_ref[...].astype(jnp.float32) * att_ref[...]).astype(o_ref.dtype)


# ---------------------------------------------------------------------------
# Wrapper
# ---------------------------------------------------------------------------
def _vmem_capacity_bytes():
    """Per-core VMEM capacity; conservative 64 MiB (v7x) if the query fails."""
    try:
        return int(pltpu.get_tpu_info().vmem_capacity_bytes)
    except Exception:
        return 64 << 20


def _pick_c_block(C, max_rows, pack):
    """Channels per x tile: a multiple of the sublane pack within max_rows.
    Prefers an exact divisor of C; otherwise the caller uses a cdiv grid with
    a masked tail (never an oversized single block)."""
    max_rows = max(pack, (max_rows // pack) * pack)
    if C <= max_rows:
        return C
    for cb in range(max_rows, pack - 1, -pack):
        if C % cb == 0:
            return cb
    return max_rows


def _params(semantics, vmem_limit):
    return pltpu.CompilerParams(dimension_semantics=semantics,
                                vmem_limit_bytes=int(vmem_limit))


@functools.partial(jax.jit, static_argnames=("fused_ok",))
def spatial_attention(x, conv_w, fused_ok=True):
    """x: (N, C, H, W); conv_w: (1, 2, k, k) OIHW, bias-free, k in {3, 7}."""
    N, C, H, W = x.shape
    HW = H * W
    isz = x.dtype.itemsize
    ksize = conv_w.shape[-1]
    pad = ksize // 2
    off0 = pad * W + pad
    pad_len = HW + 2 * off0

    # Lane-dense view: last (lane) dim is H*W (contiguous reshape, no copy).
    # NOTE: an H*W that is not a multiple of 128 only costs a masked tail vreg
    # per row; padding it in XLA would cost a full extra read+write of x.
    x3 = x.reshape(N, C, HW)

    # Fold the channel-mean 1/C into the avg-channel conv weights (conv is
    # linear), so the kernels only need the raw channel sum.
    w = conv_w.astype(jnp.float32)
    w = w.at[:, 0, :, :].multiply(1.0 / C)
    w_flat = w.reshape(-1)                                   # (2*k*k,) -> SMEM

    # Precomputed (row, col) index of each flat position: used for the
    # tap-validity masks of the flat-layout conv (keeps int div/mod in XLA).
    pos = jnp.arange(HW, dtype=jnp.int32)
    rowcol = jnp.stack([pos // W, pos % W])                  # (2, HW) int32

    # Generation-aware VMEM budget (v5e/v6e: 128 MiB, v7x: 64 MiB per core).
    cap = _vmem_capacity_bytes()
    vmem_limit = max(32 << 20, (cap * 3) // 4)               # headroom for Mosaic
    usable = (vmem_limit * 4) // 5
    # Fixed small VMEM: conv scratch, att scratch, rowcol, resident am block.
    fixed = (2 * pad_len + HW + 2 * HW) * 4 + 2 * (2 * HW) * 4

    common = dict(H=H, W=W, ksize=ksize, pad=pad)

    # ---- Fused single-pass path: whole (C, HW) batch slab resident ----------
    # Cuts x HBM traffic from 3 slab transfers (2 reads + 1 write) to 2.
    slab = C * HW * isz
    fused_live = 4 * slab + 2 * C * HW * 4 + fixed           # dbl-buf in/out + f32 temps
    if fused_ok and fused_live <= usable:
        out3 = pl.pallas_call(
            functools.partial(_fused_kernel, **common),
            out_shape=jax.ShapeDtypeStruct((N, C, HW), x.dtype),
            grid=(N,),
            in_specs=[
                pl.BlockSpec(memory_space=pltpu.MemorySpace.SMEM),    # weights
                pl.BlockSpec((2, HW), lambda b: (0, 0)),              # rowcol
                pl.BlockSpec((None, C, HW), lambda b: (b, 0, 0)),     # x slab
            ],
            out_specs=pl.BlockSpec((None, C, HW), lambda b: (b, 0, 0)),
            scratch_shapes=[pltpu.VMEM((2, pad_len), jnp.float32)],
            compiler_params=_params(("parallel",), vmem_limit),
        )(w_flat, rowcol, x3)
        return out3.reshape(N, C, H, W)

    # ---- Tiled two-phase path ------------------------------------------------
    # TODO(synk): when 8*HW*itemsize already exceeds the budget (huge H*W) the
    # lane dim should be tiled as well (Phase A only; the fused conv needs the
    # full map). Not needed for realistic routing-function inputs.
    pack = max(8, 32 // isz)                     # sublane pack: f32 8, bf16 16, i8 32
    per_row = HW * (4 * isz + 8)                 # dbl-buffered x+out rows + f32 temps
    rows_vmem = (usable - fixed) // per_row
    rows_tile = (8 << 20) // max(1, HW * isz)    # ~8 MiB x tiles: >=85% HBM roofline
    c_blk = _pick_c_block(C, max(pack, min(rows_vmem, rows_tile)), pack)
    n_ct = pl.cdiv(C, c_blk)
    need_mask = (C % c_blk) != 0                 # masked tail, never oversized block

    # Phase A: channel sum / max. Output block is resident across the C axis
    # (accumulator) => that axis MUST be "arbitrary".
    am = pl.pallas_call(
        functools.partial(_reduce_kernel, c_total=C, need_mask=need_mask),
        out_shape=jax.ShapeDtypeStruct((N, 2, HW), jnp.float32),
        grid=(N, n_ct),
        in_specs=[pl.BlockSpec((None, c_blk, HW), lambda b, ct: (b, ct, 0))],
        out_specs=pl.BlockSpec((None, 2, HW), lambda b, ct: (b, 0, 0)),
        compiler_params=_params(("parallel", "arbitrary"), vmem_limit),
    )(x3)

    # Phase B+C fused: conv+sigmoid once per batch (ct == 0, persistent VMEM
    # scratch), then out = x * att for every C tile. C axis stays "arbitrary".
    # TODO(synk): on v7x with N == 1 both phases leave one TensorCore idle; an
    # HW split of the multiply phase would restore megacore sharding there.
    out3 = pl.pallas_call(
        functools.partial(_convmul_kernel, **common),
        out_shape=jax.ShapeDtypeStruct((N, C, HW), x.dtype),
        grid=(N, n_ct),
        in_specs=[
            pl.BlockSpec(memory_space=pltpu.MemorySpace.SMEM),         # weights
            pl.BlockSpec((2, HW), lambda b, ct: (0, 0)),               # rowcol
            pl.BlockSpec((None, 2, HW), lambda b, ct: (b, 0, 0)),      # am (per batch)
            pl.BlockSpec((None, c_blk, HW), lambda b, ct: (b, ct, 0)),  # x tile
        ],
        out_specs=pl.BlockSpec((None, c_blk, HW), lambda b, ct: (b, ct, 0)),
        scratch_shapes=[pltpu.VMEM((1, HW), jnp.float32),              # attention map
                        pltpu.VMEM((2, pad_len), jnp.float32)],        # conv scratch
        compiler_params=_params(("parallel", "arbitrary"), vmem_limit),
    )(w_flat, rowcol, am, x3)

    return out3.reshape(N, C, H, W)


# ---------------------------------------------------------------------------
# Reference + self-test
# ---------------------------------------------------------------------------
def reference(x, conv_w):
    pad = conv_w.shape[-1] // 2
    avg = jnp.mean(x, axis=1, keepdims=True)
    mx = jnp.max(x, axis=1, keepdims=True)
    att = jnp.concatenate([avg, mx], axis=1)
    conv = jax.lax.conv_general_dilated(
        att, conv_w, window_strides=(1, 1), padding=((pad, pad), (pad, pad)),
        dimension_numbers=("NCHW", "OIHW", "NCHW"))
    return x * jax.nn.sigmoid(conv)


if __name__ == "__main__":
    key = jax.random.PRNGKey(0)
    kx, kw = jax.random.split(key)

    N, C, H, W = 2, 4, 16, 16
    K = 7
    x = jax.random.normal(kx, (N, C, H, W), dtype=jnp.float32)

    # Deterministic Conv2d(2, 1, 7, bias=False)-style init (1/sqrt(fan_in)).
    fan_in = 2 * K * K
    bound = 1.0 / (fan_in ** 0.5)
    conv_w = jax.random.uniform(kw, (1, 2, K, K), jnp.float32, -bound, bound)

    ref = reference(x, conv_w)

    # Fused single-pass path (the batch slab easily fits VMEM at this size).
    out_fused = jax.block_until_ready(spatial_attention(x, conv_w))
    assert out_fused.shape == (N, C, H, W)
    err = float(jnp.max(jnp.abs(out_fused - ref)))
    assert jnp.allclose(out_fused, ref, atol=1e-4, rtol=1e-4), err

    # Tiled path (channel reduce + fused conv/multiply), forced for coverage.
    out_tiled = jax.block_until_ready(spatial_attention(x, conv_w, fused_ok=False))
    err = float(jnp.max(jnp.abs(out_tiled - ref)))
    assert jnp.allclose(out_tiled, ref, atol=1e-4, rtol=1e-4), err

    print("KERNEL_OK")
</pallas_src>

<mosaic_0001>
module attributes {stable_mosaic.version = 11 : i64} {
  func.func @_fused_kernel(%arg0: i32, %arg1: memref<98xf32, #tpu.memory_space<smem>>, %arg2: memref<2x256xi32, #tpu.memory_space<vmem>>, %arg3: memref<1x4x256xf32, #tpu.memory_space<vmem>>, %arg4: memref<1x4x256xf32, #tpu.memory_space<vmem>>, %arg5: memref<2x358xf32, #tpu.memory_space<vmem>>) attributes {dimension_semantics = [#tpu.dimension_semantics<parallel>], iteration_bounds = array<i64: 2>, scalar_prefetch = 0 : i64, scratch_operands = 1 : i64, tpu.core_type = #tpu.core_type<tc>, window_params = [{transform_indices = @transform_0, window_bounds = array<i64: 98>}, {pipeline_mode = #tpu.pipeline_mode<synchronous>, transform_indices = @transform_1, window_bounds = array<i64: 2, 256>}, {transform_indices = @transform_2, window_bounds = array<i64: 1, 4, 256>}, {transform_indices = @transform_3, window_bounds = array<i64: 1, 4, 256>}]} {
    %c0 = arith.constant 0 : index
    %c0_0 = arith.constant 0 : index
    %c0_1 = arith.constant 0 : index
    %0 = vector.load %arg3[%c0, %c0_0, %c0_1] : memref<1x4x256xf32, #tpu.memory_space<vmem>>, vector<1x4x256xf32>
    %1 = vector.shape_cast %0 : vector<1x4x256xf32> to vector<4x256xf32>
    %cst = arith.constant dense<0.000000e+00> : vector<256xf32>
    %2 = vector.multi_reduction <add>, %1, %cst [0] : vector<4x256xf32> to vector<256xf32>
    %3 = vector.shape_cast %2 : vector<256xf32> to vector<1x256xf32>
    %c0_2 = arith.constant 0 : index
    %c51 = arith.constant 51 : index
    %4 = vector.load %arg5[%c0_2, %c51] : memref<2x358xf32, #tpu.memory_space<vmem>>, vector<1x256xf32>
    tpu.vector_store %arg5[%c0_2, %c51], %3 {strides = array<i32>} : memref<2x358xf32, #tpu.memory_space<vmem>>, vector<1x256xf32>,
    %cst_3 = arith.constant dense<0xFF800000> : vector<256xf32>
    %5 = vector.multi_reduction <maximumf>, %1, %cst_3 [0] : vector<4x256xf32> to vector<256xf32>
    %6 = vector.shape_cast %5 : vector<256xf32> to vector<1x256xf32>
    %c1 = arith.constant 1 : index
    %c51_4 = arith.constant 51 : index
    %7 = vector.load %arg5[%c1, %c51_4] : memref<2x358xf32, #tpu.memory_space<vmem>>, vector<1x256xf32>
    tpu.vector_store %arg5[%c1, %c51_4], %6 {strides = array<i32>} : memref<2x358xf32, #tpu.memory_space<vmem>>, vector<1x256xf32>,
    %c0_5 = arith.constant 0 : index
    %c0_6 = arith.constant 0 : index
    %8 = vector.load %arg2[%c0_5, %c0_6] : memref<2x256xi32, #tpu.memory_space<vmem>>, vector<1x256xi32>
    %c1_7 = arith.constant 1 : index
    %c0_8 = arith.constant 0 : index
    %9 = vector.load %arg2[%c1_7, %c0_8] : memref<2x256xi32, #tpu.memory_space<vmem>>, vector<1x256xi32>
    %cst_9 = arith.constant 0.000000e+00 : f32
    %10 = vector.broadcast %cst_9 : f32 to vector<1x256xf32>
    %c-3_i32 = arith.constant -3 : i32
    %11 = vector.broadcast %c-3_i32 : i32 to vector<1x256xi32>
    %12 = arith.addi %8, %11 : vector<1x256xi32>
    %c0_i32 = arith.constant 0 : i32
    %13 = vector.broadcast %c0_i32 : i32 to vector<1x256xi32>
    %14 = arith.cmpi sge, %12, %13 : vector<1x256xi32>
    %c-3_i32_10 = arith.constant -3 : i32
    %15 = vector.broadcast %c-3_i32_10 : i32 to vector<1x256xi32>
    %16 = arith.addi %8, %15 : vector<1x256xi32>
    %c16_i32 = arith.constant 16 : i32
    %17 = vector.broadcast %c16_i32 : i32 to vector<1x256xi32>
    %18 = arith.cmpi slt, %16, %17 : vector<1x256xi32>
    %19 = arith.andi %14, %18 : vector<1x256xi1>
    %c-3_i32_11 = arith.constant -3 : i32
    %20 = vector.broadcast %c-3_i32_11 : i32 to vector<1x256xi32>
    %21 = arith.addi %9, %20 : vector<1x256xi32>
    %c0_i32_12 = arith.constant 0 : i32
    %22 = vector.broadcast %c0_i32_12 : i32 to vector<1x256xi32>
    %23 = arith.cmpi sge, %21, %22 : vector<1x256xi32>
    %c-3_i32_13 = arith.constant -3 : i32
    %24 = vector.broadcast %c-3_i32_13 : i32 to vector<1x256xi32>
    %25 = arith.addi %9, %24 : vector<1x256xi32>
    %c16_i32_14 = arith.constant 16 : i32
    %26 = vector.broadcast %c16_i32_14 : i32 to vector<1x256xi32>
    %27 = arith.cmpi slt, %25, %26 : vector<1x256xi32>
    %28 = arith.andi %23, %27 : vector<1x256xi1>
    %29 = arith.andi %19, %28 : vector<1x256xi1>
    %c0_15 = arith.constant 0 : index
    %c0_16 = arith.constant 0 : index
    %30 = vector.load %arg5[%c0_15, %c0_16] : memref<2x358xf32, #tpu.memory_space<vmem>>, vector<1x256xf32>
    %c0_17 = arith.constant 0 : index
    %31 = memref.load %arg1[%c0_17] : memref<98xf32, #tpu.memory_space<smem>>
    %cst_18 = arith.constant 0.000000e+00 : f32
    %32 = vector.broadcast %cst_18 : f32 to vector<1x256xf32>
    %33 = arith.select %29, %30, %32 : vector<1x256xi1>, vector<1x256xf32>
    %34 = vector.broadcast %31 : f32 to vector<1x256xf32>
    %35 = arith.mulf %33, %34 : vector<1x256xf32>
    %36 = arith.addf %10, %35 : vector<1x256xf32>
    %c-2_i32 = arith.constant -2 : i32
    %37 = vector.broadcast %c-2_i32 : i32 to vector<1x256xi32>
    %38 = arith.addi %9, %37 : vector<1x256xi32>
    %c0_i32_19 = arith.constant 0 : i32
    %39 = vector.broadcast %c0_i32_19 : i32 to vector<1x256xi32>
    %40 = arith.cmpi sge, %38, %39 : vector<1x256xi32>
    %c-2_i32_20 = arith.constant -2 : i32
    %41 = vector.broadcast %c-2_i32_20 : i32 to vector<1x256xi32>
    %42 = arith.addi %9, %41 : vector<1x256xi32>
    %c16_i32_21 = arith.constant 16 : i32
    %43 = vector.broadcast %c16_i32_21 : i32 to vector<1x256xi32>
    %44 = arith.cmpi slt, %42, %43 : vector<1x256xi32>
    %45 = arith.andi %40, %44 : vector<1x256xi1>
    %46 = arith.andi %19, %45 : vector<1x256xi1>
    %c0_22 = arith.constant 0 : index
    %c1_23 = arith.constant 1 : index
    %47 = vector.load %arg5[%c0_22, %c1_23] : memref<2x358xf32, #tpu.memory_space<vmem>>, vector<1x256xf32>
    %c1_24 = arith.constant 1 : index
    %48 = memref.load %arg1[%c1_24] : memref<98xf32, #tpu.memory_space<smem>>
    %cst_25 = arith.constant 0.000000e+00 : f32
    %49 = vector.broadcast %cst_25 : f32 to vector<1x256xf32>
    %50 = arith.select %46, %47, %49 : vector<1x256xi1>, vector<1x256xf32>
    %51 = vector.broadcast %48 : f32 to vector<1x256xf32>
    %52 = arith.mulf %50, %51 : vector<1x256xf32>
    %53 = arith.addf %36, %52 : vector<1x256xf32>
    %c-1_i32 = arith.constant -1 : i32
    %54 = vector.broadcast %c-1_i32 : i32 to vector<1x256xi32>
    %55 = arith.addi %9, %54 : vector<1x256xi32>
    %c0_i32_26 = arith.constant 0 : i32
    %56 = vector.broadcast %c0_i32_26 : i32 to vector<1x256xi32>
    %57 = arith.cmpi sge, %55, %56 : vector<1x256xi32>
    %c-1_i32_27 = arith.constant -1 : i32
    %58 = vector.broadcast %c-1_i32_27 : i32 to vector<1x256xi32>
    %59 = arith.addi %9, %58 : vector<1x256xi32>
    %c16_i32_28 = arith.constant 16 : i32
    %60 = vector.broadcast %c16_i32_28 : i32 to vector<1x256xi32>
    %61 = arith.cmpi slt, %59, %60 : vector<1x256xi32>
    %62 = arith.andi %57, %61 : vector<1x256xi1>
    %63 = arith.andi %19, %62 : vector<1x256xi1>
    %c0_29 = arith.constant 0 : index
    %c2 = arith.constant 2 : index
    %64 = vector.load %arg5[%c0_29, %c2] : memref<2x358xf32, #tpu.memory_space<vmem>>, vector<1x256xf32>
    %c2_30 = arith.constant 2 : index
    %65 = memref.load %arg1[%c2_30] : memref<98xf32, #tpu.memory_space<smem>>
    %cst_31 = arith.constant 0.000000e+00 : f32
    %66 = vector.broadcast %cst_31 : f32 to vector<1x256xf32>
    %67 = arith.select %63, %64, %66 : vector<1x256xi1>, vector<1x256xf32>
    %68 = vector.broadcast %65 : f32 to vector<1x256xf32>
    %69 = arith.mulf %67, %68 : vector<1x256xf32>
    %70 = arith.addf %53, %69 : vector<1x256xf32>
    %c0_i32_32 = arith.constant 0 : i32
    %71 = vector.broadcast %c0_i32_32 : i32 to vector<1x256xi32>
    %72 = arith.addi %9, %71 : vector<1x256xi32>
    %c0_i32_33 = arith.constant 0 : i32
    %73 = vector.broadcast %c0_i32_33 : i32 to vector<1x256xi32>
    %74 = arith.cmpi sge, %72, %73 : vector<1x256xi32>
    %c0_i32_34 = arith.constant 0 : i32
    %75 = vector.broadcast %c0_i32_34 : i32 to vector<1x256xi32>
    %76 = arith.addi %9, %75 : vector<1x256xi32>
    %c16_i32_35 = arith.constant 16 : i32
    %77 = vector.broadcast %c16_i32_35 : i32 to vector<1x256xi32>
    %78 = arith.cmpi slt, %76, %77 : vector<1x256xi32>
    %79 = arith.andi %74, %78 : vector<1x256xi1>
    %80 = arith.andi %19, %79 : vector<1x256xi1>
    %c0_36 = arith.constant 0 : index
    %c3 = arith.constant 3 : index
    %81 = vector.load %arg5[%c0_36, %c3] : memref<2x358xf32, #tpu.memory_space<vmem>>, vector<1x256xf32>
    %c3_37 = arith.constant 3 : index
    %82 = memref.load %arg1[%c3_37] : memref<98xf32, #tpu.memory_space<smem>>
    %cst_38 = arith.constant 0.000000e+00 : f32
    %83 = vector.broadcast %cst_38 : f32 to vector<1x256xf32>
    %84 = arith.select %80, %81, %83 : vector<1x256xi1>, vector<1x256xf32>
    %85 = vector.broadcast %82 : f32 to vector<1x256xf32>
    %86 = arith.mulf %84, %85 : vector<1x256xf32>
    %87 = arith.addf %70, %86 : vector<1x256xf32>
    %c1_i32 = arith.constant 1 : i32
    %88 = vector.broadcast %c1_i32 : i32 to vector<1x256xi32>
    %89 = arith.addi %9, %88 : vector<1x256xi32>
    %c0_i32_39 = arith.constant 0 : i32
    %90 = vector.broadcast %c0_i32_39 : i32 to vector<1x256xi32>
    %91 = arith.cmpi sge, %89, %90 : vector<1x256xi32>
    %c1_i32_40 = arith.constant 1 : i32
    %92 = vector.broadcast %c1_i32_40 : i32 to vector<1x256xi32>
    %93 = arith.addi %9, %92 : vector<1x256xi32>
    %c16_i32_41 = arith.constant 16 : i32
    %94 = vector.broadcast %c16_i32_41 : i32 to vector<1x256xi32>
    %95 = arith.cmpi slt, %93, %94 : vector<1x256xi32>
    %96 = arith.andi %91, %95 : vector<1x256xi1>
    %97 = arith.andi %19, %96 : vector<1x256xi1>
    %c0_42 = arith.constant 0 : index
    %c4 = arith.constant 4 : index
    %98 = vector.load %arg5[%c0_42, %c4] : memref<2x358xf32, #tpu.memory_space<vmem>>, vector<1x256xf32>
    %c4_43 = arith.constant 4 : index
    %99 = memref.load %arg1[%c4_43] : memref<98xf32, #tpu.memory_space<smem>>
    %cst_44 = arith.constant 0.000000e+00 : f32
    %100 = vector.broadcast %cst_44 : f32 to vector<1x256xf32>
    %101 = arith.select %97, %98, %100 : vector<1x256xi1>, vector<1x256xf32>
    %102 = vector.broadcast %99 : f32 to vector<1x256xf32>
    %103 = arith.mulf %101, %102 : vector<1x256xf32>
    %104 = arith.addf %87, %103 : vector<1x256xf32>
    %c2_i32 = arith.constant 2 : i32
    %105 = vector.broadcast %c2_i32 : i32 to vector<1x256xi32>
    %106 = arith.addi %9, %105 : vector<1x256xi32>
    %c0_i32_45 = arith.constant 0 : i32
    %107 = vector.broadcast %c0_i32_45 : i32 to vector<1x256xi32>
    %108 = arith.cmpi sge, %106, %107 : vector<1x256xi32>
    %c2_i32_46 = arith.constant 2 : i32
    %109 = vector.broadcast %c2_i32_46 : i32 to vector<1x256xi32>
    %110 = arith.addi %9, %109 : vector<1x256xi32>
    %c16_i32_47 = arith.constant 16 : i32
    %111 = vector.broadcast %c16_i32_47 : i32 to vector<1x256xi32>
    %112 = arith.cmpi slt, %110, %111 : vector<1x256xi32>
    %113 = arith.andi %108, %112 : vector<1x256xi1>
    %114 = arith.andi %19, %113 : vector<1x256xi1>
    %c0_48 = arith.constant 0 : index
    %c5 = arith.constant 5 : index
    %115 = vector.load %arg5[%c0_48, %c5] : memref<2x358xf32, #tpu.memory_space<vmem>>, vector<1x256xf32>
    %c5_49 = arith.constant 5 : index
    %116 = memref.load %arg1[%c5_49] : memref<98xf32, #tpu.memory_space<smem>>
    %cst_50 = arith.constant 0.000000e+00 : f32
    %117 = vector.broadcast %cst_50 : f32 to vector<1x256xf32>
    %118 = arith.select %114, %115, %117 : vector<1x256xi1>, vector<1x256xf32>
    %119 = vector.broadcast %116 : f32 to vector<1x256xf32>
    %120 = arith.mulf %118, %119 : vector<1x256xf32>
    %121 = arith.addf %104, %120 : vector<1x256xf32>
    %c3_i32 = arith.constant 3 : i32
    %122 = vector.broadcast %c3_i32 : i32 to vector<1x256xi32>
    %123 = arith.addi %9, %122 : vector<1x256xi32>
    %c0_i32_51 = arith.constant 0 : i32
    %124 = vector.broadcast %c0_i32_51 : i32 to vector<1x256xi32>
    %125 = arith.cmpi sge, %123, %124 : vector<1x256xi32>
    %c3_i32_52 = arith.constant 3 : i32
    %126 = vector.broadcast %c3_i32_52 : i32 to vector<1x256xi32>
    %127 = arith.addi %9, %126 : vector<1x256xi32>
    %c16_i32_53 = arith.constant 16 : i32
    %128 = vector.broadcast %c16_i32_53 : i32 to vector<1x256xi32>
    %129 = arith.cmpi slt, %127, %128 : vector<1x256xi32>
    %130 = arith.andi %125, %129 : vector<1x256xi1>
    %131 = arith.andi %19, %130 : vector<1x256xi1>
    %c0_54 = arith.constant 0 : index
    %c6 = arith.constant 6 : index
    %132 = vector.load %arg5[%c0_54, %c6] : memref<2x358xf32, #tpu.memory_space<vmem>>, vector<1x256xf32>
    %c6_55 = arith.constant 6 : index
    %133 = memref.load %arg1[%c6_55] : memref<98xf32, #tpu.memory_space<smem>>
    %cst_56 = arith.constant 0.000000e+00 : f32
    %134 = vector.broadcast %cst_56 : f32 to vector<1x256xf32>
    %135 = arith.select %131, %132, %134 : vector<1x256xi1>, vector<1x256xf32>
    %136 = vector.broadcast %133 : f32 to vector<1x256xf32>
    %137 = arith.mulf %135, %136 : vector<1x256xf32>
    %138 = arith.addf %121, %137 : vector<1x256xf32>
    %c-2_i32_57 = arith.constant -2 : i32
    %139 = vector.broadcast %c-2_i32_57 : i32 to vector<1x256xi32>
    %140 = arith.addi %8, %139 : vector<1x256xi32>
    %c0_i32_58 = arith.constant 0 : i32
    %141 = vector.broadcast %c0_i32_58 : i32 to vector<1x256xi32>
    %142 = arith.cmpi sge, %140, %141 : vector<1x256xi32>
    %c-2_i32_59 = arith.constant -2 : i32
    %143 = vector.broadcast %c-2_i32_59 : i32 to vector<1x256xi32>
    %144 = arith.addi %8, %143 : vector<1x256xi32>
    %c16_i32_60 = arith.constant 16 : i32
    %145 = vector.broadcast %c16_i32_60 : i32 to vector<1x256xi32>
    %146 = arith.cmpi slt, %144, %145 : vector<1x256xi32>
    %147 = arith.andi %142, %146 : vector<1x256xi1>
    %c-3_i32_61 = arith.constant -3 : i32
    %148 = vector.broadcast %c-3_i32_61 : i32 to vector<1x256xi32>
    %149 = arith.addi %9, %148 : vector<1x256xi32>
    %c0_i32_62 = arith.constant 0 : i32
    %150 = vector.broadcast %c0_i32_62 : i32 to vector<1x256xi32>
    %151 = arith.cmpi sge, %149, %150 : vector<1x256xi32>
    %c-3_i32_63 = arith.constant -3 : i32
    %152 = vector.broadcast %c-3_i32_63 : i32 to vector<1x256xi32>
    %153 = arith.addi %9, %152 : vector<1x256xi32>
    %c16_i32_64 = arith.constant 16 : i32
    %154 = vector.broadcast %c16_i32_64 : i32 to vector<1x256xi32>
    %155 = arith.cmpi slt, %153, %154 : vector<1x256xi32>
    %156 = arith.andi %151, %155 : vector<1x256xi1>
    %157 = arith.andi %147, %156 : vector<1x256xi1>
    %c0_65 = arith.constant 0 : index
    %c16 = arith.constant 16 : index
    %158 = vector.load %arg5[%c0_65, %c16] : memref<2x358xf32, #tpu.memory_space<vmem>>, vector<1x256xf32>
    %c7 = arith.constant 7 : index
    %159 = memref.load %arg1[%c7] : memref<98xf32, #tpu.memory_space<smem>>
    %cst_66 = arith.constant 0.000000e+00 : f32
    %160 = vector.broadcast %cst_66 : f32 to vector<1x256xf32>
    %161 = arith.select %157, %158, %160 : vector<1x256xi1>, vector<1x256xf32>
    %162 = vector.broadcast %159 : f32 to vector<1x256xf32>
    %163 = arith.mulf %161, %162 : vector<1x256xf32>
    %164 = arith.addf %138, %163 : vector<1x256xf32>
    %c-2_i32_67 = arith.constant -2 : i32
    %165 = vector.broadcast %c-2_i32_67 : i32 to vector<1x256xi32>
    %166 = arith.addi %9, %165 : vector<1x256xi32>
    %c0_i32_68 = arith.constant 0 : i32
    %167 = vector.broadcast %c0_i32_68 : i32 to vector<1x256xi32>
    %168 = arith.cmpi sge, %166, %167 : vector<1x256xi32>
    %c-2_i32_69 = arith.constant -2 : i32
    %169 = vector.broadcast %c-2_i32_69 : i32 to vector<1x256xi32>
    %170 = arith.addi %9, %169 : vector<1x256xi32>
    %c16_i32_70 = arith.constant 16 : i32
    %171 = vector.broadcast %c16_i32_70 : i32 to vector<1x256xi32>
    %172 = arith.cmpi slt, %170, %171 : vector<1x256xi32>
    %173 = arith.andi %168, %172 : vector<1x256xi1>
    %174 = arith.andi %147, %173 : vector<1x256xi1>
    %c0_71 = arith.constant 0 : index
    %c17 = arith.constant 17 : index
    %175 = vector.load %arg5[%c0_71, %c17] : memref<2x358xf32, #tpu.memory_space<vmem>>, vector<1x256xf32>
    %c8 = arith.constant 8 : index
    %176 = memref.load %arg1[%c8] : memref<98xf32, #tpu.memory_space<smem>>
    %cst_72 = arith.constant 0.000000e+00 : f32
    %177 = vector.broadcast %cst_72 : f32 to vector<1x256xf32>
    %178 = arith.select %174, %175, %177 : vector<1x256xi1>, vector<1x256xf32>
    %179 = vector.broadcast %176 : f32 to vector<1x256xf32>
    %180 = arith.mulf %178, %179 : vector<1x256xf32>
    %181 = arith.addf %164, %180 : vector<1x256xf32>
    %c-1_i32_73 = arith.constant -1 : i32
    %182 = vector.broadcast %c-1_i32_73 : i32 to vector<1x256xi32>
    %183 = arith.addi %9, %182 : vector<1x256xi32>
    %c0_i32_74 = arith.constant 0 : i32
    %184 = vector.broadcast %c0_i32_74 : i32 to vector<1x256xi32>
    %185 = arith.cmpi sge, %183, %184 : vector<1x256xi32>
    %c-1_i32_75 = arith.constant -1 : i32
    %186 = vector.broadcast %c-1_i32_75 : i32 to vector<1x256xi32>
    %187 = arith.addi %9, %186 : vector<1x256xi32>
    %c16_i32_76 = arith.constant 16 : i32
    %188 = vector.broadcast %c16_i32_76 : i32 to vector<1x256xi32>
    %189 = arith.cmpi slt, %187, %188 : vector<1x256xi32>
    %190 = arith.andi %185, %189 : vector<1x256xi1>
    %191 = arith.andi %147, %190 : vector<1x256xi1>
    %c0_77 = arith.constant 0 : index
    %c18 = arith.constant 18 : index
    %192 = vector.load %arg5[%c0_77, %c18] : memref<2x358xf32, #tpu.memory_space<vmem>>, vector<1x256xf32>
    %c9 = arith.constant 9 : index
    %193 = memref.load %arg1[%c9] : memref<98xf32, #tpu.memory_space<smem>>
    %cst_78 = arith.constant 0.000000e+00 : f32
    %194 = vector.broadcast %cst_78 : f32 to vector<1x256xf32>
    %195 = arith.select %191, %192, %194 : vector<1x256xi1>, vector<1x256xf32>
    %196 = vector.broadcast %193 : f32 to vector<1x256xf32>
    %197 = arith.mulf %195, %196 : vector<1x256xf32>
    %198 = arith.addf %181, %197 : vector<1x256xf32>
    %c0_i32_79 = arith.constant 0 : i32
    %199 = vector.broadcast %c0_i32_79 : i32 to vector<1x256xi32>
    %200 = arith.addi %9, %199 : vector<1x256xi32>
    %c0_i32_80 = arith.constant 0 : i32
    %201 = vector.broadcast %c0_i32_80 : i32 to vector<1x256xi32>
    %202 = arith.cmpi sge, %200, %201 : vector<1x256xi32>
    %c0_i32_81 = arith.constant 0 : i32
    %203 = vector.broadcast %c0_i32_81 : i32 to vector<1x256xi32>
    %204 = arith.addi %9, %203 : vector<1x256xi32>
    %c16_i32_82 = arith.constant 16 : i32
    %205 = vector.broadcast %c16_i32_82 : i32 to vector<1x256xi32>
    %206 = arith.cmpi slt, %204, %205 : vector<1x256xi32>
    %207 = arith.andi %202, %206 : vector<1x256xi1>
    %208 = arith.andi %147, %207 : vector<1x256xi1>
    %c0_83 = arith.constant 0 : index
    %c19 = arith.constant 19 : index
    %209 = vector.load %arg5[%c0_83, %c19] : memref<2x358xf32, #tpu.memory_space<vmem>>, vector<1x256xf32>
    %c10 = arith.constant 10 : index
    %210 = memref.load %arg1[%c10] : memref<98xf32, #tpu.memory_space<smem>>
    %cst_84 = arith.constant 0.000000e+00 : f32
    %211 = vector.broadcast %cst_84 : f32 to vector<1x256xf32>
    %212 = arith.select %208, %209, %211 : vector<1x256xi1>, vector<1x256xf32>
    %213 = vector.broadcast %210 : f32 to vector<1x256xf32>
    %214 = arith.mulf %212, %213 : vector<1x256xf32>
    %215 = arith.addf %198, %214 : vector<1x256xf32>
    %c1_i32_85 = arith.constant 1 : i32
    %216 = vector.broadcast %c1_i32_85 : i32 to vector<1x256xi32>
    %217 = arith.addi %9, %216 : vector<1x256xi32>
    %c0_i32_86 = arith.constant 0 : i32
    %218 = vector.broadcast %c0_i32_86 : i32 to vector<1x256xi32>
    %219 = arith.cmpi sge, %217, %218 : vector<1x256xi32>
    %c1_i32_87 = arith.constant 1 : i32
    %220 = vector.broadcast %c1_i32_87 : i32 to vector<1x256xi32>
    %221 = arith.addi %9, %220 : vector<1x256xi32>
    %c16_i32_88 = arith.constant 16 : i32
    %222 = vector.broadcast %c16_i32_88 : i32 to vector<1x256xi32>
    %223 = arith.cmpi slt, %221, %222 : vector<1x256xi32>
    %224 = arith.andi %219, %223 : vector<1x256xi1>
    %225 = arith.andi %147, %224 : vector<1x256xi1>
    %c0_89 = arith.constant 0 : index
    %c20 = arith.constant 20 : index
    %226 = vector.load %arg5[%c0_89, %c20] : memref<2x358xf32, #tpu.memory_space<vmem>>, vector<1x256xf32>
    %c11 = arith.constant 11 : index
    %227 = memref.load %arg1[%c11] : memref<98xf32, #tpu.memory_space<smem>>
    %cst_90 = arith.constant 0.000000e+00 : f32
    %228 = vector.broadcast %cst_90 : f32 to vector<1x256xf32>
    %229 = arith.select %225, %226, %228 : vector<1x256xi1>, vector<1x256xf32>
    %230 = vector.broadcast %227 : f32 to vector<1x256xf32>
    %231 = arith.mulf %229, %230 : vector<1x256xf32>
    %232 = arith.addf %215, %231 : vector<1x256xf32>
    %c2_i32_91 = arith.constant 2 : i32
    %233 = vector.broadcast %c2_i32_91 : i32 to vector<1x256xi32>
    %234 = arith.addi %9, %233 : vector<1x256xi32>
    %c0_i32_92 = arith.constant 0 : i32
    %235 = vector.broadcast %c0_i32_92 : i32 to vector<1x256xi32>
    %236 = arith.cmpi sge, %234, %235 : vector<1x256xi32>
    %c2_i32_93 = arith.constant 2 : i32
    %237 = vector.broadcast %c2_i32_93 : i32 to vector<1x256xi32>
    %238 = arith.addi %9, %237 : vector<1x256xi32>
    %c16_i32_94 = arith.constant 16 : i32
    %239 = vector.broadcast %c16_i32_94 : i32 to vector<1x256xi32>
    %240 = arith.cmpi slt, %238, %239 : vector<1x256xi32>
    %241 = arith.andi %236, %240 : vector<1x256xi1>
    %242 = arith.andi %147, %241 : vector<1x256xi1>
    %c0_95 = arith.constant 0 : index
    %c21 = arith.constant 21 : index
    %243 = vector.load %arg5[%c0_95, %c21] : memref<2x358xf32, #tpu.memory_space<vmem>>, vector<1x256xf32>
    %c12 = arith.constant 12 : index
    %244 = memref.load %arg1[%c12] : memref<98xf32, #tpu.memory_space<smem>>
    %cst_96 = arith.constant 0.000000e+00 : f32
    %245 = vector.broadcast %cst_96 : f32 to vector<1x256xf32>
    %246 = arith.select %242, %243, %245 : vector<1x256xi1>, vector<1x256xf32>
    %247 = vector.broadcast %244 : f32 to vector<1x256xf32>
    %248 = arith.mulf %246, %247 : vector<1x256xf32>
    %249 = arith.addf %232, %248 : vector<1x256xf32>
    %c3_i32_97 = arith.constant 3 : i32
    %250 = vector.broadcast %c3_i32_97 : i32 to vector<1x256xi32>
    %251 = arith.addi %9, %250 : vector<1x256xi32>
    %c0_i32_98 = arith.constant 0 : i32
    %252 = vector.broadcast %c0_i32_98 : i32 to vector<1x256xi32>
    %253 = arith.cmpi sge, %251, %252 : vector<1x256xi32>
    %c3_i32_99 = arith.constant 3 : i32
    %254 = vector.broadcast %c3_i32_99 : i32 to vector<1x256xi32>
    %255 = arith.addi %9, %254 : vector<1x256xi32>
    %c16_i32_100 = arith.constant 16 : i32
    %256 = vector.broadcast %c16_i32_100 : i32 to vector<1x256xi32>
    %257 = arith.cmpi slt, %255, %256 : vector<1x256xi32>
    %258 = arith.andi %253, %257 : vector<1x256xi1>
    %259 = arith.andi %147, %258 : vector<1x256xi1>
    %c0_101 = arith.constant 0 : index
    %c22 = arith.constant 22 : index
    %260 = vector.load %arg5[%c0_101, %c22] : memref<2x358xf32, #tpu.memory_space<vmem>>, vector<1x256xf32>
    %c13 = arith.constant 13 : index
    %261 = memref.load %arg1[%c13] : memref<98xf32, #tpu.memory_space<smem>>
    %cst_102 = arith.constant 0.000000e+00 : f32
    %262 = vector.broadcast %cst_102 : f32 to vector<1x256xf32>
    %263 = arith.select %259, %260, %262 : vector<1x256xi1>, vector<1x256xf32>
    %264 = vector.broadcast %261 : f32 to vector<1x256xf32>
    %265 = arith.mulf %263, %264 : vector<1x256xf32>
    %266 = arith.addf %249, %265 : vector<1x256xf32>
    %c-1_i32_103 = arith.constant -1 : i32
    %267 = vector.broadcast %c-1_i32_103 : i32 to vector<1x256xi32>
    %268 = arith.addi %8, %267 : vector<1x256xi32>
    %c0_i32_104 = arith.constant 0 : i32
    %269 = vector.broadcast %c0_i32_104 : i32 to vector<1x256xi32>
    %270 = arith.cmpi sge, %268, %269 : vector<1x256xi32>
    %c-1_i32_105 = arith.constant -1 : i32
    %271 = vector.broadcast %c-1_i32_105 : i32 to vector<1x256xi32>
    %272 = arith.addi %8, %271 : vector<1x256xi32>
    %c16_i32_106 = arith.constant 16 : i32
    %273 = vector.broadcast %c16_i32_106 : i32 to vector<1x256xi32>
    %274 = arith.cmpi slt, %272, %273 : vector<1x256xi32>
    %275 = arith.andi %270, %274 : vector<1x256xi1>
    %c-3_i32_107 = arith.constant -3 : i32
    %276 = vector.broadcast %c-3_i32_107 : i32 to vector<1x256xi32>
    %277 = arith.addi %9, %276 : vector<1x256xi32>
    %c0_i32_108 = arith.constant 0 : i32
    %278 = vector.broadcast %c0_i32_108 : i32 to vector<1x256xi32>
    %279 = arith.cmpi sge, %277, %278 : vector<1x256xi32>
    %c-3_i32_109 = arith.constant -3 : i32
    %280 = vector.broadcast %c-3_i32_109 : i32 to vector<1x256xi32>
    %281 = arith.addi %9, %280 : vector<1x256xi32>
    %c16_i32_110 = arith.constant 16 : i32
    %282 = vector.broadcast %c16_i32_110 : i32 to vector<1x256xi32>
    %283 = arith.cmpi slt, %281, %282 : vector<1x256xi32>
    %284 = arith.andi %279, %283 : vector<1x256xi1>
    %285 = arith.andi %275, %284 : vector<1x256xi1>
    %c0_111 = arith.constant 0 : index
    %c32 = arith.constant 32 : index
    %286 = vector.load %arg5[%c0_111, %c32] : memref<2x358xf32, #tpu.memory_space<vmem>>, vector<1x256xf32>
    %c14 = arith.constant 14 : index
    %287 = memref.load %arg1[%c14] : memref<98xf32, #tpu.memory_space<smem>>
    %cst_112 = arith.constant 0.000000e+00 : f32
    %288 = vector.broadcast %cst_112 : f32 to vector<1x256xf32>
    %289 = arith.select %285, %286, %288 : vector<1x256xi1>, vector<1x256xf32>
    %290 = vector.broadcast %287 : f32 to vector<1x256xf32>
    %291 = arith.mulf %289, %290 : vector<1x256xf32>
    %292 = arith.addf %266, %291 : vector<1x256xf32>
    %c-2_i32_113 = arith.constant -2 : i32
    %293 = vector.broadcast %c-2_i32_113 : i32 to vector<1x256xi32>
    %294 = arith.addi %9, %293 : vector<1x256xi32>
    %c0_i32_114 = arith.constant 0 : i32
    %295 = vector.broadcast %c0_i32_114 : i32 to vector<1x256xi32>
    %296 = arith.cmpi sge, %294, %295 : vector<1x256xi32>
    %c-2_i32_115 = arith.constant -2 : i32
    %297 = vector.broadcast %c-2_i32_115 : i32 to vector<1x256xi32>
    %298 = arith.addi %9, %297 : vector<1x256xi32>
    %c16_i32_116 = arith.constant 16 : i32
    %299 = vector.broadcast %c16_i32_116 : i32 to vector<1x256xi32>
    %300 = arith.cmpi slt, %298, %299 : vector<1x256xi32>
    %301 = arith.andi %296, %300 : vector<1x256xi1>
    %302 = arith.andi %275, %301 : vector<1x256xi1>
    %c0_117 = arith.constant 0 : index
    %c33 = arith.constant 33 : index
    %303 = vector.load %arg5[%c0_117, %c33] : memref<2x358xf32, #tpu.memory_space<vmem>>, vector<1x256xf32>
    %c15 = arith.constant 15 : index
    %304 = memref.load %arg1[%c15] : memref<98xf32, #tpu.memory_space<smem>>
    %cst_118 = arith.constant 0.000000e+00 : f32
    %305 = vector.broadcast %cst_118 : f32 to vector<1x256xf32>
    %306 = arith.select %302, %303, %305 : vector<1x256xi1>, vector<1x256xf32>
    %307 = vector.broadcast %304 : f32 to vector<1x256xf32>
    %308 = arith.mulf %306, %307 : vector<1x256xf32>
    %309 = arith.addf %292, %308 : vector<1x256xf32>
    %c-1_i32_119 = arith.constant -1 : i32
    %310 = vector.broadcast %c-1_i32_119 : i32 to vector<1x256xi32>
    %311 = arith.addi %9, %310 : vector<1x256xi32>
    %c0_i32_120 = arith.constant 0 : i32
    %312 = vector.broadcast %c0_i32_120 : i32 to vector<1x256xi32>
    %313 = arith.cmpi sge, %311, %312 : vector<1x256xi32>
    %c-1_i32_121 = arith.constant -1 : i32
    %314 = vector.broadcast %c-1_i32_121 : i32 to vector<1x256xi32>
    %315 = arith.addi %9, %314 : vector<1x256xi32>
    %c16_i32_122 = arith.constant 16 : i32
    %316 = vector.broadcast %c16_i32_122 : i32 to vector<1x256xi32>
    %317 = arith.cmpi slt, %315, %316 : vector<1x256xi32>
    %318 = arith.andi %313, %317 : vector<1x256xi1>
    %319 = arith.andi %275, %318 : vector<1x256xi1>
    %c0_123 = arith.constant 0 : index
    %c34 = arith.constant 34 : index
    %320 = vector.load %arg5[%c0_123, %c34] : memref<2x358xf32, #tpu.memory_space<vmem>>, vector<1x256xf32>
    %c16_124 = arith.constant 16 : index
    %321 = memref.load %arg1[%c16_124] : memref<98xf32, #tpu.memory_space<smem>>
    %cst_125 = arith.constant 0.000000e+00 : f32
    %322 = vector.broadcast %cst_125 : f32 to vector<1x256xf32>
    %323 = arith.select %319, %320, %322 : vector<1x256xi1>, vector<1x256xf32>
    %324 = vector.broadcast %321 : f32 to vector<1x256xf32>
    %325 = arith.mulf %323, %324 : vector<1x256xf32>
    %326 = arith.addf %309, %325 : vector<1x256xf32>
    %c0_i32_126 = arith.constant 0 : i32
    %327 = vector.broadcast %c0_i32_126 : i32 to vector<1x256xi32>
    %328 = arith.addi %9, %327 : vector<1x256xi32>
    %c0_i32_127 = arith.constant 0 : i32
    %329 = vector.broadcast %c0_i32_127 : i32 to vector<1x256xi32>
    %330 = arith.cmpi sge, %328, %329 : vector<1x256xi32>
    %c0_i32_128 = arith.constant 0 : i32
    %331 = vector.broadcast %c0_i32_128 : i32 to vector<1x256xi32>
    %332 = arith.addi %9, %331 : vector<1x256xi32>
    %c16_i32_129 = arith.constant 16 : i32
    %333 = vector.broadcast %c16_i32_129 : i32 to vector<1x256xi32>
    %334 = arith.cmpi slt, %332, %333 : vector<1x256xi32>
    %335 = arith.andi %330, %334 : vector<1x256xi1>
    %336 = arith.andi %275, %335 : vector<1x256xi1>
    %c0_130 = arith.constant 0 : index
    %c35 = arith.constant 35 : index
    %337 = vector.load %arg5[%c0_130, %c35] : memref<2x358xf32, #tpu.memory_space<vmem>>, vector<1x256xf32>
    %c17_131 = arith.constant 17 : index
    %338 = memref.load %arg1[%c17_131] : memref<98xf32, #tpu.memory_space<smem>>
    %cst_132 = arith.constant 0.000000e+00 : f32
    %339 = vector.broadcast %cst_132 : f32 to vector<1x256xf32>
    %340 = arith.select %336, %337, %339 : vector<1x256xi1>, vector<1x256xf32>
    %341 = vector.broadcast %338 : f32 to vector<1x256xf32>
    %342 = arith.mulf %340, %341 : vector<1x256xf32>
    %343 = arith.addf %326, %342 : vector<1x256xf32>
    %c1_i32_133 = arith.constant 1 : i32
    %344 = vector.broadcast %c1_i32_133 : i32 to vector<1x256xi32>
    %345 = arith.addi %9, %344 : vector<1x256xi32>
    %c0_i32_134 = arith.constant 0 : i32
    %346 = vector.broadcast %c0_i32_134 : i32 to vector<1x256xi32>
    %347 = arith.cmpi sge, %345, %346 : vector<1x256xi32>
    %c1_i32_135 = arith.constant 1 : i32
    %348 = vector.broadcast %c1_i32_135 : i32 to vector<1x256xi32>
    %349 = arith.addi %9, %348 : vector<1x256xi32>
    %c16_i32_136 = arith.constant 16 : i32
    %350 = vector.broadcast %c16_i32_136 : i32 to vector<1x256xi32>
    %351 = arith.cmpi slt, %349, %350 : vector<1x256xi32>
    %352 = arith.andi %347, %351 : vector<1x256xi1>
    %353 = arith.andi %275, %352 : vector<1x256xi1>
    %c0_137 = arith.constant 0 : index
    %c36 = arith.constant 36 : index
    %354 = vector.load %arg5[%c0_137, %c36] : memref<2x358xf32, #tpu.memory_space<vmem>>, vector<1x256xf32>
    %c18_138 = arith.constant 18 : index
    %355 = memref.load %arg1[%c18_138] : memref<98xf32, #tpu.memory_space<smem>>
    %cst_139 = arith.constant 0.000000e+00 : f32
    %356 = vector.broadcast %cst_139 : f32 to vector<1x256xf32>
    %357 = arith.select %353, %354, %356 : vector<1x256xi1>, vector<1x256xf32>
    %358 = vector.broadcast %355 : f32 to vector<1x256xf32>
    %359 = arith.mulf %357, %358 : vector<1x256xf32>
    %360 = arith.addf %343, %359 : vector<1x256xf32>
    %c2_i32_140 = arith.constant 2 : i32
    %361 = vector.broadcast %c2_i32_140 : i32 to vector<1x256xi32>
    %362 = arith.addi %9, %361 : vector<1x256xi32>
    %c0_i32_141 = arith.constant 0 : i32
    %363 = vector.broadcast %c0_i32_141 : i32 to vector<1x256xi32>
    %364 = arith.cmpi sge, %362, %363 : vector<1x256xi32>
    %c2_i32_142 = arith.constant 2 : i32
    %365 = vector.broadcast %c2_i32_142 : i32 to vector<1x256xi32>
    %366 = arith.addi %9, %365 : vector<1x256xi32>
    %c16_i32_143 = arith.constant 16 : i32
    %367 = vector.broadcast %c16_i32_143 : i32 to vector<1x256xi32>
    %368 = arith.cmpi slt, %366, %367 : vector<1x256xi32>
    %369 = arith.andi %364, %368 : vector<1x256xi1>
    %370 = arith.andi %275, %369 : vector<1x256xi1>
    %c0_144 = arith.constant 0 : index
    %c37 = arith.constant 37 : index
    %371 = vector.load %arg5[%c0_144, %c37] : memref<2x358xf32, #tpu.memory_space<vmem>>, vector<1x256xf32>
    %c19_145 = arith.constant 19 : index
    %372 = memref.load %arg1[%c19_145] : memref<98xf32, #tpu.memory_space<smem>>
    %cst_146 = arith.constant 0.000000e+00 : f32
    %373 = vector.broadcast %cst_146 : f32 to vector<1x256xf32>
    %374 = arith.select %370, %371, %373 : vector<1x256xi1>, vector<1x256xf32>
    %375 = vector.broadcast %372 : f32 to vector<1x256xf32>
    %376 = arith.mulf %374, %375 : vector<1x256xf32>
    %377 = arith.addf %360, %376 : vector<1x256xf32>
    %c3_i32_147 = arith.constant 3 : i32
    %378 = vector.broadcast %c3_i32_147 : i32 to vector<1x256xi32>
    %379 = arith.addi %9, %378 : vector<1x256xi32>
    %c0_i32_148 = arith.constant 0 : i32
    %380 = vector.broadcast %c0_i32_148 : i32 to vector<1x256xi32>
    %381 = arith.cmpi sge, %379, %380 : vector<1x256xi32>
    %c3_i32_149 = arith.constant 3 : i32
    %382 = vector.broadcast %c3_i32_149 : i32 to vector<1x256xi32>
    %383 = arith.addi %9, %382 : vector<1x256xi32>
    %c16_i32_150 = arith.constant 16 : i32
    %384 = vector.broadcast %c16_i32_150 : i32 to vector<1x256xi32>
    %385 = arith.cmpi slt, %383, %384 : vector<1x256xi32>
    %386 = arith.andi %381, %385 : vector<1x256xi1>
    %387 = arith.andi %275, %386 : vector<1x256xi1>
    %c0_151 = arith.constant 0 : index
    %c38 = arith.constant 38 : index
    %388 = vector.load %arg5[%c0_151, %c38] : memref<2x358xf32, #tpu.memory_space<vmem>>, vector<1x256xf32>
    %c20_152 = arith.constant 20 : index
    %389 = memref.load %arg1[%c20_152] : memref<98xf32, #tpu.memory_space<smem>>
    %cst_153 = arith.constant 0.000000e+00 : f32
    %390 = vector.broadcast %cst_153 : f32 to vector<1x256xf32>
    %391 = arith.select %387, %388, %390 : vector<1x256xi1>, vector<1x256xf32>
    %392 = vector.broadcast %389 : f32 to vector<1x256xf32>
    %393 = arith.mulf %391, %392 : vector<1x256xf32>
    %394 = arith.addf %377, %393 : vector<1x256xf32>
    %c0_i32_154 = arith.constant 0 : i32
    %395 = vector.broadcast %c0_i32_154 : i32 to vector<1x256xi32>
    %396 = arith.addi %8, %395 : vector<1x256xi32>
    %c0_i32_155 = arith.constant 0 : i32
    %397 = vector.broadcast %c0_i32_155 : i32 to vector<1x256xi32>
    %398 = arith.cmpi sge, %396, %397 : vector<1x256xi32>
    %c0_i32_156 = arith.constant 0 : i32
    %399 = vector.broadcast %c0_i32_156 : i32 to vector<1x256xi32>
    %400 = arith.addi %8, %399 : vector<1x256xi32>
    %c16_i32_157 = arith.constant 16 : i32
    %401 = vector.broadcast %c16_i32_157 : i32 to vector<1x256xi32>
    %402 = arith.cmpi slt, %400, %401 : vector<1x256xi32>
    %403 = arith.andi %398, %402 : vector<1x256xi1>
    %c-3_i32_158 = arith.constant -3 : i32
    %404 = vector.broadcast %c-3_i32_158 : i32 to vector<1x256xi32>
    %405 = arith.addi %9, %404 : vector<1x256xi32>
    %c0_i32_159 = arith.constant 0 : i32
    %406 = vector.broadcast %c0_i32_159 : i32 to vector<1x256xi32>
    %407 = arith.cmpi sge, %405, %406 : vector<1x256xi32>
    %c-3_i32_160 = arith.constant -3 : i32
    %408 = vector.broadcast %c-3_i32_160 : i32 to vector<1x256xi32>
    %409 = arith.addi %9, %408 : vector<1x256xi32>
    %c16_i32_161 = arith.constant 16 : i32
    %410 = vector.broadcast %c16_i32_161 : i32 to vector<1x256xi32>
    %411 = arith.cmpi slt, %409, %410 : vector<1x256xi32>
    %412 = arith.andi %407, %411 : vector<1x256xi1>
    %413 = arith.andi %403, %412 : vector<1x256xi1>
    %c0_162 = arith.constant 0 : index
    %c48 = arith.constant 48 : index
    %414 = vector.load %arg5[%c0_162, %c48] : memref<2x358xf32, #tpu.memory_space<vmem>>, vector<1x256xf32>
    %c21_163 = arith.constant 21 : index
    %415 = memref.load %arg1[%c21_163] : memref<98xf32, #tpu.memory_space<smem>>
    %cst_164 = arith.constant 0.000000e+00 : f32
    %416 = vector.broadcast %cst_164 : f32 to vector<1x256xf32>
    %417 = arith.select %413, %414, %416 : vector<1x256xi1>, vector<1x256xf32>
    %418 = vector.broadcast %415 : f32 to vector<1x256xf32>
    %419 = arith.mulf %417, %418 : vector<1x256xf32>
    %420 = arith.addf %394, %419 : vector<1x256xf32>
    %c-2_i32_165 = arith.constant -2 : i32
    %421 = vector.broadcast %c-2_i32_165 : i32 to vector<1x256xi32>
    %422 = arith.addi %9, %421 : vector<1x256xi32>
    %c0_i32_166 = arith.constant 0 : i32
    %423 = vector.broadcast %c0_i32_166 : i32 to vector<1x256xi32>
    %424 = arith.cmpi sge, %422, %423 : vector<1x256xi32>
    %c-2_i32_167 = arith.constant -2 : i32
    %425 = vector.broadcast %c-2_i32_167 : i32 to vector<1x256xi32>
    %426 = arith.addi %9, %425 : vector<1x256xi32>
    %c16_i32_168 = arith.constant 16 : i32
    %427 = vector.broadcast %c16_i32_168 : i32 to vector<1x256xi32>
    %428 = arith.cmpi slt, %426, %427 : vector<1x256xi32>
    %429 = arith.andi %424, %428 : vector<1x256xi1>
    %430 = arith.andi %403, %429 : vector<1x256xi1>
    %c0_169 = arith.constant 0 : index
    %c49 = arith.constant 49 : index
    %431 = vector.load %arg5[%c0_169, %c49] : memref<2x358xf32, #tpu.memory_space<vmem>>, vector<1x256xf32>
    %c22_170 = arith.constant 22 : index
    %432 = memref.load %arg1[%c22_170] : memref<98xf32, #tpu.memory_space<smem>>
    %cst_171 = arith.constant 0.000000e+00 : f32
    %433 = vector.broadcast %cst_171 : f32 to vector<1x256xf32>
    %434 = arith.select %430, %431, %433 : vector<1x256xi1>, vector<1x256xf32>
    %435 = vector.broadcast %432 : f32 to vector<1x256xf32>
    %436 = arith.mulf %434, %435 : vector<1x256xf32>
    %437 = arith.addf %420, %436 : vector<1x256xf32>
    %c-1_i32_172 = arith.constant -1 : i32
    %438 = vector.broadcast %c-1_i32_172 : i32 to vector<1x256xi32>
    %439 = arith.addi %9, %438 : vector<1x256xi32>
    %c0_i32_173 = arith.constant 0 : i32
    %440 = vector.broadcast %c0_i32_173 : i32 to vector<1x256xi32>
    %441 = arith.cmpi sge, %439, %440 : vector<1x256xi32>
    %c-1_i32_174 = arith.constant -1 : i32
    %442 = vector.broadcast %c-1_i32_174 : i32 to vector<1x256xi32>
    %443 = arith.addi %9, %442 : vector<1x256xi32>
    %c16_i32_175 = arith.constant 16 : i32
    %444 = vector.broadcast %c16_i32_175 : i32 to vector<1x256xi32>
    %445 = arith.cmpi slt, %443, %444 : vector<1x256xi32>
    %446 = arith.andi %441, %445 : vector<1x256xi1>
    %447 = arith.andi %403, %446 : vector<1x256xi1>
    %c0_176 = arith.constant 0 : index
    %c50 = arith.constant 50 : index
    %448 = vector.load %arg5[%c0_176, %c50] : memref<2x358xf32, #tpu.memory_space<vmem>>, vector<1x256xf32>
    %c23 = arith.constant 23 : index
    %449 = memref.load %arg1[%c23] : memref<98xf32, #tpu.memory_space<smem>>
    %cst_177 = arith.constant 0.000000e+00 : f32
    %450 = vector.broadcast %cst_177 : f32 to vector<1x256xf32>
    %451 = arith.select %447, %448, %450 : vector<1x256xi1>, vector<1x256xf32>
    %452 = vector.broadcast %449 : f32 to vector<1x256xf32>
    %453 = arith.mulf %451, %452 : vector<1x256xf32>
    %454 = arith.addf %437, %453 : vector<1x256xf32>
    %c0_i32_178 = arith.constant 0 : i32
    %455 = vector.broadcast %c0_i32_178 : i32 to vector<1x256xi32>
    %456 = arith.addi %9, %455 : vector<1x256xi32>
    %c0_i32_179 = arith.constant 0 : i32
    %457 = vector.broadcast %c0_i32_179 : i32 to vector<1x256xi32>
    %458 = arith.cmpi sge, %456, %457 : vector<1x256xi32>
    %c0_i32_180 = arith.constant 0 : i32
    %459 = vector.broadcast %c0_i32_180 : i32 to vector<1x256xi32>
    %460 = arith.addi %9, %459 : vector<1x256xi32>
    %c16_i32_181 = arith.constant 16 : i32
    %461 = vector.broadcast %c16_i32_181 : i32 to vector<1x256xi32>
    %462 = arith.cmpi slt, %460, %461 : vector<1x256xi32>
    %463 = arith.andi %458, %462 : vector<1x256xi1>
    %464 = arith.andi %403, %463 : vector<1x256xi1>
    %c0_182 = arith.constant 0 : index
    %c51_183 = arith.constant 51 : index
    %465 = vector.load %arg5[%c0_182, %c51_183] : memref<2x358xf32, #tpu.memory_space<vmem>>, vector<1x256xf32>
    %c24 = arith.constant 24 : index
    %466 = memref.load %arg1[%c24] : memref<98xf32, #tpu.memory_space<smem>>
    %cst_184 = arith.constant 0.000000e+00 : f32
    %467 = vector.broadcast %cst_184 : f32 to vector<1x256xf32>
    %468 = arith.select %464, %465, %467 : vector<1x256xi1>, vector<1x256xf32>
    %469 = vector.broadcast %466 : f32 to vector<1x256xf32>
    %470 = arith.mulf %468, %469 : vector<1x256xf32>
    %471 = arith.addf %454, %470 : vector<1x256xf32>
    %c1_i32_185 = arith.constant 1 : i32
    %472 = vector.broadcast %c1_i32_185 : i32 to vector<1x256xi32>
    %473 = arith.addi %9, %472 : vector<1x256xi32>
    %c0_i32_186 = arith.constant 0 : i32
    %474 = vector.broadcast %c0_i32_186 : i32 to vector<1x256xi32>
    %475 = arith.cmpi sge, %473, %474 : vector<1x256xi32>
    %c1_i32_187 = arith.constant 1 : i32
    %476 = vector.broadcast %c1_i32_187 : i32 to vector<1x256xi32>
    %477 = arith.addi %9, %476 : vector<1x256xi32>
    %c16_i32_188 = arith.constant 16 : i32
    %478 = vector.broadcast %c16_i32_188 : i32 to vector<1x256xi32>
    %479 = arith.cmpi slt, %477, %478 : vector<1x256xi32>
    %480 = arith.andi %475, %479 : vector<1x256xi1>
    %481 = arith.andi %403, %480 : vector<1x256xi1>
    %c0_189 = arith.constant 0 : index
    %c52 = arith.constant 52 : index
    %482 = vector.load %arg5[%c0_189, %c52] : memref<2x358xf32, #tpu.memory_space<vmem>>, vector<1x256xf32>
    %c25 = arith.constant 25 : index
    %483 = memref.load %arg1[%c25] : memref<98xf32, #tpu.memory_space<smem>>
    %cst_190 = arith.constant 0.000000e+00 : f32
    %484 = vector.broadcast %cst_190 : f32 to vector<1x256xf32>
    %485 = arith.select %481, %482, %484 : vector<1x256xi1>, vector<1x256xf32>
    %486 = vector.broadcast %483 : f32 to vector<1x256xf32>
    %487 = arith.mulf %485, %486 : vector<1x256xf32>
    %488 = arith.addf %471, %487 : vector<1x256xf32>
    %c2_i32_191 = arith.constant 2 : i32
    %489 = vector.broadcast %c2_i32_191 : i32 to vector<1x256xi32>
    %490 = arith.addi %9, %489 : vector<1x256xi32>
    %c0_i32_192 = arith.constant 0 : i32
    %491 = vector.broadcast %c0_i32_192 : i32 to vector<1x256xi32>
    %492 = arith.cmpi sge, %490, %491 : vector<1x256xi32>
    %c2_i32_193 = arith.constant 2 : i32
    %493 = vector.broadcast %c2_i32_193 : i32 to vector<1x256xi32>
    %494 = arith.addi %9, %493 : vector<1x256xi32>
    %c16_i32_194 = arith.constant 16 : i32
    %495 = vector.broadcast %c16_i32_194 : i32 to vector<1x256xi32>
    %496 = arith.cmpi slt, %494, %495 : vector<1x256xi32>
    %497 = arith.andi %492, %496 : vector<1x256xi1>
    %498 = arith.andi %403, %497 : vector<1x256xi1>
    %c0_195 = arith.constant 0 : index
    %c53 = arith.constant 53 : index
    %499 = vector.load %arg5[%c0_195, %c53] : memref<2x358xf32, #tpu.memory_space<vmem>>, vector<1x256xf32>
    %c26 = arith.constant 26 : index
    %500 = memref.load %arg1[%c26] : memref<98xf32, #tpu.memory_space<smem>>
    %cst_196 = arith.constant 0.000000e+00 : f32
    %501 = vector.broadcast %cst_196 : f32 to vector<1x256xf32>
    %502 = arith.select %498, %499, %501 : vector<1x256xi1>, vector<1x256xf32>
    %503 = vector.broadcast %500 : f32 to vector<1x256xf32>
    %504 = arith.mulf %502, %503 : vector<1x256xf32>
    %505 = arith.addf %488, %504 : vector<1x256xf32>
    %c3_i32_197 = arith.constant 3 : i32
    %506 = vector.broadcast %c3_i32_197 : i32 to vector<1x256xi32>
    %507 = arith.addi %9, %506 : vector<1x256xi32>
    %c0_i32_198 = arith.constant 0 : i32
    %508 = vector.broadcast %c0_i32_198 : i32 to vector<1x256xi32>
    %509 = arith.cmpi sge, %507, %508 : vector<1x256xi32>
    %c3_i32_199 = arith.constant 3 : i32
    %510 = vector.broadcast %c3_i32_199 : i32 to vector<1x256xi32>
    %511 = arith.addi %9, %510 : vector<1x256xi32>
    %c16_i32_200 = arith.constant 16 : i32
    %512 = vector.broadcast %c16_i32_200 : i32 to vector<1x256xi32>
    %513 = arith.cmpi slt, %511, %512 : vector<1x256xi32>
    %514 = arith.andi %509, %513 : vector<1x256xi1>
    %515 = arith.andi %403, %514 : vector<1x256xi1>
    %c0_201 = arith.constant 0 : index
    %c54 = arith.constant 54 : index
    %516 = vector.load %arg5[%c0_201, %c54] : memref<2x358xf32, #tpu.memory_space<vmem>>, vector<1x256xf32>
    %c27 = arith.constant 27 : index
    %517 = memref.load %arg1[%c27] : memref<98xf32, #tpu.memory_space<smem>>
    %cst_202 = arith.constant 0.000000e+00 : f32
    %518 = vector.broadcast %cst_202 : f32 to vector<1x256xf32>
    %519 = arith.select %515, %516, %518 : vector<1x256xi1>, vector<1x256xf32>
    %520 = vector.broadcast %517 : f32 to vector<1x256xf32>
    %521 = arith.mulf %519, %520 : vector<1x256xf32>
    %522 = arith.addf %505, %521 : vector<1x256xf32>
    %c1_i32_203 = arith.constant 1 : i32
    %523 = vector.broadcast %c1_i32_203 : i32 to vector<1x256xi32>
    %524 = arith.addi %8, %523 : vector<1x256xi32>
    %c0_i32_204 = arith.constant 0 : i32
    %525 = vector.broadcast %c0_i32_204 : i32 to vector<1x256xi32>
    %526 = arith.cmpi sge, %524, %525 : vector<1x256xi32>
    %c1_i32_205 = arith.constant 1 : i32
    %527 = vector.broadcast %c1_i32_205 : i32 to vector<1x256xi32>
    %528 = arith.addi %8, %527 : vector<1x256xi32>
    %c16_i32_206 = arith.constant 16 : i32
    %529 = vector.broadcast %c16_i32_206 : i32 to vector<1x256xi32>
    %530 = arith.cmpi slt, %528, %529 : vector<1x256xi32>
    %531 = arith.andi %526, %530 : vector<1x256xi1>
    %c-3_i32_207 = arith.constant -3 : i32
    %532 = vector.broadcast %c-3_i32_207 : i32 to vector<1x256xi32>
    %533 = arith.addi %9, %532 : vector<1x256xi32>
    %c0_i32_208 = arith.constant 0 : i32
    %534 = vector.broadcast %c0_i32_208 : i32 to vector<1x256xi32>
    %535 = arith.cmpi sge, %533, %534 : vector<1x256xi32>
    %c-3_i32_209 = arith.constant -3 : i32
    %536 = vector.broadcast %c-3_i32_209 : i32 to vector<1x256xi32>
    %537 = arith.addi %9, %536 : vector<1x256xi32>
    %c16_i32_210 = arith.constant 16 : i32
    %538 = vector.broadcast %c16_i32_210 : i32 to vector<1x256xi32>
    %539 = arith.cmpi slt, %537, %538 : vector<1x256xi32>
    %540 = arith.andi %535, %539 : vector<1x256xi1>
    %541 = arith.andi %531, %540 : vector<1x256xi1>
    %c0_211 = arith.constant 0 : index
    %c64 = arith.constant 64 : index
    %542 = vector.load %arg5[%c0_211, %c64] : memref<2x358xf32, #tpu.memory_space<vmem>>, vector<1x256xf32>
    %c28 = arith.constant 28 : index
    %543 = memref.load %arg1[%c28] : memref<98xf32, #tpu.memory_space<smem>>
    %cst_212 = arith.constant 0.000000e+00 : f32
    %544 = vector.broadcast %cst_212 : f32 to vector<1x256xf32>
    %545 = arith.select %541, %542, %544 : vector<1x256xi1>, vector<1x256xf32>
    %546 = vector.broadcast %543 : f32 to vector<1x256xf32>
    %547 = arith.mulf %545, %546 : vector<1x256xf32>
    %548 = arith.addf %522, %547 : vector<1x256xf32>
    %c-2_i32_213 = arith.constant -2 : i32
    %549 = vector.broadcast %c-2_i32_213 : i32 to vector<1x256xi32>
    %550 = arith.addi %9, %549 : vector<1x256xi32>
    %c0_i32_214 = arith.constant 0 : i32
    %551 = vector.broadcast %c0_i32_214 : i32 to vector<1x256xi32>
    %552 = arith.cmpi sge, %550, %551 : vector<1x256xi32>
    %c-2_i32_215 = arith.constant -2 : i32
    %553 = vector.broadcast %c-2_i32_215 : i32 to vector<1x256xi32>
    %554 = arith.addi %9, %553 : vector<1x256xi32>
    %c16_i32_216 = arith.constant 16 : i32
    %555 = vector.broadcast %c16_i32_216 : i32 to vector<1x256xi32>
    %556 = arith.cmpi slt, %554, %555 : vector<1x256xi32>
    %557 = arith.andi %552, %556 : vector<1x256xi1>
    %558 = arith.andi %531, %557 : vector<1x256xi1>
    %c0_217 = arith.constant 0 : index
    %c65 = arith.constant 65 : index
    %559 = vector.load %arg5[%c0_217, %c65] : memref<2x358xf32, #tpu.memory_space<vmem>>, vector<1x256xf32>
    %c29 = arith.constant 29 : index
    %560 = memref.load %arg1[%c29] : memref<98xf32, #tpu.memory_space<smem>>
    %cst_218 = arith.constant 0.000000e+00 : f32
    %561 = vector.broadcast %cst_218 : f32 to vector<1x256xf32>
    %562 = arith.select %558, %559, %561 : vector<1x256xi1>, vector<1x256xf32>
    %563 = vector.broadcast %560 : f32 to vector<1x256xf32>
    %564 = arith.mulf %562, %563 : vector<1x256xf32>
    %565 = arith.addf %548, %564 : vector<1x256xf32>
    %c-1_i32_219 = arith.constant -1 : i32
    %566 = vector.broadcast %c-1_i32_219 : i32 to vector<1x256xi32>
    %567 = arith.addi %9, %566 : vector<1x256xi32>
    %c0_i32_220 = arith.constant 0 : i32
    %568 = vector.broadcast %c0_i32_220 : i32 to vector<1x256xi32>
    %569 = arith.cmpi sge, %567, %568 : vector<1x256xi32>
    %c-1_i32_221 = arith.constant -1 : i32
    %570 = vector.broadcast %c-1_i32_221 : i32 to vector<1x256xi32>
    %571 = arith.addi %9, %570 : vector<1x256xi32>
    %c16_i32_222 = arith.constant 16 : i32
    %572 = vector.broadcast %c16_i32_222 : i32 to vector<1x256xi32>
    %573 = arith.cmpi slt, %571, %572 : vector<1x256xi32>
    %574 = arith.andi %569, %573 : vector<1x256xi1>
    %575 = arith.andi %531, %574 : vector<1x256xi1>
    %c0_223 = arith.constant 0 : index
    %c66 = arith.constant 66 : index
    %576 = vector.load %arg5[%c0_223, %c66] : memref<2x358xf32, #tpu.memory_space<vmem>>, vector<1x256xf32>
    %c30 = arith.constant 30 : index
    %577 = memref.load %arg1[%c30] : memref<98xf32, #tpu.memory_space<smem>>
    %cst_224 = arith.constant 0.000000e+00 : f32
    %578 = vector.broadcast %cst_224 : f32 to vector<1x256xf32>
    %579 = arith.select %575, %576, %578 : vector<1x256xi1>, vector<1x256xf32>
    %580 = vector.broadcast %577 : f32 to vector<1x256xf32>
    %581 = arith.mulf %579, %580 : vector<1x256xf32>
    %582 = arith.addf %565, %581 : vector<1x256xf32>
    %c0_i32_225 = arith.constant 0 : i32
    %583 = vector.broadcast %c0_i32_225 : i32 to vector<1x256xi32>
    %584 = arith.addi %9, %583 : vector<1x256xi32>
    %c0_i32_226 = arith.constant 0 : i32
    %585 = vector.broadcast %c0_i32_226 : i32 to vector<1x256xi32>
    %586 = arith.cmpi sge, %584, %585 : vector<1x256xi32>
    %c0_i32_227 = arith.constant 0 : i32
    %587 = vector.broadcast %c0_i32_227 : i32 to vector<1x256xi32>
    %588 = arith.addi %9, %587 : vector<1x256xi32>
    %c16_i32_228 = arith.constant 16 : i32
    %589 = vector.broadcast %c16_i32_228 : i32 to vector<1x256xi32>
    %590 = arith.cmpi slt, %588, %589 : vector<1x256xi32>
    %591 = arith.andi %586, %590 : vector<1x256xi1>
    %592 = arith.andi %531, %591 : vector<1x256xi1>
    %c0_229 = arith.constant 0 : index
    %c67 = arith.constant 67 : index
    %593 = vector.load %arg5[%c0_229, %c67] : memref<2x358xf32, #tpu.memory_space<vmem>>, vector<1x256xf32>
    %c31 = arith.constant 31 : index
    %594 = memref.load %arg1[%c31] : memref<98xf32, #tpu.memory_space<smem>>
    %cst_230 = arith.constant 0.000000e+00 : f32
    %595 = vector.broadcast %cst_230 : f32 to vector<1x256xf32>
    %596 = arith.select %592, %593, %595 : vector<1x256xi1>, vector<1x256xf32>
    %597 = vector.broadcast %594 : f32 to vector<1x256xf32>
    %598 = arith.mulf %596, %597 : vector<1x256xf32>
    %599 = arith.addf %582, %598 : vector<1x256xf32>
    %c1_i32_231 = arith.constant 1 : i32
    %600 = vector.broadcast %c1_i32_231 : i32 to vector<1x256xi32>
    %601 = arith.addi %9, %600 : vector<1x256xi32>
    %c0_i32_232 = arith.constant 0 : i32
    %602 = vector.broadcast %c0_i32_232 : i32 to vector<1x256xi32>
    %603 = arith.cmpi sge, %601, %602 : vector<1x256xi32>
    %c1_i32_233 = arith.constant 1 : i32
    %604 = vector.broadcast %c1_i32_233 : i32 to vector<1x256xi32>
    %605 = arith.addi %9, %604 : vector<1x256xi32>
    %c16_i32_234 = arith.constant 16 : i32
    %606 = vector.broadcast %c16_i32_234 : i32 to vector<1x256xi32>
    %607 = arith.cmpi slt, %605, %606 : vector<1x256xi32>
    %608 = arith.andi %603, %607 : vector<1x256xi1>
    %609 = arith.andi %531, %608 : vector<1x256xi1>
    %c0_235 = arith.constant 0 : index
    %c68 = arith.constant 68 : index
    %610 = vector.load %arg5[%c0_235, %c68] : memref<2x358xf32, #tpu.memory_space<vmem>>, vector<1x256xf32>
    %c32_236 = arith.constant 32 : index
    %611 = memref.load %arg1[%c32_236] : memref<98xf32, #tpu.memory_space<smem>>
    %cst_237 = arith.constant 0.000000e+00 : f32
    %612 = vector.broadcast %cst_237 : f32 to vector<1x256xf32>
    %613 = arith.select %609, %610, %612 : vector<1x256xi1>, vector<1x256xf32>
    %614 = vector.broadcast %611 : f32 to vector<1x256xf32>
    %615 = arith.mulf %613, %614 : vector<1x256xf32>
    %616 = arith.addf %599, %615 : vector<1x256xf32>
    %c2_i32_238 = arith.constant 2 : i32
    %617 = vector.broadcast %c2_i32_238 : i32 to vector<1x256xi32>
    %618 = arith.addi %9, %617 : vector<1x256xi32>
    %c0_i32_239 = arith.constant 0 : i32
    %619 = vector.broadcast %c0_i32_239 : i32 to vector<1x256xi32>
    %620 = arith.cmpi sge, %618, %619 : vector<1x256xi32>
    %c2_i32_240 = arith.constant 2 : i32
    %621 = vector.broadcast %c2_i32_240 : i32 to vector<1x256xi32>
    %622 = arith.addi %9, %621 : vector<1x256xi32>
    %c16_i32_241 = arith.constant 16 : i32
    %623 = vector.broadcast %c16_i32_241 : i32 to vector<1x256xi32>
    %624 = arith.cmpi slt, %622, %623 : vector<1x256xi32>
    %625 = arith.andi %620, %624 : vector<1x256xi1>
    %626 = arith.andi %531, %625 : vector<1x256xi1>
    %c0_242 = arith.constant 0 : index
    %c69 = arith.constant 69 : index
    %627 = vector.load %arg5[%c0_242, %c69] : memref<2x358xf32, #tpu.memory_space<vmem>>, vector<1x256xf32>
    %c33_243 = arith.constant 33 : index
    %628 = memref.load %arg1[%c33_243] : memref<98xf32, #tpu.memory_space<smem>>
    %cst_244 = arith.constant 0.000000e+00 : f32
    %629 = vector.broadcast %cst_244 : f32 to vector<1x256xf32>
    %630 = arith.select %626, %627, %629 : vector<1x256xi1>, vector<1x256xf32>
    %631 = vector.broadcast %628 : f32 to vector<1x256xf32>
    %632 = arith.mulf %630, %631 : vector<1x256xf32>
    %633 = arith.addf %616, %632 : vector<1x256xf32>
    %c3_i32_245 = arith.constant 3 : i32
    %634 = vector.broadcast %c3_i32_245 : i32 to vector<1x256xi32>
    %635 = arith.addi %9, %634 : vector<1x256xi32>
    %c0_i32_246 = arith.constant 0 : i32
    %636 = vector.broadcast %c0_i32_246 : i32 to vector<1x256xi32>
    %637 = arith.cmpi sge, %635, %636 : vector<1x256xi32>
    %c3_i32_247 = arith.constant 3 : i32
    %638 = vector.broadcast %c3_i32_247 : i32 to vector<1x256xi32>
    %639 = arith.addi %9, %638 : vector<1x256xi32>
    %c16_i32_248 = arith.constant 16 : i32
    %640 = vector.broadcast %c16_i32_248 : i32 to vector<1x256xi32>
    %641 = arith.cmpi slt, %639, %640 : vector<1x256xi32>
    %642 = arith.andi %637, %641 : vector<1x256xi1>
    %643 = arith.andi %531, %642 : vector<1x256xi1>
    %c0_249 = arith.constant 0 : index
    %c70 = arith.constant 70 : index
    %644 = vector.load %arg5[%c0_249, %c70] : memref<2x358xf32, #tpu.memory_space<vmem>>, vector<1x256xf32>
    %c34_250 = arith.constant 34 : index
    %645 = memref.load %arg1[%c34_250] : memref<98xf32, #tpu.memory_space<smem>>
    %cst_251 = arith.constant 0.000000e+00 : f32
    %646 = vector.broadcast %cst_251 : f32 to vector<1x256xf32>
    %647 = arith.select %643, %644, %646 : vector<1x256xi1>, vector<1x256xf32>
    %648 = vector.broadcast %645 : f32 to vector<1x256xf32>
    %649 = arith.mulf %647, %648 : vector<1x256xf32>
    %650 = arith.addf %633, %649 : vector<1x256xf32>
    %c2_i32_252 = arith.constant 2 : i32
    %651 = vector.broadcast %c2_i32_252 : i32 to vector<1x256xi32>
    %652 = arith.addi %8, %651 : vector<1x256xi32>
    %c0_i32_253 = arith.constant 0 : i32
    %653 = vector.broadcast %c0_i32_253 : i32 to vector<1x256xi32>
    %654 = arith.cmpi sge, %652, %653 : vector<1x256xi32>
    %c2_i32_254 = arith.constant 2 : i32
    %655 = vector.broadcast %c2_i32_254 : i32 to vector<1x256xi32>
    %656 = arith.addi %8, %655 : vector<1x256xi32>
    %c16_i32_255 = arith.constant 16 : i32
    %657 = vector.broadcast %c16_i32_255 : i32 to vector<1x256xi32>
    %658 = arith.cmpi slt, %656, %657 : vector<1x256xi32>
    %659 = arith.andi %654, %658 : vector<1x256xi1>
    %c-3_i32_256 = arith.constant -3 : i32
    %660 = vector.broadcast %c-3_i32_256 : i32 to vector<1x256xi32>
    %661 = arith.addi %9, %660 : vector<1x256xi32>
    %c0_i32_257 = arith.constant 0 : i32
    %662 = vector.broadcast %c0_i32_257 : i32 to vector<1x256xi32>
    %663 = arith.cmpi sge, %661, %662 : vector<1x256xi32>
    %c-3_i32_258 = arith.constant -3 : i32
    %664 = vector.broadcast %c-3_i32_258 : i32 to vector<1x256xi32>
    %665 = arith.addi %9, %664 : vector<1x256xi32>
    %c16_i32_259 = arith.constant 16 : i32
    %666 = vector.broadcast %c16_i32_259 : i32 to vector<1x256xi32>
    %667 = arith.cmpi slt, %665, %666 : vector<1x256xi32>
    %668 = arith.andi %663, %667 : vector<1x256xi1>
    %669 = arith.andi %659, %668 : vector<1x256xi1>
    %c0_260 = arith.constant 0 : index
    %c80 = arith.constant 80 : index
    %670 = vector.load %arg5[%c0_260, %c80] : memref<2x358xf32, #tpu.memory_space<vmem>>, vector<1x256xf32>
    %c35_261 = arith.constant 35 : index
    %671 = memref.load %arg1[%c35_261] : memref<98xf32, #tpu.memory_space<smem>>
    %cst_262 = arith.constant 0.000000e+00 : f32
    %672 = vector.broadcast %cst_262 : f32 to vector<1x256xf32>
    %673 = arith.select %669, %670, %672 : vector<1x256xi1>, vector<1x256xf32>
    %674 = vector.broadcast %671 : f32 to vector<1x256xf32>
    %675 = arith.mulf %673, %674 : vector<1x256xf32>
    %676 = arith.addf %650, %675 : vector<1x256xf32>
    %c-2_i32_263 = arith.constant -2 : i32
    %677 = vector.broadcast %c-2_i32_263 : i32 to vector<1x256xi32>
    %678 = arith.addi %9, %677 : vector<1x256xi32>
    %c0_i32_264 = arith.constant 0 : i32
    %679 = vector.broadcast %c0_i32_264 : i32 to vector<1x256xi32>
    %680 = arith.cmpi sge, %678, %679 : vector<1x256xi32>
    %c-2_i32_265 = arith.constant -2 : i32
    %681 = vector.broadcast %c-2_i32_265 : i32 to vector<1x256xi32>
    %682 = arith.addi %9, %681 : vector<1x256xi32>
    %c16_i32_266 = arith.constant 16 : i32
    %683 = vector.broadcast %c16_i32_266 : i32 to vector<1x256xi32>
    %684 = arith.cmpi slt, %682, %683 : vector<1x256xi32>
    %685 = arith.andi %680, %684 : vector<1x256xi1>
    %686 = arith.andi %659, %685 : vector<1x256xi1>
    %c0_267 = arith.constant 0 : index
    %c81 = arith.constant 81 : index
    %687 = vector.load %arg5[%c0_267, %c81] : memref<2x358xf32, #tpu.memory_space<vmem>>, vector<1x256xf32>
    %c36_268 = arith.constant 36 : index
    %688 = memref.load %arg1[%c36_268] : memref<98xf32, #tpu.memory_space<smem>>
    %cst_269 = arith.constant 0.000000e+00 : f32
    %689 = vector.broadcast %cst_269 : f32 to vector<1x256xf32>
    %690 = arith.select %686, %687, %689 : vector<1x256xi1>, vector<1x256xf32>
    %691 = vector.broadcast %688 : f32 to vector<1x256xf32>
    %692 = arith.mulf %690, %691 : vector<1x256xf32>
    %693 = arith.addf %676, %692 : vector<1x256xf32>
    %c-1_i32_270 = arith.constant -1 : i32
    %694 = vector.broadcast %c-1_i32_270 : i32 to vector<1x256xi32>
    %695 = arith.addi %9, %694 : vector<1x256xi32>
    %c0_i32_271 = arith.constant 0 : i32
    %696 = vector.broadcast %c0_i32_271 : i32 to vector<1x256xi32>
    %697 = arith.cmpi sge, %695, %696 : vector<1x256xi32>
    %c-1_i32_272 = arith.constant -1 : i32
    %698 = vector.broadcast %c-1_i32_272 : i32 to vector<1x256xi32>
    %699 = arith.addi %9, %698 : vector<1x256xi32>
    %c16_i32_273 = arith.constant 16 : i32
    %700 = vector.broadcast %c16_i32_273 : i32 to vector<1x256xi32>
    %701 = arith.cmpi slt, %699, %700 : vector<1x256xi32>
    %702 = arith.andi %697, %701 : vector<1x256xi1>
    %703 = arith.andi %659, %702 : vector<1x256xi1>
    %c0_274 = arith.constant 0 : index
    %c82 = arith.constant 82 : index
    %704 = vector.load %arg5[%c0_274, %c82] : memref<2x358xf32, #tpu.memory_space<vmem>>, vector<1x256xf32>
    %c37_275 = arith.constant 37 : index
    %705 = memref.load %arg1[%c37_275] : memref<98xf32, #tpu.memory_space<smem>>
    %cst_276 = arith.constant 0.000000e+00 : f32
    %706 = vector.broadcast %cst_276 : f32 to vector<1x256xf32>
    %707 = arith.select %703, %704, %706 : vector<1x256xi1>, vector<1x256xf32>
    %708 = vector.broadcast %705 : f32 to vector<1x256xf32>
    %709 = arith.mulf %707, %708 : vector<1x256xf32>
    %710 = arith.addf %693, %709 : vector<1x256xf32>
    %c0_i32_277 = arith.constant 0 : i32
    %711 = vector.broadcast %c0_i32_277 : i32 to vector<1x256xi32>
    %712 = arith.addi %9, %711 : vector<1x256xi32>
    %c0_i32_278 = arith.constant 0 : i32
    %713 = vector.broadcast %c0_i32_278 : i32 to vector<1x256xi32>
    %714 = arith.cmpi sge, %712, %713 : vector<1x256xi32>
    %c0_i32_279 = arith.constant 0 : i32
    %715 = vector.broadcast %c0_i32_279 : i32 to vector<1x256xi32>
    %716 = arith.addi %9, %715 : vector<1x256xi32>
    %c16_i32_280 = arith.constant 16 : i32
    %717 = vector.broadcast %c16_i32_280 : i32 to vector<1x256xi32>
    %718 = arith.cmpi slt, %716, %717 : vector<1x256xi32>
    %719 = arith.andi %714, %718 : vector<1x256xi1>
    %720 = arith.andi %659, %719 : vector<1x256xi1>
    %c0_281 = arith.constant 0 : index
    %c83 = arith.constant 83 : index
    %721 = vector.load %arg5[%c0_281, %c83] : memref<2x358xf32, #tpu.memory_space<vmem>>, vector<1x256xf32>
    %c38_282 = arith.constant 38 : index
    %722 = memref.load %arg1[%c38_282] : memref<98xf32, #tpu.memory_space<smem>>
    %cst_283 = arith.constant 0.000000e+00 : f32
    %723 = vector.broadcast %cst_283 : f32 to vector<1x256xf32>
    %724 = arith.select %720, %721, %723 : vector<1x256xi1>, vector<1x256xf32>
    %725 = vector.broadcast %722 : f32 to vector<1x256xf32>
    %726 = arith.mulf %724, %725 : vector<1x256xf32>
    %727 = arith.addf %710, %726 : vector<1x256xf32>
    %c1_i32_284 = arith.constant 1 : i32
    %728 = vector.broadcast %c1_i32_284 : i32 to vector<1x256xi32>
    %729 = arith.addi %9, %728 : vector<1x256xi32>
    %c0_i32_285 = arith.constant 0 : i32
    %730 = vector.broadcast %c0_i32_285 : i32 to vector<1x256xi32>
    %731 = arith.cmpi sge, %729, %730 : vector<1x256xi32>
    %c1_i32_286 = arith.constant 1 : i32
    %732 = vector.broadcast %c1_i32_286 : i32 to vector<1x256xi32>
    %733 = arith.addi %9, %732 : vector<1x256xi32>
    %c16_i32_287 = arith.constant 16 : i32
    %734 = vector.broadcast %c16_i32_287 : i32 to vector<1x256xi32>
    %735 = arith.cmpi slt, %733, %734 : vector<1x256xi32>
    %736 = arith.andi %731, %735 : vector<1x256xi1>
    %737 = arith.andi %659, %736 : vector<1x256xi1>
    %c0_288 = arith.constant 0 : index
    %c84 = arith.constant 84 : index
    %738 = vector.load %arg5[%c0_288, %c84] : memref<2x358xf32, #tpu.memory_space<vmem>>, vector<1x256xf32>
    %c39 = arith.constant 39 : index
    %739 = memref.load %arg1[%c39] : memref<98xf32, #tpu.memory_space<smem>>
    %cst_289 = arith.constant 0.000000e+00 : f32
    %740 = vector.broadcast %cst_289 : f32 to vector<1x256xf32>
    %741 = arith.select %737, %738, %740 : vector<1x256xi1>, vector<1x256xf32>
    %742 = vector.broadcast %739 : f32 to vector<1x256xf32>
    %743 = arith.mulf %741, %742 : vector<1x256xf32>
    %744 = arith.addf %727, %743 : vector<1x256xf32>
    %c2_i32_290 = arith.constant 2 : i32
    %745 = vector.broadcast %c2_i32_290 : i32 to vector<1x256xi32>
    %746 = arith.addi %9, %745 : vector<1x256xi32>
    %c0_i32_291 = arith.constant 0 : i32
    %747 = vector.broadcast %c0_i32_291 : i32 to vector<1x256xi32>
    %748 = arith.cmpi sge, %746, %747 : vector<1x256xi32>
    %c2_i32_292 = arith.constant 2 : i32
    %749 = vector.broadcast %c2_i32_292 : i32 to vector<1x256xi32>
    %750 = arith.addi %9, %749 : vector<1x256xi32>
    %c16_i32_293 = arith.constant 16 : i32
    %751 = vector.broadcast %c16_i32_293 : i32 to vector<1x256xi32>
    %752 = arith.cmpi slt, %750, %751 : vector<1x256xi32>
    %753 = arith.andi %748, %752 : vector<1x256xi1>
    %754 = arith.andi %659, %753 : vector<1x256xi1>
    %c0_294 = arith.constant 0 : index
    %c85 = arith.constant 85 : index
    %755 = vector.load %arg5[%c0_294, %c85] : memref<2x358xf32, #tpu.memory_space<vmem>>, vector<1x256xf32>
    %c40 = arith.constant 40 : index
    %756 = memref.load %arg1[%c40] : memref<98xf32, #tpu.memory_space<smem>>
    %cst_295 = arith.constant 0.000000e+00 : f32
    %757 = vector.broadcast %cst_295 : f32 to vector<1x256xf32>
    %758 = arith.select %754, %755, %757 : vector<1x256xi1>, vector<1x256xf32>
    %759 = vector.broadcast %756 : f32 to vector<1x256xf32>
    %760 = arith.mulf %758, %759 : vector<1x256xf32>
    %761 = arith.addf %744, %760 : vector<1x256xf32>
    %c3_i32_296 = arith.constant 3 : i32
    %762 = vector.broadcast %c3_i32_296 : i32 to vector<1x256xi32>
    %763 = arith.addi %9, %762 : vector<1x256xi32>
    %c0_i32_297 = arith.constant 0 : i32
    %764 = vector.broadcast %c0_i32_297 : i32 to vector<1x256xi32>
    %765 = arith.cmpi sge, %763, %764 : vector<1x256xi32>
    %c3_i32_298 = arith.constant 3 : i32
    %766 = vector.broadcast %c3_i32_298 : i32 to vector<1x256xi32>
    %767 = arith.addi %9, %766 : vector<1x256xi32>
    %c16_i32_299 = arith.constant 16 : i32
    %768 = vector.broadcast %c16_i32_299 : i32 to vector<1x256xi32>
    %769 = arith.cmpi slt, %767, %768 : vector<1x256xi32>
    %770 = arith.andi %765, %769 : vector<1x256xi1>
    %771 = arith.andi %659, %770 : vector<1x256xi1>
    %c0_300 = arith.constant 0 : index
    %c86 = arith.constant 86 : index
    %772 = vector.load %arg5[%c0_300, %c86] : memref<2x358xf32, #tpu.memory_space<vmem>>, vector<1x256xf32>
    %c41 = arith.constant 41 : index
    %773 = memref.load %arg1[%c41] : memref<98xf32, #tpu.memory_space<smem>>
    %cst_301 = arith.constant 0.000000e+00 : f32
    %774 = vector.broadcast %cst_301 : f32 to vector<1x256xf32>
    %775 = arith.select %771, %772, %774 : vector<1x256xi1>, vector<1x256xf32>
    %776 = vector.broadcast %773 : f32 to vector<1x256xf32>
    %777 = arith.mulf %775, %776 : vector<1x256xf32>
    %778 = arith.addf %761, %777 : vector<1x256xf32>
    %c3_i32_302 = arith.constant 3 : i32
    %779 = vector.broadcast %c3_i32_302 : i32 to vector<1x256xi32>
    %780 = arith.addi %8, %779 : vector<1x256xi32>
    %c0_i32_303 = arith.constant 0 : i32
    %781 = vector.broadcast %c0_i32_303 : i32 to vector<1x256xi32>
    %782 = arith.cmpi sge, %780, %781 : vector<1x256xi32>
    %c3_i32_304 = arith.constant 3 : i32
    %783 = vector.broadcast %c3_i32_304 : i32 to vector<1x256xi32>
    %784 = arith.addi %8, %783 : vector<1x256xi32>
    %c16_i32_305 = arith.constant 16 : i32
    %785 = vector.broadcast %c16_i32_305 : i32 to vector<1x256xi32>
    %786 = arith.cmpi slt, %784, %785 : vector<1x256xi32>
    %787 = arith.andi %782, %786 : vector<1x256xi1>
    %c-3_i32_306 = arith.constant -3 : i32
    %788 = vector.broadcast %c-3_i32_306 : i32 to vector<1x256xi32>
    %789 = arith.addi %9, %788 : vector<1x256xi32>
    %c0_i32_307 = arith.constant 0 : i32
    %790 = vector.broadcast %c0_i32_307 : i32 to vector<1x256xi32>
    %791 = arith.cmpi sge, %789, %790 : vector<1x256xi32>
    %c-3_i32_308 = arith.constant -3 : i32
    %792 = vector.broadcast %c-3_i32_308 : i32 to vector<1x256xi32>
    %793 = arith.addi %9, %792 : vector<1x256xi32>
    %c16_i32_309 = arith.constant 16 : i32
    %794 = vector.broadcast %c16_i32_309 : i32 to vector<1x256xi32>
    %795 = arith.cmpi slt, %793, %794 : vector<1x256xi32>
    %796 = arith.andi %791, %795 : vector<1x256xi1>
    %797 = arith.andi %787, %796 : vector<1x256xi1>
    %c0_310 = arith.constant 0 : index
    %c96 = arith.constant 96 : index
    %798 = vector.load %arg5[%c0_310, %c96] : memref<2x358xf32, #tpu.memory_space<vmem>>, vector<1x256xf32>
    %c42 = arith.constant 42 : index
    %799 = memref.load %arg1[%c42] : memref<98xf32, #tpu.memory_space<smem>>
    %cst_311 = arith.constant 0.000000e+00 : f32
    %800 = vector.broadcast %cst_311 : f32 to vector<1x256xf32>
    %801 = arith.select %797, %798, %800 : vector<1x256xi1>, vector<1x256xf32>
    %802 = vector.broadcast %799 : f32 to vector<1x256xf32>
    %803 = arith.mulf %801, %802 : vector<1x256xf32>
    %804 = arith.addf %778, %803 : vector<1x256xf32>
    %c-2_i32_312 = arith.constant -2 : i32
    %805 = vector.broadcast %c-2_i32_312 : i32 to vector<1x256xi32>
    %806 = arith.addi %9, %805 : vector<1x256xi32>
    %c0_i32_313 = arith.constant 0 : i32
    %807 = vector.broadcast %c0_i32_313 : i32 to vector<1x256xi32>
    %808 = arith.cmpi sge, %806, %807 : vector<1x256xi32>
    %c-2_i32_314 = arith.constant -2 : i32
    %809 = vector.broadcast %c-2_i32_314 : i32 to vector<1x256xi32>
    %810 = arith.addi %9, %809 : vector<1x256xi32>
    %c16_i32_315 = arith.constant 16 : i32
    %811 = vector.broadcast %c16_i32_315 : i32 to vector<1x256xi32>
    %812 = arith.cmpi slt, %810, %811 : vector<1x256xi32>
    %813 = arith.andi %808, %812 : vector<1x256xi1>
    %814 = arith.andi %787, %813 : vector<1x256xi1>
    %c0_316 = arith.constant 0 : index
    %c97 = arith.constant 97 : index
    %815 = vector.load %arg5[%c0_316, %c97] : memref<2x358xf32, #tpu.memory_space<vmem>>, vector<1x256xf32>
    %c43 = arith.constant 43 : index
    %816 = memref.load %arg1[%c43] : memref<98xf32, #tpu.memory_space<smem>>
    %cst_317 = arith.constant 0.000000e+00 : f32
    %817 = vector.broadcast %cst_317 : f32 to vector<1x256xf32>
    %818 = arith.select %814, %815, %817 : vector<1x256xi1>, vector<1x256xf32>
    %819 = vector.broadcast %816 : f32 to vector<1x256xf32>
    %820 = arith.mulf %818, %819 : vector<1x256xf32>
    %821 = arith.addf %804, %820 : vector<1x256xf32>
    %c-1_i32_318 = arith.constant -1 : i32
    %822 = vector.broadcast %c-1_i32_318 : i32 to vector<1x256xi32>
    %823 = arith.addi %9, %822 : vector<1x256xi32>
    %c0_i32_319 = arith.constant 0 : i32
    %824 = vector.broadcast %c0_i32_319 : i32 to vector<1x256xi32>
    %825 = arith.cmpi sge, %823, %824 : vector<1x256xi32>
    %c-1_i32_320 = arith.constant -1 : i32
    %826 = vector.broadcast %c-1_i32_320 : i32 to vector<1x256xi32>
    %827 = arith.addi %9, %826 : vector<1x256xi32>
    %c16_i32_321 = arith.constant 16 : i32
    %828 = vector.broadcast %c16_i32_321 : i32 to vector<1x256xi32>
    %829 = arith.cmpi slt, %827, %828 : vector<1x256xi32>
    %830 = arith.andi %825, %829 : vector<1x256xi1>
    %831 = arith.andi %787, %830 : vector<1x256xi1>
    %c0_322 = arith.constant 0 : index
    %c98 = arith.constant 98 : index
    %832 = vector.load %arg5[%c0_322, %c98] : memref<2x358xf32, #tpu.memory_space<vmem>>, vector<1x256xf32>
    %c44 = arith.constant 44 : index
    %833 = memref.load %arg1[%c44] : memref<98xf32, #tpu.memory_space<smem>>
    %cst_323 = arith.constant 0.000000e+00 : f32
    %834 = vector.broadcast %cst_323 : f32 to vector<1x256xf32>
    %835 = arith.select %831, %832, %834 : vector<1x256xi1>, vector<1x256xf32>
    %836 = vector.broadcast %833 : f32 to vector<1x256xf32>
    %837 = arith.mulf %835, %836 : vector<1x256xf32>
    %838 = arith.addf %821, %837 : vector<1x256xf32>
    %c0_i32_324 = arith.constant 0 : i32
    %839 = vector.broadcast %c0_i32_324 : i32 to vector<1x256xi32>
    %840 = arith.addi %9, %839 : vector<1x256xi32>
    %c0_i32_325 = arith.constant 0 : i32
    %841 = vector.broadcast %c0_i32_325 : i32 to vector<1x256xi32>
    %842 = arith.cmpi sge, %840, %841 : vector<1x256xi32>
    %c0_i32_326 = arith.constant 0 : i32
    %843 = vector.broadcast %c0_i32_326 : i32 to vector<1x256xi32>
    %844 = arith.addi %9, %843 : vector<1x256xi32>
    %c16_i32_327 = arith.constant 16 : i32
    %845 = vector.broadcast %c16_i32_327 : i32 to vector<1x256xi32>
    %846 = arith.cmpi slt, %844, %845 : vector<1x256xi32>
    %847 = arith.andi %842, %846 : vector<1x256xi1>
    %848 = arith.andi %787, %847 : vector<1x256xi1>
    %c0_328 = arith.constant 0 : index
    %c99 = arith.constant 99 : index
    %849 = vector.load %arg5[%c0_328, %c99] : memref<2x358xf32, #tpu.memory_space<vmem>>, vector<1x256xf32>
    %c45 = arith.constant 45 : index
    %850 = memref.load %arg1[%c45] : memref<98xf32, #tpu.memory_space<smem>>
    %cst_329 = arith.constant 0.000000e+00 : f32
    %851 = vector.broadcast %cst_329 : f32 to vector<1x256xf32>
    %852 = arith.select %848, %849, %851 : vector<1x256xi1>, vector<1x256xf32>
    %853 = vector.broadcast %850 : f32 to vector<1x256xf32>
    %854 = arith.mulf %852, %853 : vector<1x256xf32>
    %855 = arith.addf %838, %854 : vector<1x256xf32>
    %c1_i32_330 = arith.constant 1 : i32
    %856 = vector.broadcast %c1_i32_330 : i32 to vector<1x256xi32>
    %857 = arith.addi %9, %856 : vector<1x256xi32>
    %c0_i32_331 = arith.constant 0 : i32
    %858 = vector.broadcast %c0_i32_331 : i32 to vector<1x256xi32>
    %859 = arith.cmpi sge, %857, %858 : vector<1x256xi32>
    %c1_i32_332 = arith.constant 1 : i32
    %860 = vector.broadcast %c1_i32_332 : i32 to vector<1x256xi32>
    %861 = arith.addi %9, %860 : vector<1x256xi32>
    %c16_i32_333 = arith.constant 16 : i32
    %862 = vector.broadcast %c16_i32_333 : i32 to vector<1x256xi32>
    %863 = arith.cmpi slt, %861, %862 : vector<1x256xi32>
    %864 = arith.andi %859, %863 : vector<1x256xi1>
    %865 = arith.andi %787, %864 : vector<1x256xi1>
    %c0_334 = arith.constant 0 : index
    %c100 = arith.constant 100 : index
    %866 = vector.load %arg5[%c0_334, %c100] : memref<2x358xf32, #tpu.memory_space<vmem>>, vector<1x256xf32>
    %c46 = arith.constant 46 : index
    %867 = memref.load %arg1[%c46] : memref<98xf32, #tpu.memory_space<smem>>
    %cst_335 = arith.constant 0.000000e+00 : f32
    %868 = vector.broadcast %cst_335 : f32 to vector<1x256xf32>
    %869 = arith.select %865, %866, %868 : vector<1x256xi1>, vector<1x256xf32>
    %870 = vector.broadcast %867 : f32 to vector<1x256xf32>
    %871 = arith.mulf %869, %870 : vector<1x256xf32>
    %872 = arith.addf %855, %871 : vector<1x256xf32>
    %c2_i32_336 = arith.constant 2 : i32
    %873 = vector.broadcast %c2_i32_336 : i32 to vector<1x256xi32>
    %874 = arith.addi %9, %873 : vector<1x256xi32>
    %c0_i32_337 = arith.constant 0 : i32
    %875 = vector.broadcast %c0_i32_337 : i32 to vector<1x256xi32>
    %876 = arith.cmpi sge, %874, %875 : vector<1x256xi32>
    %c2_i32_338 = arith.constant 2 : i32
    %877 = vector.broadcast %c2_i32_338 : i32 to vector<1x256xi32>
    %878 = arith.addi %9, %877 : vector<1x256xi32>
    %c16_i32_339 = arith.constant 16 : i32
    %879 = vector.broadcast %c16_i32_339 : i32 to vector<1x256xi32>
    %880 = arith.cmpi slt, %878, %879 : vector<1x256xi32>
    %881 = arith.andi %876, %880 : vector<1x256xi1>
    %882 = arith.andi %787, %881 : vector<1x256xi1>
    %c0_340 = arith.constant 0 : index
    %c101 = arith.constant 101 : index
    %883 = vector.load %arg5[%c0_340, %c101] : memref<2x358xf32, #tpu.memory_space<vmem>>, vector<1x256xf32>
    %c47 = arith.constant 47 : index
    %884 = memref.load %arg1[%c47] : memref<98xf32, #tpu.memory_space<smem>>
    %cst_341 = arith.constant 0.000000e+00 : f32
    %885 = vector.broadcast %cst_341 : f32 to vector<1x256xf32>
    %886 = arith.select %882, %883, %885 : vector<1x256xi1>, vector<1x256xf32>
    %887 = vector.broadcast %884 : f32 to vector<1x256xf32>
    %888 = arith.mulf %886, %887 : vector<1x256xf32>
    %889 = arith.addf %872, %888 : vector<1x256xf32>
    %c3_i32_342 = arith.constant 3 : i32
    %890 = vector.broadcast %c3_i32_342 : i32 to vector<1x256xi32>
    %891 = arith.addi %9, %890 : vector<1x256xi32>
    %c0_i32_343 = arith.constant 0 : i32
    %892 = vector.broadcast %c0_i32_343 : i32 to vector<1x256xi32>
    %893 = arith.cmpi sge, %891, %892 : vector<1x256xi32>
    %c3_i32_344 = arith.constant 3 : i32
    %894 = vector.broadcast %c3_i32_344 : i32 to vector<1x256xi32>
    %895 = arith.addi %9, %894 : vector<1x256xi32>
    %c16_i32_345 = arith.constant 16 : i32
    %896 = vector.broadcast %c16_i32_345 : i32 to vector<1x256xi32>
    %897 = arith.cmpi slt, %895, %896 : vector<1x256xi32>
    %898 = arith.andi %893, %897 : vector<1x256xi1>
    %899 = arith.andi %787, %898 : vector<1x256xi1>
    %c0_346 = arith.constant 0 : index
    %c102 = arith.constant 102 : index
    %900 = vector.load %arg5[%c0_346, %c102] : memref<2x358xf32, #tpu.memory_space<vmem>>, vector<1x256xf32>
    %c48_347 = arith.constant 48 : index
    %901 = memref.load %arg1[%c48_347] : memref<98xf32, #tpu.memory_space<smem>>
    %cst_348 = arith.constant 0.000000e+00 : f32
    %902 = vector.broadcast %cst_348 : f32 to vector<1x256xf32>
    %903 = arith.select %899, %900, %902 : vector<1x256xi1>, vector<1x256xf32>
    %904 = vector.broadcast %901 : f32 to vector<1x256xf32>
    %905 = arith.mulf %903, %904 : vector<1x256xf32>
    %906 = arith.addf %889, %905 : vector<1x256xf32>
    %c-3_i32_349 = arith.constant -3 : i32
    %907 = vector.broadcast %c-3_i32_349 : i32 to vector<1x256xi32>
    %908 = arith.addi %8, %907 : vector<1x256xi32>
    %c0_i32_350 = arith.constant 0 : i32
    %909 = vector.broadcast %c0_i32_350 : i32 to vector<1x256xi32>
    %910 = arith.cmpi sge, %908, %909 : vector<1x256xi32>
    %c-3_i32_351 = arith.constant -3 : i32
    %911 = vector.broadcast %c-3_i32_351 : i32 to vector<1x256xi32>
    %912 = arith.addi %8, %911 : vector<1x256xi32>
    %c16_i32_352 = arith.constant 16 : i32
    %913 = vector.broadcast %c16_i32_352 : i32 to vector<1x256xi32>
    %914 = arith.cmpi slt, %912, %913 : vector<1x256xi32>
    %915 = arith.andi %910, %914 : vector<1x256xi1>
    %c-3_i32_353 = arith.constant -3 : i32
    %916 = vector.broadcast %c-3_i32_353 : i32 to vector<1x256xi32>
    %917 = arith.addi %9, %916 : vector<1x256xi32>
    %c0_i32_354 = arith.constant 0 : i32
    %918 = vector.broadcast %c0_i32_354 : i32 to vector<1x256xi32>
    %919 = arith.cmpi sge, %917, %918 : vector<1x256xi32>
    %c-3_i32_355 = arith.constant -3 : i32
    %920 = vector.broadcast %c-3_i32_355 : i32 to vector<1x256xi32>
    %921 = arith.addi %9, %920 : vector<1x256xi32>
    %c16_i32_356 = arith.constant 16 : i32
    %922 = vector.broadcast %c16_i32_356 : i32 to vector<1x256xi32>
    %923 = arith.cmpi slt, %921, %922 : vector<1x256xi32>
    %924 = arith.andi %919, %923 : vector<1x256xi1>
    %925 = arith.andi %915, %924 : vector<1x256xi1>
    %c1_357 = arith.constant 1 : index
    %c0_358 = arith.constant 0 : index
    %926 = vector.load %arg5[%c1_357, %c0_358] : memref<2x358xf32, #tpu.memory_space<vmem>>, vector<1x256xf32>
    %c49_359 = arith.constant 49 : index
    %927 = memref.load %arg1[%c49_359] : memref<98xf32, #tpu.memory_space<smem>>
    %cst_360 = arith.constant 0.000000e+00 : f32
    %928 = vector.broadcast %cst_360 : f32 to vector<1x256xf32>
    %929 = arith.select %925, %926, %928 : vector<1x256xi1>, vector<1x256xf32>
    %930 = vector.broadcast %927 : f32 to vector<1x256xf32>
    %931 = arith.mulf %929, %930 : vector<1x256xf32>
    %932 = arith.addf %906, %931 : vector<1x256xf32>
    %c-2_i32_361 = arith.constant -2 : i32
    %933 = vector.broadcast %c-2_i32_361 : i32 to vector<1x256xi32>
    %934 = arith.addi %9, %933 : vector<1x256xi32>
    %c0_i32_362 = arith.constant 0 : i32
    %935 = vector.broadcast %c0_i32_362 : i32 to vector<1x256xi32>
    %936 = arith.cmpi sge, %934, %935 : vector<1x256xi32>
    %c-2_i32_363 = arith.constant -2 : i32
    %937 = vector.broadcast %c-2_i32_363 : i32 to vector<1x256xi32>
    %938 = arith.addi %9, %937 : vector<1x256xi32>
    %c16_i32_364 = arith.constant 16 : i32
    %939 = vector.broadcast %c16_i32_364 : i32 to vector<1x256xi32>
    %940 = arith.cmpi slt, %938, %939 : vector<1x256xi32>
    %941 = arith.andi %936, %940 : vector<1x256xi1>
    %942 = arith.andi %915, %941 : vector<1x256xi1>
    %c1_365 = arith.constant 1 : index
    %c1_366 = arith.constant 1 : index
    %943 = vector.load %arg5[%c1_365, %c1_366] : memref<2x358xf32, #tpu.memory_space<vmem>>, vector<1x256xf32>
    %c50_367 = arith.constant 50 : index
    %944 = memref.load %arg1[%c50_367] : memref<98xf32, #tpu.memory_space<smem>>
    %cst_368 = arith.constant 0.000000e+00 : f32
    %945 = vector.broadcast %cst_368 : f32 to vector<1x256xf32>
    %946 = arith.select %942, %943, %945 : vector<1x256xi1>, vector<1x256xf32>
    %947 = vector.broadcast %944 : f32 to vector<1x256xf32>
    %948 = arith.mulf %946, %947 : vector<1x256xf32>
    %949 = arith.addf %932, %948 : vector<1x256xf32>
    %c-1_i32_369 = arith.constant -1 : i32
    %950 = vector.broadcast %c-1_i32_369 : i32 to vector<1x256xi32>
    %951 = arith.addi %9, %950 : vector<1x256xi32>
    %c0_i32_370 = arith.constant 0 : i32
    %952 = vector.broadcast %c0_i32_370 : i32 to vector<1x256xi32>
    %953 = arith.cmpi sge, %951, %952 : vector<1x256xi32>
    %c-1_i32_371 = arith.constant -1 : i32
    %954 = vector.broadcast %c-1_i32_371 : i32 to vector<1x256xi32>
    %955 = arith.addi %9, %954 : vector<1x256xi32>
    %c16_i32_372 = arith.constant 16 : i32
    %956 = vector.broadcast %c16_i32_372 : i32 to vector<1x256xi32>
    %957 = arith.cmpi slt, %955, %956 : vector<1x256xi32>
    %958 = arith.andi %953, %957 : vector<1x256xi1>
    %959 = arith.andi %915, %958 : vector<1x256xi1>
    %c1_373 = arith.constant 1 : index
    %c2_374 = arith.constant 2 : index
    %960 = vector.load %arg5[%c1_373, %c2_374] : memref<2x358xf32, #tpu.memory_space<vmem>>, vector<1x256xf32>
    %c51_375 = arith.constant 51 : index
    %961 = memref.load %arg1[%c51_375] : memref<98xf32, #tpu.memory_space<smem>>
    %cst_376 = arith.constant 0.000000e+00 : f32
    %962 = vector.broadcast %cst_376 : f32 to vector<1x256xf32>
    %963 = arith.select %959, %960, %962 : vector<1x256xi1>, vector<1x256xf32>
    %964 = vector.broadcast %961 : f32 to vector<1x256xf32>
    %965 = arith.mulf %963, %964 : vector<1x256xf32>
    %966 = arith.addf %949, %965 : vector<1x256xf32>
    %c0_i32_377 = arith.constant 0 : i32
    %967 = vector.broadcast %c0_i32_377 : i32 to vector<1x256xi32>
    %968 = arith.addi %9, %967 : vector<1x256xi32>
    %c0_i32_378 = arith.constant 0 : i32
    %969 = vector.broadcast %c0_i32_378 : i32 to vector<1x256xi32>
    %970 = arith.cmpi sge, %968, %969 : vector<1x256xi32>
    %c0_i32_379 = arith.constant 0 : i32
    %971 = vector.broadcast %c0_i32_379 : i32 to vector<1x256xi32>
    %972 = arith.addi %9, %971 : vector<1x256xi32>
    %c16_i32_380 = arith.constant 16 : i32
    %973 = vector.broadcast %c16_i32_380 : i32 to vector<1x256xi32>
    %974 = arith.cmpi slt, %972, %973 : vector<1x256xi32>
    %975 = arith.andi %970, %974 : vector<1x256xi1>
    %976 = arith.andi %915, %975 : vector<1x256xi1>
    %c1_381 = arith.constant 1 : index
    %c3_382 = arith.constant 3 : index
    %977 = vector.load %arg5[%c1_381, %c3_382] : memref<2x358xf32, #tpu.memory_space<vmem>>, vector<1x256xf32>
    %c52_383 = arith.constant 52 : index
    %978 = memref.load %arg1[%c52_383] : memref<98xf32, #tpu.memory_space<smem>>
    %cst_384 = arith.constant 0.000000e+00 : f32
    %979 = vector.broadcast %cst_384 : f32 to vector<1x256xf32>
    %980 = arith.select %976, %977, %979 : vector<1x256xi1>, vector<1x256xf32>
    %981 = vector.broadcast %978 : f32 to vector<1x256xf32>
    %982 = arith.mulf %980, %981 : vector<1x256xf32>
    %983 = arith.addf %966, %982 : vector<1x256xf32>
    %c1_i32_385 = arith.constant 1 : i32
    %984 = vector.broadcast %c1_i32_385 : i32 to vector<1x256xi32>
    %985 = arith.addi %9, %984 : vector<1x256xi32>
    %c0_i32_386 = arith.constant 0 : i32
    %986 = vector.broadcast %c0_i32_386 : i32 to vector<1x256xi32>
    %987 = arith.cmpi sge, %985, %986 : vector<1x256xi32>
    %c1_i32_387 = arith.constant 1 : i32
    %988 = vector.broadcast %c1_i32_387 : i32 to vector<1x256xi32>
    %989 = arith.addi %9, %988 : vector<1x256xi32>
    %c16_i32_388 = arith.constant 16 : i32
    %990 = vector.broadcast %c16_i32_388 : i32 to vector<1x256xi32>
    %991 = arith.cmpi slt, %989, %990 : vector<1x256xi32>
    %992 = arith.andi %987, %991 : vector<1x256xi1>
    %993 = arith.andi %915, %992 : vector<1x256xi1>
    %c1_389 = arith.constant 1 : index
    %c4_390 = arith.constant 4 : index
    %994 = vector.load %arg5[%c1_389, %c4_390] : memref<2x358xf32, #tpu.memory_space<vmem>>, vector<1x256xf32>
    %c53_391 = arith.constant 53 : index
    %995 = memref.load %arg1[%c53_391] : memref<98xf32, #tpu.memory_space<smem>>
    %cst_392 = arith.constant 0.000000e+00 : f32
    %996 = vector.broadcast %cst_392 : f32 to vector<1x256xf32>
    %997 = arith.select %993, %994, %996 : vector<1x256xi1>, vector<1x256xf32>
    %998 = vector.broadcast %995 : f32 to vector<1x256xf32>
    %999 = arith.mulf %997, %998 : vector<1x256xf32>
    %1000 = arith.addf %983, %999 : vector<1x256xf32>
    %c2_i32_393 = arith.constant 2 : i32
    %1001 = vector.broadcast %c2_i32_393 : i32 to vector<1x256xi32>
    %1002 = arith.addi %9, %1001 : vector<1x256xi32>
    %c0_i32_394 = arith.constant 0 : i32
    %1003 = vector.broadcast %c0_i32_394 : i32 to vector<1x256xi32>
    %1004 = arith.cmpi sge, %1002, %1003 : vector<1x256xi32>
    %c2_i32_395 = arith.constant 2 : i32
    %1005 = vector.broadcast %c2_i32_395 : i32 to vector<1x256xi32>
    %1006 = arith.addi %9, %1005 : vector<1x256xi32>
    %c16_i32_396 = arith.constant 16 : i32
    %1007 = vector.broadcast %c16_i32_396 : i32 to vector<1x256xi32>
    %1008 = arith.cmpi slt, %1006, %1007 : vector<1x256xi32>
    %1009 = arith.andi %1004, %1008 : vector<1x256xi1>
    %1010 = arith.andi %915, %1009 : vector<1x256xi1>
    %c1_397 = arith.constant 1 : index
    %c5_398 = arith.constant 5 : index
    %1011 = vector.load %arg5[%c1_397, %c5_398] : memref<2x358xf32, #tpu.memory_space<vmem>>, vector<1x256xf32>
    %c54_399 = arith.constant 54 : index
    %1012 = memref.load %arg1[%c54_399] : memref<98xf32, #tpu.memory_space<smem>>
    %cst_400 = arith.constant 0.000000e+00 : f32
    %1013 = vector.broadcast %cst_400 : f32 to vector<1x256xf32>
    %1014 = arith.select %1010, %1011, %1013 : vector<1x256xi1>, vector<1x256xf32>
    %1015 = vector.broadcast %1012 : f32 to vector<1x256xf32>
    %1016 = arith.mulf %1014, %1015 : vector<1x256xf32>
    %1017 = arith.addf %1000, %1016 : vector<1x256xf32>
    %c3_i32_401 = arith.constant 3 : i32
    %1018 = vector.broadcast %c3_i32_401 : i32 to vector<1x256xi32>
    %1019 = arith.addi %9, %1018 : vector<1x256xi32>
    %c0_i32_402 = arith.constant 0 : i32
    %1020 = vector.broadcast %c0_i32_402 : i32 to vector<1x256xi32>
    %1021 = arith.cmpi sge, %1019, %1020 : vector<1x256xi32>
    %c3_i32_403 = arith.constant 3 : i32
    %1022 = vector.broadcast %c3_i32_403 : i32 to vector<1x256xi32>
    %1023 = arith.addi %9, %1022 : vector<1x256xi32>
    %c16_i32_404 = arith.constant 16 : i32
    %1024 = vector.broadcast %c16_i32_404 : i32 to vector<1x256xi32>
    %1025 = arith.cmpi slt, %1023, %1024 : vector<1x256xi32>
    %1026 = arith.andi %1021, %1025 : vector<1x256xi1>
    %1027 = arith.andi %915, %1026 : vector<1x256xi1>
    %c1_405 = arith.constant 1 : index
    %c6_406 = arith.constant 6 : index
    %1028 = vector.load %arg5[%c1_405, %c6_406] : memref<2x358xf32, #tpu.memory_space<vmem>>, vector<1x256xf32>
    %c55 = arith.constant 55 : index
    %1029 = memref.load %arg1[%c55] : memref<98xf32, #tpu.memory_space<smem>>
    %cst_407 = arith.constant 0.000000e+00 : f32
    %1030 = vector.broadcast %cst_407 : f32 to vector<1x256xf32>
    %1031 = arith.select %1027, %1028, %1030 : vector<1x256xi1>, vector<1x256xf32>
    %1032 = vector.broadcast %1029 : f32 to vector<1x256xf32>
    %1033 = arith.mulf %1031, %1032 : vector<1x256xf32>
    %1034 = arith.addf %1017, %1033 : vector<1x256xf32>
    %c-2_i32_408 = arith.constant -2 : i32
    %1035 = vector.broadcast %c-2_i32_408 : i32 to vector<1x256xi32>
    %1036 = arith.addi %8, %1035 : vector<1x256xi32>
    %c0_i32_409 = arith.constant 0 : i32
    %1037 = vector.broadcast %c0_i32_409 : i32 to vector<1x256xi32>
    %1038 = arith.cmpi sge, %1036, %1037 : vector<1x256xi32>
    %c-2_i32_410 = arith.constant -2 : i32
    %1039 = vector.broadcast %c-2_i32_410 : i32 to vector<1x256xi32>
    %1040 = arith.addi %8, %1039 : vector<1x256xi32>
    %c16_i32_411 = arith.constant 16 : i32
    %1041 = vector.broadcast %c16_i32_411 : i32 to vector<1x256xi32>
    %1042 = arith.cmpi slt, %1040, %1041 : vector<1x256xi32>
    %1043 = arith.andi %1038, %1042 : vector<1x256xi1>
    %c-3_i32_412 = arith.constant -3 : i32
    %1044 = vector.broadcast %c-3_i32_412 : i32 to vector<1x256xi32>
    %1045 = arith.addi %9, %1044 : vector<1x256xi32>
    %c0_i32_413 = arith.constant 0 : i32
    %1046 = vector.broadcast %c0_i32_413 : i32 to vector<1x256xi32>
    %1047 = arith.cmpi sge, %1045, %1046 : vector<1x256xi32>
    %c-3_i32_414 = arith.constant -3 : i32
    %1048 = vector.broadcast %c-3_i32_414 : i32 to vector<1x256xi32>
    %1049 = arith.addi %9, %1048 : vector<1x256xi32>
    %c16_i32_415 = arith.constant 16 : i32
    %1050 = vector.broadcast %c16_i32_415 : i32 to vector<1x256xi32>
    %1051 = arith.cmpi slt, %1049, %1050 : vector<1x256xi32>
    %1052 = arith.andi %1047, %1051 : vector<1x256xi1>
    %1053 = arith.andi %1043, %1052 : vector<1x256xi1>
    %c1_416 = arith.constant 1 : index
    %c16_417 = arith.constant 16 : index
    %1054 = vector.load %arg5[%c1_416, %c16_417] : memref<2x358xf32, #tpu.memory_space<vmem>>, vector<1x256xf32>
    %c56 = arith.constant 56 : index
    %1055 = memref.load %arg1[%c56] : memref<98xf32, #tpu.memory_space<smem>>
    %cst_418 = arith.constant 0.000000e+00 : f32
    %1056 = vector.broadcast %cst_418 : f32 to vector<1x256xf32>
    %1057 = arith.select %1053, %1054, %1056 : vector<1x256xi1>, vector<1x256xf32>
    %1058 = vector.broadcast %1055 : f32 to vector<1x256xf32>
    %1059 = arith.mulf %1057, %1058 : vector<1x256xf32>
    %1060 = arith.addf %1034, %1059 : vector<1x256xf32>
    %c-2_i32_419 = arith.constant -2 : i32
    %1061 = vector.broadcast %c-2_i32_419 : i32 to vector<1x256xi32>
    %1062 = arith.addi %9, %1061 : vector<1x256xi32>
    %c0_i32_420 = arith.constant 0 : i32
    %1063 = vector.broadcast %c0_i32_420 : i32 to vector<1x256xi32>
    %1064 = arith.cmpi sge, %1062, %1063 : vector<1x256xi32>
    %c-2_i32_421 = arith.constant -2 : i32
    %1065 = vector.broadcast %c-2_i32_421 : i32 to vector<1x256xi32>
    %1066 = arith.addi %9, %1065 : vector<1x256xi32>
    %c16_i32_422 = arith.constant 16 : i32
    %1067 = vector.broadcast %c16_i32_422 : i32 to vector<1x256xi32>
    %1068 = arith.cmpi slt, %1066, %1067 : vector<1x256xi32>
    %1069 = arith.andi %1064, %1068 : vector<1x256xi1>
    %1070 = arith.andi %1043, %1069 : vector<1x256xi1>
    %c1_423 = arith.constant 1 : index
    %c17_424 = arith.constant 17 : index
    %1071 = vector.load %arg5[%c1_423, %c17_424] : memref<2x358xf32, #tpu.memory_space<vmem>>, vector<1x256xf32>
    %c57 = arith.constant 57 : index
    %1072 = memref.load %arg1[%c57] : memref<98xf32, #tpu.memory_space<smem>>
    %cst_425 = arith.constant 0.000000e+00 : f32
    %1073 = vector.broadcast %cst_425 : f32 to vector<1x256xf32>
    %1074 = arith.select %1070, %1071, %1073 : vector<1x256xi1>, vector<1x256xf32>
    %1075 = vector.broadcast %1072 : f32 to vector<1x256xf32>
    %1076 = arith.mulf %1074, %1075 : vector<1x256xf32>
    %1077 = arith.addf %1060, %1076 : vector<1x256xf32>
    %c-1_i32_426 = arith.constant -1 : i32
    %1078 = vector.broadcast %c-1_i32_426 : i32 to vector<1x256xi32>
    %1079 = arith.addi %9, %1078 : vector<1x256xi32>
    %c0_i32_427 = arith.constant 0 : i32
    %1080 = vector.broadcast %c0_i32_427 : i32 to vector<1x256xi32>
    %1081 = arith.cmpi sge, %1079, %1080 : vector<1x256xi32>
    %c-1_i32_428 = arith.constant -1 : i32
    %1082 = vector.broadcast %c-1_i32_428 : i32 to vector<1x256xi32>
    %1083 = arith.addi %9, %1082 : vector<1x256xi32>
    %c16_i32_429 = arith.constant 16 : i32
    %1084 = vector.broadcast %c16_i32_429 : i32 to vector<1x256xi32>
    %1085 = arith.cmpi slt, %1083, %1084 : vector<1x256xi32>
    %1086 = arith.andi %1081, %1085 : vector<1x256xi1>
    %1087 = arith.andi %1043, %1086 : vector<1x256xi1>
    %c1_430 = arith.constant 1 : index
    %c18_431 = arith.constant 18 : index
    %1088 = vector.load %arg5[%c1_430, %c18_431] : memref<2x358xf32, #tpu.memory_space<vmem>>, vector<1x256xf32>
    %c58 = arith.constant 58 : index
    %1089 = memref.load %arg1[%c58] : memref<98xf32, #tpu.memory_space<smem>>
    %cst_432 = arith.constant 0.000000e+00 : f32
    %1090 = vector.broadcast %cst_432 : f32 to vector<1x256xf32>
    %1091 = arith.select %1087, %1088, %1090 : vector<1x256xi1>, vector<1x256xf32>
    %1092 = vector.broadcast %1089 : f32 to vector<1x256xf32>
    %1093 = arith.mulf %1091, %1092 : vector<1x256xf32>
    %1094 = arith.addf %1077, %1093 : vector<1x256xf32>
    %c0_i32_433 = arith.constant 0 : i32
    %1095 = vector.broadcast %c0_i32_433 : i32 to vector<1x256xi32>
    %1096 = arith.addi %9, %1095 : vector<1x256xi32>
    %c0_i32_434 = arith.constant 0 : i32
    %1097 = vector.broadcast %c0_i32_434 : i32 to vector<1x256xi32>
    %1098 = arith.cmpi sge, %1096, %1097 : vector<1x256xi32>
    %c0_i32_435 = arith.constant 0 : i32
    %1099 = vector.broadcast %c0_i32_435 : i32 to vector<1x256xi32>
    %1100 = arith.addi %9, %1099 : vector<1x256xi32>
    %c16_i32_436 = arith.constant 16 : i32
    %1101 = vector.broadcast %c16_i32_436 : i32 to vector<1x256xi32>
    %1102 = arith.cmpi slt, %1100, %1101 : vector<1x256xi32>
    %1103 = arith.andi %1098, %1102 : vector<1x256xi1>
    %1104 = arith.andi %1043, %1103 : vector<1x256xi1>
    %c1_437 = arith.constant 1 : index
    %c19_438 = arith.constant 19 : index
    %1105 = vector.load %arg5[%c1_437, %c19_438] : memref<2x358xf32, #tpu.memory_space<vmem>>, vector<1x256xf32>
    %c59 = arith.constant 59 : index
    %1106 = memref.load %arg1[%c59] : memref<98xf32, #tpu.memory_space<smem>>
    %cst_439 = arith.constant 0.000000e+00 : f32
    %1107 = vector.broadcast %cst_439 : f32 to vector<1x256xf32>
    %1108 = arith.select %1104, %1105, %1107 : vector<1x256xi1>, vector<1x256xf32>
    %1109 = vector.broadcast %1106 : f32 to vector<1x256xf32>
    %1110 = arith.mulf %1108, %1109 : vector<1x256xf32>
    %1111 = arith.addf %1094, %1110 : vector<1x256xf32>
    %c1_i32_440 = arith.constant 1 : i32
    %1112 = vector.broadcast %c1_i32_440 : i32 to vector<1x256xi32>
    %1113 = arith.addi %9, %1112 : vector<1x256xi32>
    %c0_i32_441 = arith.constant 0 : i32
    %1114 = vector.broadcast %c0_i32_441 : i32 to vector<1x256xi32>
    %1115 = arith.cmpi sge, %1113, %1114 : vector<1x256xi32>
    %c1_i32_442 = arith.constant 1 : i32
    %1116 = vector.broadcast %c1_i32_442 : i32 to vector<1x256xi32>
    %1117 = arith.addi %9, %1116 : vector<1x256xi32>
    %c16_i32_443 = arith.constant 16 : i32
    %1118 = vector.broadcast %c16_i32_443 : i32 to vector<1x256xi32>
    %1119 = arith.cmpi slt, %1117, %1118 : vector<1x256xi32>
    %1120 = arith.andi %1115, %1119 : vector<1x256xi1>
    %1121 = arith.andi %1043, %1120 : vector<1x256xi1>
    %c1_444 = arith.constant 1 : index
    %c20_445 = arith.constant 20 : index
    %1122 = vector.load %arg5[%c1_444, %c20_445] : memref<2x358xf32, #tpu.memory_space<vmem>>, vector<1x256xf32>
    %c60 = arith.constant 60 : index
    %1123 = memref.load %arg1[%c60] : memref<98xf32, #tpu.memory_space<smem>>
    %cst_446 = arith.constant 0.000000e+00 : f32
    %1124 = vector.broadcast %cst_446 : f32 to vector<1x256xf32>
    %1125 = arith.select %1121, %1122, %1124 : vector<1x256xi1>, vector<1x256xf32>
    %1126 = vector.broadcast %1123 : f32 to vector<1x256xf32>
    %1127 = arith.mulf %1125, %1126 : vector<1x256xf32>
    %1128 = arith.addf %1111, %1127 : vector<1x256xf32>
    %c2_i32_447 = arith.constant 2 : i32
    %1129 = vector.broadcast %c2_i32_447 : i32 to vector<1x256xi32>
    %1130 = arith.addi %9, %1129 : vector<1x256xi32>
    %c0_i32_448 = arith.constant 0 : i32
    %1131 = vector.broadcast %c0_i32_448 : i32 to vector<1x256xi32>
    %1132 = arith.cmpi sge, %1130, %1131 : vector<1x256xi32>
    %c2_i32_449 = arith.constant 2 : i32
    %1133 = vector.broadcast %c2_i32_449 : i32 to vector<1x256xi32>
    %1134 = arith.addi %9, %1133 : vector<1x256xi32>
    %c16_i32_450 = arith.constant 16 : i32
    %1135 = vector.broadcast %c16_i32_450 : i32 to vector<1x256xi32>
    %1136 = arith.cmpi slt, %1134, %1135 : vector<1x256xi32>
    %1137 = arith.andi %1132, %1136 : vector<1x256xi1>
    %1138 = arith.andi %1043, %1137 : vector<1x256xi1>
    %c1_451 = arith.constant 1 : index
    %c21_452 = arith.constant 21 : index
    %1139 = vector.load %arg5[%c1_451, %c21_452] : memref<2x358xf32, #tpu.memory_space<vmem>>, vector<1x256xf32>
    %c61 = arith.constant 61 : index
    %1140 = memref.load %arg1[%c61] : memref<98xf32, #tpu.memory_space<smem>>
    %cst_453 = arith.constant 0.000000e+00 : f32
    %1141 = vector.broadcast %cst_453 : f32 to vector<1x256xf32>
    %1142 = arith.select %1138, %1139, %1141 : vector<1x256xi1>, vector<1x256xf32>
    %1143 = vector.broadcast %1140 : f32 to vector<1x256xf32>
    %1144 = arith.mulf %1142, %1143 : vector<1x256xf32>
    %1145 = arith.addf %1128, %1144 : vector<1x256xf32>
    %c3_i32_454 = arith.constant 3 : i32
    %1146 = vector.broadcast %c3_i32_454 : i32 to vector<1x256xi32>
    %1147 = arith.addi %9, %1146 : vector<1x256xi32>
    %c0_i32_455 = arith.constant 0 : i32
    %1148 = vector.broadcast %c0_i32_455 : i32 to vector<1x256xi32>
    %1149 = arith.cmpi sge, %1147, %1148 : vector<1x256xi32>
    %c3_i32_456 = arith.constant 3 : i32
    %1150 = vector.broadcast %c3_i32_456 : i32 to vector<1x256xi32>
    %1151 = arith.addi %9, %1150 : vector<1x256xi32>
    %c16_i32_457 = arith.constant 16 : i32
    %1152 = vector.broadcast %c16_i32_457 : i32 to vector<1x256xi32>
    %1153 = arith.cmpi slt, %1151, %1152 : vector<1x256xi32>
    %1154 = arith.andi %1149, %1153 : vector<1x256xi1>
    %1155 = arith.andi %1043, %1154 : vector<1x256xi1>
    %c1_458 = arith.constant 1 : index
    %c22_459 = arith.constant 22 : index
    %1156 = vector.load %arg5[%c1_458, %c22_459] : memref<2x358xf32, #tpu.memory_space<vmem>>, vector<1x256xf32>
    %c62 = arith.constant 62 : index
    %1157 = memref.load %arg1[%c62] : memref<98xf32, #tpu.memory_space<smem>>
    %cst_460 = arith.constant 0.000000e+00 : f32
    %1158 = vector.broadcast %cst_460 : f32 to vector<1x256xf32>
    %1159 = arith.select %1155, %1156, %1158 : vector<1x256xi1>, vector<1x256xf32>
    %1160 = vector.broadcast %1157 : f32 to vector<1x256xf32>
    %1161 = arith.mulf %1159, %1160 : vector<1x256xf32>
    %1162 = arith.addf %1145, %1161 : vector<1x256xf32>
    %c-1_i32_461 = arith.constant -1 : i32
    %1163 = vector.broadcast %c-1_i32_461 : i32 to vector<1x256xi32>
    %1164 = arith.addi %8, %1163 : vector<1x256xi32>
    %c0_i32_462 = arith.constant 0 : i32
    %1165 = vector.broadcast %c0_i32_462 : i32 to vector<1x256xi32>
    %1166 = arith.cmpi sge, %1164, %1165 : vector<1x256xi32>
    %c-1_i32_463 = arith.constant -1 : i32
    %1167 = vector.broadcast %c-1_i32_463 : i32 to vector<1x256xi32>
    %1168 = arith.addi %8, %1167 : vector<1x256xi32>
    %c16_i32_464 = arith.constant 16 : i32
    %1169 = vector.broadcast %c16_i32_464 : i32 to vector<1x256xi32>
    %1170 = arith.cmpi slt, %1168, %1169 : vector<1x256xi32>
    %1171 = arith.andi %1166, %1170 : vector<1x256xi1>
    %c-3_i32_465 = arith.constant -3 : i32
    %1172 = vector.broadcast %c-3_i32_465 : i32 to vector<1x256xi32>
    %1173 = arith.addi %9, %1172 : vector<1x256xi32>
    %c0_i32_466 = arith.constant 0 : i32
    %1174 = vector.broadcast %c0_i32_466 : i32 to vector<1x256xi32>
    %1175 = arith.cmpi sge, %1173, %1174 : vector<1x256xi32>
    %c-3_i32_467 = arith.constant -3 : i32
    %1176 = vector.broadcast %c-3_i32_467 : i32 to vector<1x256xi32>
    %1177 = arith.addi %9, %1176 : vector<1x256xi32>
    %c16_i32_468 = arith.constant 16 : i32
    %1178 = vector.broadcast %c16_i32_468 : i32 to vector<1x256xi32>
    %1179 = arith.cmpi slt, %1177, %1178 : vector<1x256xi32>
    %1180 = arith.andi %1175, %1179 : vector<1x256xi1>
    %1181 = arith.andi %1171, %1180 : vector<1x256xi1>
    %c1_469 = arith.constant 1 : index
    %c32_470 = arith.constant 32 : index
    %1182 = vector.load %arg5[%c1_469, %c32_470] : memref<2x358xf32, #tpu.memory_space<vmem>>, vector<1x256xf32>
    %c63 = arith.constant 63 : index
    %1183 = memref.load %arg1[%c63] : memref<98xf32, #tpu.memory_space<smem>>
    %cst_471 = arith.constant 0.000000e+00 : f32
    %1184 = vector.broadcast %cst_471 : f32 to vector<1x256xf32>
    %1185 = arith.select %1181, %1182, %1184 : vector<1x256xi1>, vector<1x256xf32>
    %1186 = vector.broadcast %1183 : f32 to vector<1x256xf32>
    %1187 = arith.mulf %1185, %1186 : vector<1x256xf32>
    %1188 = arith.addf %1162, %1187 : vector<1x256xf32>
    %c-2_i32_472 = arith.constant -2 : i32
    %1189 = vector.broadcast %c-2_i32_472 : i32 to vector<1x256xi32>
    %1190 = arith.addi %9, %1189 : vector<1x256xi32>
    %c0_i32_473 = arith.constant 0 : i32
    %1191 = vector.broadcast %c0_i32_473 : i32 to vector<1x256xi32>
    %1192 = arith.cmpi sge, %1190, %1191 : vector<1x256xi32>
    %c-2_i32_474 = arith.constant -2 : i32
    %1193 = vector.broadcast %c-2_i32_474 : i32 to vector<1x256xi32>
    %1194 = arith.addi %9, %1193 : vector<1x256xi32>
    %c16_i32_475 = arith.constant 16 : i32
    %1195 = vector.broadcast %c16_i32_475 : i32 to vector<1x256xi32>
    %1196 = arith.cmpi slt, %1194, %1195 : vector<1x256xi32>
    %1197 = arith.andi %1192, %1196 : vector<1x256xi1>
    %1198 = arith.andi %1171, %1197 : vector<1x256xi1>
    %c1_476 = arith.constant 1 : index
    %c33_477 = arith.constant 33 : index
    %1199 = vector.load %arg5[%c1_476, %c33_477] : memref<2x358xf32, #tpu.memory_space<vmem>>, vector<1x256xf32>
    %c64_478 = arith.constant 64 : index
    %1200 = memref.load %arg1[%c64_478] : memref<98xf32, #tpu.memory_space<smem>>
    %cst_479 = arith.constant 0.000000e+00 : f32
    %1201 = vector.broadcast %cst_479 : f32 to vector<1x256xf32>
    %1202 = arith.select %1198, %1199, %1201 : vector<1x256xi1>, vector<1x256xf32>
    %1203 = vector.broadcast %1200 : f32 to vector<1x256xf32>
    %1204 = arith.mulf %1202, %1203 : vector<1x256xf32>
    %1205 = arith.addf %1188, %1204 : vector<1x256xf32>
    %c-1_i32_480 = arith.constant -1 : i32
    %1206 = vector.broadcast %c-1_i32_480 : i32 to vector<1x256xi32>
    %1207 = arith.addi %9, %1206 : vector<1x256xi32>
    %c0_i32_481 = arith.constant 0 : i32
    %1208 = vector.broadcast %c0_i32_481 : i32 to vector<1x256xi32>
    %1209 = arith.cmpi sge, %1207, %1208 : vector<1x256xi32>
    %c-1_i32_482 = arith.constant -1 : i32
    %1210 = vector.broadcast %c-1_i32_482 : i32 to vector<1x256xi32>
    %1211 = arith.addi %9, %1210 : vector<1x256xi32>
    %c16_i32_483 = arith.constant 16 : i32
    %1212 = vector.broadcast %c16_i32_483 : i32 to vector<1x256xi32>
    %1213 = arith.cmpi slt, %1211, %1212 : vector<1x256xi32>
    %1214 = arith.andi %1209, %1213 : vector<1x256xi1>
    %1215 = arith.andi %1171, %1214 : vector<1x256xi1>
    %c1_484 = arith.constant 1 : index
    %c34_485 = arith.constant 34 : index
    %1216 = vector.load %arg5[%c1_484, %c34_485] : memref<2x358xf32, #tpu.memory_space<vmem>>, vector<1x256xf32>
    %c65_486 = arith.constant 65 : index
    %1217 = memref.load %arg1[%c65_486] : memref<98xf32, #tpu.memory_space<smem>>
    %cst_487 = arith.constant 0.000000e+00 : f32
    %1218 = vector.broadcast %cst_487 : f32 to vector<1x256xf32>
    %1219 = arith.select %1215, %1216, %1218 : vector<1x256xi1>, vector<1x256xf32>
    %1220 = vector.broadcast %1217 : f32 to vector<1x256xf32>
    %1221 = arith.mulf %1219, %1220 : vector<1x256xf32>
    %1222 = arith.addf %1205, %1221 : vector<1x256xf32>
    %c0_i32_488 = arith.constant 0 : i32
    %1223 = vector.broadcast %c0_i32_488 : i32 to vector<1x256xi32>
    %1224 = arith.addi %9, %1223 : vector<1x256xi32>
    %c0_i32_489 = arith.constant 0 : i32
    %1225 = vector.broadcast %c0_i32_489 : i32 to vector<1x256xi32>
    %1226 = arith.cmpi sge, %1224, %1225 : vector<1x256xi32>
    %c0_i32_490 = arith.constant 0 : i32
    %1227 = vector.broadcast %c0_i32_490 : i32 to vector<1x256xi32>
    %1228 = arith.addi %9, %1227 : vector<1x256xi32>
    %c16_i32_491 = arith.constant 16 : i32
    %1229 = vector.broadcast %c16_i32_491 : i32 to vector<1x256xi32>
    %1230 = arith.cmpi slt, %1228, %1229 : vector<1x256xi32>
    %1231 = arith.andi %1226, %1230 : vector<1x256xi1>
    %1232 = arith.andi %1171, %1231 : vector<1x256xi1>
    %c1_492 = arith.constant 1 : index
    %c35_493 = arith.constant 35 : index
    %1233 = vector.load %arg5[%c1_492, %c35_493] : memref<2x358xf32, #tpu.memory_space<vmem>>, vector<1x256xf32>
    %c66_494 = arith.constant 66 : index
    %1234 = memref.load %arg1[%c66_494] : memref<98xf32, #tpu.memory_space<smem>>
    %cst_495 = arith.constant 0.000000e+00 : f32
    %1235 = vector.broadcast %cst_495 : f32 to vector<1x256xf32>
    %1236 = arith.select %1232, %1233, %1235 : vector<1x256xi1>, vector<1x256xf32>
    %1237 = vector.broadcast %1234 : f32 to vector<1x256xf32>
    %1238 = arith.mulf %1236, %1237 : vector<1x256xf32>
    %1239 = arith.addf %1222, %1238 : vector<1x256xf32>
    %c1_i32_496 = arith.constant 1 : i32
    %1240 = vector.broadcast %c1_i32_496 : i32 to vector<1x256xi32>
    %1241 = arith.addi %9, %1240 : vector<1x256xi32>
    %c0_i32_497 = arith.constant 0 : i32
    %1242 = vector.broadcast %c0_i32_497 : i32 to vector<1x256xi32>
    %1243 = arith.cmpi sge, %1241, %1242 : vector<1x256xi32>
    %c1_i32_498 = arith.constant 1 : i32
    %1244 = vector.broadcast %c1_i32_498 : i32 to vector<1x256xi32>
    %1245 = arith.addi %9, %1244 : vector<1x256xi32>
    %c16_i32_499 = arith.constant 16 : i32
    %1246 = vector.broadcast %c16_i32_499 : i32 to vector<1x256xi32>
    %1247 = arith.cmpi slt, %1245, %1246 : vector<1x256xi32>
    %1248 = arith.andi %1243, %1247 : vector<1x256xi1>
    %1249 = arith.andi %1171, %1248 : vector<1x256xi1>
    %c1_500 = arith.constant 1 : index
    %c36_501 = arith.constant 36 : index
    %1250 = vector.load %arg5[%c1_500, %c36_501] : memref<2x358xf32, #tpu.memory_space<vmem>>, vector<1x256xf32>
    %c67_502 = arith.constant 67 : index
    %1251 = memref.load %arg1[%c67_502] : memref<98xf32, #tpu.memory_space<smem>>
    %cst_503 = arith.constant 0.000000e+00 : f32
    %1252 = vector.broadcast %cst_503 : f32 to vector<1x256xf32>
    %1253 = arith.select %1249, %1250, %1252 : vector<1x256xi1>, vector<1x256xf32>
    %1254 = vector.broadcast %1251 : f32 to vector<1x256xf32>
    %1255 = arith.mulf %1253, %1254 : vector<1x256xf32>
    %1256 = arith.addf %1239, %1255 : vector<1x256xf32>
    %c2_i32_504 = arith.constant 2 : i32
    %1257 = vector.broadcast %c2_i32_504 : i32 to vector<1x256xi32>
    %1258 = arith.addi %9, %1257 : vector<1x256xi32>
    %c0_i32_505 = arith.constant 0 : i32
    %1259 = vector.broadcast %c0_i32_505 : i32 to vector<1x256xi32>
    %1260 = arith.cmpi sge, %1258, %1259 : vector<1x256xi32>
    %c2_i32_506 = arith.constant 2 : i32
    %1261 = vector.broadcast %c2_i32_506 : i32 to vector<1x256xi32>
    %1262 = arith.addi %9, %1261 : vector<1x256xi32>
    %c16_i32_507 = arith.constant 16 : i32
    %1263 = vector.broadcast %c16_i32_507 : i32 to vector<1x256xi32>
    %1264 = arith.cmpi slt, %1262, %1263 : vector<1x256xi32>
    %1265 = arith.andi %1260, %1264 : vector<1x256xi1>
    %1266 = arith.andi %1171, %1265 : vector<1x256xi1>
    %c1_508 = arith.constant 1 : index
    %c37_509 = arith.constant 37 : index
    %1267 = vector.load %arg5[%c1_508, %c37_509] : memref<2x358xf32, #tpu.memory_space<vmem>>, vector<1x256xf32>
    %c68_510 = arith.constant 68 : index
    %1268 = memref.load %arg1[%c68_510] : memref<98xf32, #tpu.memory_space<smem>>
    %cst_511 = arith.constant 0.000000e+00 : f32
    %1269 = vector.broadcast %cst_511 : f32 to vector<1x256xf32>
    %1270 = arith.select %1266, %1267, %1269 : vector<1x256xi1>, vector<1x256xf32>
    %1271 = vector.broadcast %1268 : f32 to vector<1x256xf32>
    %1272 = arith.mulf %1270, %1271 : vector<1x256xf32>
    %1273 = arith.addf %1256, %1272 : vector<1x256xf32>
    %c3_i32_512 = arith.constant 3 : i32
    %1274 = vector.broadcast %c3_i32_512 : i32 to vector<1x256xi32>
    %1275 = arith.addi %9, %1274 : vector<1x256xi32>
    %c0_i32_513 = arith.constant 0 : i32
    %1276 = vector.broadcast %c0_i32_513 : i32 to vector<1x256xi32>
    %1277 = arith.cmpi sge, %1275, %1276 : vector<1x256xi32>
    %c3_i32_514 = arith.constant 3 : i32
    %1278 = vector.broadcast %c3_i32_514 : i32 to vector<1x256xi32>
    %1279 = arith.addi %9, %1278 : vector<1x256xi32>
    %c16_i32_515 = arith.constant 16 : i32
    %1280 = vector.broadcast %c16_i32_515 : i32 to vector<1x256xi32>
    %1281 = arith.cmpi slt, %1279, %1280 : vector<1x256xi32>
    %1282 = arith.andi %1277, %1281 : vector<1x256xi1>
    %1283 = arith.andi %1171, %1282 : vector<1x256xi1>
    %c1_516 = arith.constant 1 : index
    %c38_517 = arith.constant 38 : index
    %1284 = vector.load %arg5[%c1_516, %c38_517] : memref<2x358xf32, #tpu.memory_space<vmem>>, vector<1x256xf32>
    %c69_518 = arith.constant 69 : index
    %1285 = memref.load %arg1[%c69_518] : memref<98xf32, #tpu.memory_space<smem>>
    %cst_519 = arith.constant 0.000000e+00 : f32
    %1286 = vector.broadcast %cst_519 : f32 to vector<1x256xf32>
    %1287 = arith.select %1283, %1284, %1286 : vector<1x256xi1>, vector<1x256xf32>
    %1288 = vector.broadcast %1285 : f32 to vector<1x256xf32>
    %1289 = arith.mulf %1287, %1288 : vector<1x256xf32>
    %1290 = arith.addf %1273, %1289 : vector<1x256xf32>
    %c0_i32_520 = arith.constant 0 : i32
    %1291 = vector.broadcast %c0_i32_520 : i32 to vector<1x256xi32>
    %1292 = arith.addi %8, %1291 : vector<1x256xi32>
    %c0_i32_521 = arith.constant 0 : i32
    %1293 = vector.broadcast %c0_i32_521 : i32 to vector<1x256xi32>
    %1294 = arith.cmpi sge, %1292, %1293 : vector<1x256xi32>
    %c0_i32_522 = arith.constant 0 : i32
    %1295 = vector.broadcast %c0_i32_522 : i32 to vector<1x256xi32>
    %1296 = arith.addi %8, %1295 : vector<1x256xi32>
    %c16_i32_523 = arith.constant 16 : i32
    %1297 = vector.broadcast %c16_i32_523 : i32 to vector<1x256xi32>
    %1298 = arith.cmpi slt, %1296, %1297 : vector<1x256xi32>
    %1299 = arith.andi %1294, %1298 : vector<1x256xi1>
    %c-3_i32_524 = arith.constant -3 : i32
    %1300 = vector.broadcast %c-3_i32_524 : i32 to vector<1x256xi32>
    %1301 = arith.addi %9, %1300 : vector<1x256xi32>
    %c0_i32_525 = arith.constant 0 : i32
    %1302 = vector.broadcast %c0_i32_525 : i32 to vector<1x256xi32>
    %1303 = arith.cmpi sge, %1301, %1302 : vector<1x256xi32>
    %c-3_i32_526 = arith.constant -3 : i32
    %1304 = vector.broadcast %c-3_i32_526 : i32 to vector<1x256xi32>
    %1305 = arith.addi %9, %1304 : vector<1x256xi32>
    %c16_i32_527 = arith.constant 16 : i32
    %1306 = vector.broadcast %c16_i32_527 : i32 to vector<1x256xi32>
    %1307 = arith.cmpi slt, %1305, %1306 : vector<1x256xi32>
    %1308 = arith.andi %1303, %1307 : vector<1x256xi1>
    %1309 = arith.andi %1299, %1308 : vector<1x256xi1>
    %c1_528 = arith.constant 1 : index
    %c48_529 = arith.constant 48 : index
    %1310 = vector.load %arg5[%c1_528, %c48_529] : memref<2x358xf32, #tpu.memory_space<vmem>>, vector<1x256xf32>
    %c70_530 = arith.constant 70 : index
    %1311 = memref.load %arg1[%c70_530] : memref<98xf32, #tpu.memory_space<smem>>
    %cst_531 = arith.constant 0.000000e+00 : f32
    %1312 = vector.broadcast %cst_531 : f32 to vector<1x256xf32>
    %1313 = arith.select %1309, %1310, %1312 : vector<1x256xi1>, vector<1x256xf32>
    %1314 = vector.broadcast %1311 : f32 to vector<1x256xf32>
    %1315 = arith.mulf %1313, %1314 : vector<1x256xf32>
    %1316 = arith.addf %1290, %1315 : vector<1x256xf32>
    %c-2_i32_532 = arith.constant -2 : i32
    %1317 = vector.broadcast %c-2_i32_532 : i32 to vector<1x256xi32>
    %1318 = arith.addi %9, %1317 : vector<1x256xi32>
    %c0_i32_533 = arith.constant 0 : i32
    %1319 = vector.broadcast %c0_i32_533 : i32 to vector<1x256xi32>
    %1320 = arith.cmpi sge, %1318, %1319 : vector<1x256xi32>
    %c-2_i32_534 = arith.constant -2 : i32
    %1321 = vector.broadcast %c-2_i32_534 : i32 to vector<1x256xi32>
    %1322 = arith.addi %9, %1321 : vector<1x256xi32>
    %c16_i32_535 = arith.constant 16 : i32
    %1323 = vector.broadcast %c16_i32_535 : i32 to vector<1x256xi32>
    %1324 = arith.cmpi slt, %1322, %1323 : vector<1x256xi32>
    %1325 = arith.andi %1320, %1324 : vector<1x256xi1>
    %1326 = arith.andi %1299, %1325 : vector<1x256xi1>
    %c1_536 = arith.constant 1 : index
    %c49_537 = arith.constant 49 : index
    %1327 = vector.load %arg5[%c1_536, %c49_537] : memref<2x358xf32, #tpu.memory_space<vmem>>, vector<1x256xf32>
    %c71 = arith.constant 71 : index
    %1328 = memref.load %arg1[%c71] : memref<98xf32, #tpu.memory_space<smem>>
    %cst_538 = arith.constant 0.000000e+00 : f32
    %1329 = vector.broadcast %cst_538 : f32 to vector<1x256xf32>
    %1330 = arith.select %1326, %1327, %1329 : vector<1x256xi1>, vector<1x256xf32>
    %1331 = vector.broadcast %1328 : f32 to vector<1x256xf32>
    %1332 = arith.mulf %1330, %1331 : vector<1x256xf32>
    %1333 = arith.addf %1316, %1332 : vector<1x256xf32>
    %c-1_i32_539 = arith.constant -1 : i32
    %1334 = vector.broadcast %c-1_i32_539 : i32 to vector<1x256xi32>
    %1335 = arith.addi %9, %1334 : vector<1x256xi32>
    %c0_i32_540 = arith.constant 0 : i32
    %1336 = vector.broadcast %c0_i32_540 : i32 to vector<1x256xi32>
    %1337 = arith.cmpi sge, %1335, %1336 : vector<1x256xi32>
    %c-1_i32_541 = arith.constant -1 : i32
    %1338 = vector.broadcast %c-1_i32_541 : i32 to vector<1x256xi32>
    %1339 = arith.addi %9, %1338 : vector<1x256xi32>
    %c16_i32_542 = arith.constant 16 : i32
    %1340 = vector.broadcast %c16_i32_542 : i32 to vector<1x256xi32>
    %1341 = arith.cmpi slt, %1339, %1340 : vector<1x256xi32>
    %1342 = arith.andi %1337, %1341 : vector<1x256xi1>
    %1343 = arith.andi %1299, %1342 : vector<1x256xi1>
    %c1_543 = arith.constant 1 : index
    %c50_544 = arith.constant 50 : index
    %1344 = vector.load %arg5[%c1_543, %c50_544] : memref<2x358xf32, #tpu.memory_space<vmem>>, vector<1x256xf32>
    %c72 = arith.constant 72 : index
    %1345 = memref.load %arg1[%c72] : memref<98xf32, #tpu.memory_space<smem>>
    %cst_545 = arith.constant 0.000000e+00 : f32
    %1346 = vector.broadcast %cst_545 : f32 to vector<1x256xf32>
    %1347 = arith.select %1343, %1344, %1346 : vector<1x256xi1>, vector<1x256xf32>
    %1348 = vector.broadcast %1345 : f32 to vector<1x256xf32>
    %1349 = arith.mulf %1347, %1348 : vector<1x256xf32>
    %1350 = arith.addf %1333, %1349 : vector<1x256xf32>
    %c0_i32_546 = arith.constant 0 : i32
    %1351 = vector.broadcast %c0_i32_546 : i32 to vector<1x256xi32>
    %1352 = arith.addi %9, %1351 : vector<1x256xi32>
    %c0_i32_547 = arith.constant 0 : i32
    %1353 = vector.broadcast %c0_i32_547 : i32 to vector<1x256xi32>
    %1354 = arith.cmpi sge, %1352, %1353 : vector<1x256xi32>
    %c0_i32_548 = arith.constant 0 : i32
    %1355 = vector.broadcast %c0_i32_548 : i32 to vector<1x256xi32>
    %1356 = arith.addi %9, %1355 : vector<1x256xi32>
    %c16_i32_549 = arith.constant 16 : i32
    %1357 = vector.broadcast %c16_i32_549 : i32 to vector<1x256xi32>
    %1358 = arith.cmpi slt, %1356, %1357 : vector<1x256xi32>
    %1359 = arith.andi %1354, %1358 : vector<1x256xi1>
    %1360 = arith.andi %1299, %1359 : vector<1x256xi1>
    %c1_550 = arith.constant 1 : index
    %c51_551 = arith.constant 51 : index
    %1361 = vector.load %arg5[%c1_550, %c51_551] : memref<2x358xf32, #tpu.memory_space<vmem>>, vector<1x256xf32>
    %c73 = arith.constant 73 : index
    %1362 = memref.load %arg1[%c73] : memref<98xf32, #tpu.memory_space<smem>>
    %cst_552 = arith.constant 0.000000e+00 : f32
    %1363 = vector.broadcast %cst_552 : f32 to vector<1x256xf32>
    %1364 = arith.select %1360, %1361, %1363 : vector<1x256xi1>, vector<1x256xf32>
    %1365 = vector.broadcast %1362 : f32 to vector<1x256xf32>
    %1366 = arith.mulf %1364, %1365 : vector<1x256xf32>
    %1367 = arith.addf %1350, %1366 : vector<1x256xf32>
    %c1_i32_553 = arith.constant 1 : i32
    %1368 = vector.broadcast %c1_i32_553 : i32 to vector<1x256xi32>
    %1369 = arith.addi %9, %1368 : vector<1x256xi32>
    %c0_i32_554 = arith.constant 0 : i32
    %1370 = vector.broadcast %c0_i32_554 : i32 to vector<1x256xi32>
    %1371 = arith.cmpi sge, %1369, %1370 : vector<1x256xi32>
    %c1_i32_555 = arith.constant 1 : i32
    %1372 = vector.broadcast %c1_i32_555 : i32 to vector<1x256xi32>
    %1373 = arith.addi %9, %1372 : vector<1x256xi32>
    %c16_i32_556 = arith.constant 16 : i32
    %1374 = vector.broadcast %c16_i32_556 : i32 to vector<1x256xi32>
    %1375 = arith.cmpi slt, %1373, %1374 : vector<1x256xi32>
    %1376 = arith.andi %1371, %1375 : vector<1x256xi1>
    %1377 = arith.andi %1299, %1376 : vector<1x256xi1>
    %c1_557 = arith.constant 1 : index
    %c52_558 = arith.constant 52 : index
    %1378 = vector.load %arg5[%c1_557, %c52_558] : memref<2x358xf32, #tpu.memory_space<vmem>>, vector<1x256xf32>
    %c74 = arith.constant 74 : index
    %1379 = memref.load %arg1[%c74] : memref<98xf32, #tpu.memory_space<smem>>
    %cst_559 = arith.constant 0.000000e+00 : f32
    %1380 = vector.broadcast %cst_559 : f32 to vector<1x256xf32>
    %1381 = arith.select %1377, %1378, %1380 : vector<1x256xi1>, vector<1x256xf32>
    %1382 = vector.broadcast %1379 : f32 to vector<1x256xf32>
    %1383 = arith.mulf %1381, %1382 : vector<1x256xf32>
    %1384 = arith.addf %1367, %1383 : vector<1x256xf32>
    %c2_i32_560 = arith.constant 2 : i32
    %1385 = vector.broadcast %c2_i32_560 : i32 to vector<1x256xi32>
    %1386 = arith.addi %9, %1385 : vector<1x256xi32>
    %c0_i32_561 = arith.constant 0 : i32
    %1387 = vector.broadcast %c0_i32_561 : i32 to vector<1x256xi32>
    %1388 = arith.cmpi sge, %1386, %1387 : vector<1x256xi32>
    %c2_i32_562 = arith.constant 2 : i32
    %1389 = vector.broadcast %c2_i32_562 : i32 to vector<1x256xi32>
    %1390 = arith.addi %9, %1389 : vector<1x256xi32>
    %c16_i32_563 = arith.constant 16 : i32
    %1391 = vector.broadcast %c16_i32_563 : i32 to vector<1x256xi32>
    %1392 = arith.cmpi slt, %1390, %1391 : vector<1x256xi32>
    %1393 = arith.andi %1388, %1392 : vector<1x256xi1>
    %1394 = arith.andi %1299, %1393 : vector<1x256xi1>
    %c1_564 = arith.constant 1 : index
    %c53_565 = arith.constant 53 : index
    %1395 = vector.load %arg5[%c1_564, %c53_565] : memref<2x358xf32, #tpu.memory_space<vmem>>, vector<1x256xf32>
    %c75 = arith.constant 75 : index
    %1396 = memref.load %arg1[%c75] : memref<98xf32, #tpu.memory_space<smem>>
    %cst_566 = arith.constant 0.000000e+00 : f32
    %1397 = vector.broadcast %cst_566 : f32 to vector<1x256xf32>
    %1398 = arith.select %1394, %1395, %1397 : vector<1x256xi1>, vector<1x256xf32>
    %1399 = vector.broadcast %1396 : f32 to vector<1x256xf32>
    %1400 = arith.mulf %1398, %1399 : vector<1x256xf32>
    %1401 = arith.addf %1384, %1400 : vector<1x256xf32>
    %c3_i32_567 = arith.constant 3 : i32
    %1402 = vector.broadcast %c3_i32_567 : i32 to vector<1x256xi32>
    %1403 = arith.addi %9, %1402 : vector<1x256xi32>
    %c0_i32_568 = arith.constant 0 : i32
    %1404 = vector.broadcast %c0_i32_568 : i32 to vector<1x256xi32>
    %1405 = arith.cmpi sge, %1403, %1404 : vector<1x256xi32>
    %c3_i32_569 = arith.constant 3 : i32
    %1406 = vector.broadcast %c3_i32_569 : i32 to vector<1x256xi32>
    %1407 = arith.addi %9, %1406 : vector<1x256xi32>
    %c16_i32_570 = arith.constant 16 : i32
    %1408 = vector.broadcast %c16_i32_570 : i32 to vector<1x256xi32>
    %1409 = arith.cmpi slt, %1407, %1408 : vector<1x256xi32>
    %1410 = arith.andi %1405, %1409 : vector<1x256xi1>
    %1411 = arith.andi %1299, %1410 : vector<1x256xi1>
    %c1_571 = arith.constant 1 : index
    %c54_572 = arith.constant 54 : index
    %1412 = vector.load %arg5[%c1_571, %c54_572] : memref<2x358xf32, #tpu.memory_space<vmem>>, vector<1x256xf32>
    %c76 = arith.constant 76 : index
    %1413 = memref.load %arg1[%c76] : memref<98xf32, #tpu.memory_space<smem>>
    %cst_573 = arith.constant 0.000000e+00 : f32
    %1414 = vector.broadcast %cst_573 : f32 to vector<1x256xf32>
    %1415 = arith.select %1411, %1412, %1414 : vector<1x256xi1>, vector<1x256xf32>
    %1416 = vector.broadcast %1413 : f32 to vector<1x256xf32>
    %1417 = arith.mulf %1415, %1416 : vector<1x256xf32>
    %1418 = arith.addf %1401, %1417 : vector<1x256xf32>
    %c1_i32_574 = arith.constant 1 : i32
    %1419 = vector.broadcast %c1_i32_574 : i32 to vector<1x256xi32>
    %1420 = arith.addi %8, %1419 : vector<1x256xi32>
    %c0_i32_575 = arith.constant 0 : i32
    %1421 = vector.broadcast %c0_i32_575 : i32 to vector<1x256xi32>
    %1422 = arith.cmpi sge, %1420, %1421 : vector<1x256xi32>
    %c1_i32_576 = arith.constant 1 : i32
    %1423 = vector.broadcast %c1_i32_576 : i32 to vector<1x256xi32>
    %1424 = arith.addi %8, %1423 : vector<1x256xi32>
    %c16_i32_577 = arith.constant 16 : i32
    %1425 = vector.broadcast %c16_i32_577 : i32 to vector<1x256xi32>
    %1426 = arith.cmpi slt, %1424, %1425 : vector<1x256xi32>
    %1427 = arith.andi %1422, %1426 : vector<1x256xi1>
    %c-3_i32_578 = arith.constant -3 : i32
    %1428 = vector.broadcast %c-3_i32_578 : i32 to vector<1x256xi32>
    %1429 = arith.addi %9, %1428 : vector<1x256xi32>
    %c0_i32_579 = arith.constant 0 : i32
    %1430 = vector.broadcast %c0_i32_579 : i32 to vector<1x256xi32>
    %1431 = arith.cmpi sge, %1429, %1430 : vector<1x256xi32>
    %c-3_i32_580 = arith.constant -3 : i32
    %1432 = vector.broadcast %c-3_i32_580 : i32 to vector<1x256xi32>
    %1433 = arith.addi %9, %1432 : vector<1x256xi32>
    %c16_i32_581 = arith.constant 16 : i32
    %1434 = vector.broadcast %c16_i32_581 : i32 to vector<1x256xi32>
    %1435 = arith.cmpi slt, %1433, %1434 : vector<1x256xi32>
    %1436 = arith.andi %1431, %1435 : vector<1x256xi1>
    %1437 = arith.andi %1427, %1436 : vector<1x256xi1>
    %c1_582 = arith.constant 1 : index
    %c64_583 = arith.constant 64 : index
    %1438 = vector.load %arg5[%c1_582, %c64_583] : memref<2x358xf32, #tpu.memory_space<vmem>>, vector<1x256xf32>
    %c77 = arith.constant 77 : index
    %1439 = memref.load %arg1[%c77] : memref<98xf32, #tpu.memory_space<smem>>
    %cst_584 = arith.constant 0.000000e+00 : f32
    %1440 = vector.broadcast %cst_584 : f32 to vector<1x256xf32>
    %1441 = arith.select %1437, %1438, %1440 : vector<1x256xi1>, vector<1x256xf32>
    %1442 = vector.broadcast %1439 : f32 to vector<1x256xf32>
    %1443 = arith.mulf %1441, %1442 : vector<1x256xf32>
    %1444 = arith.addf %1418, %1443 : vector<1x256xf32>
    %c-2_i32_585 = arith.constant -2 : i32
    %1445 = vector.broadcast %c-2_i32_585 : i32 to vector<1x256xi32>
    %1446 = arith.addi %9, %1445 : vector<1x256xi32>
    %c0_i32_586 = arith.constant 0 : i32
    %1447 = vector.broadcast %c0_i32_586 : i32 to vector<1x256xi32>
    %1448 = arith.cmpi sge, %1446, %1447 : vector<1x256xi32>
    %c-2_i32_587 = arith.constant -2 : i32
    %1449 = vector.broadcast %c-2_i32_587 : i32 to vector<1x256xi32>
    %1450 = arith.addi %9, %1449 : vector<1x256xi32>
    %c16_i32_588 = arith.constant 16 : i32
    %1451 = vector.broadcast %c16_i32_588 : i32 to vector<1x256xi32>
    %1452 = arith.cmpi slt, %1450, %1451 : vector<1x256xi32>
    %1453 = arith.andi %1448, %1452 : vector<1x256xi1>
    %1454 = arith.andi %1427, %1453 : vector<1x256xi1>
    %c1_589 = arith.constant 1 : index
    %c65_590 = arith.constant 65 : index
    %1455 = vector.load %arg5[%c1_589, %c65_590] : memref<2x358xf32, #tpu.memory_space<vmem>>, vector<1x256xf32>
    %c78 = arith.constant 78 : index
    %1456 = memref.load %arg1[%c78] : memref<98xf32, #tpu.memory_space<smem>>
    %cst_591 = arith.constant 0.000000e+00 : f32
    %1457 = vector.broadcast %cst_591 : f32 to vector<1x256xf32>
    %1458 = arith.select %1454, %1455, %1457 : vector<1x256xi1>, vector<1x256xf32>
    %1459 = vector.broadcast %1456 : f32 to vector<1x256xf32>
    %1460 = arith.mulf %1458, %1459 : vector<1x256xf32>
    %1461 = arith.addf %1444, %1460 : vector<1x256xf32>
    %c-1_i32_592 = arith.constant -1 : i32
    %1462 = vector.broadcast %c-1_i32_592 : i32 to vector<1x256xi32>
    %1463 = arith.addi %9, %1462 : vector<1x256xi32>
    %c0_i32_593 = arith.constant 0 : i32
    %1464 = vector.broadcast %c0_i32_593 : i32 to vector<1x256xi32>
    %1465 = arith.cmpi sge, %1463, %1464 : vector<1x256xi32>
    %c-1_i32_594 = arith.constant -1 : i32
    %1466 = vector.broadcast %c-1_i32_594 : i32 to vector<1x256xi32>
    %1467 = arith.addi %9, %1466 : vector<1x256xi32>
    %c16_i32_595 = arith.constant 16 : i32
    %1468 = vector.broadcast %c16_i32_595 : i32 to vector<1x256xi32>
    %1469 = arith.cmpi slt, %1467, %1468 : vector<1x256xi32>
    %1470 = arith.andi %1465, %1469 : vector<1x256xi1>
    %1471 = arith.andi %1427, %1470 : vector<1x256xi1>
    %c1_596 = arith.constant 1 : index
    %c66_597 = arith.constant 66 : index
    %1472 = vector.load %arg5[%c1_596, %c66_597] : memref<2x358xf32, #tpu.memory_space<vmem>>, vector<1x256xf32>
    %c79 = arith.constant 79 : index
    %1473 = memref.load %arg1[%c79] : memref<98xf32, #tpu.memory_space<smem>>
    %cst_598 = arith.constant 0.000000e+00 : f32
    %1474 = vector.broadcast %cst_598 : f32 to vector<1x256xf32>
    %1475 = arith.select %1471, %1472, %1474 : vector<1x256xi1>, vector<1x256xf32>
    %1476 = vector.broadcast %1473 : f32 to vector<1x256xf32>
    %1477 = arith.mulf %1475, %1476 : vector<1x256xf32>
    %1478 = arith.addf %1461, %1477 : vector<1x256xf32>
    %c0_i32_599 = arith.constant 0 : i32
    %1479 = vector.broadcast %c0_i32_599 : i32 to vector<1x256xi32>
    %1480 = arith.addi %9, %1479 : vector<1x256xi32>
    %c0_i32_600 = arith.constant 0 : i32
    %1481 = vector.broadcast %c0_i32_600 : i32 to vector<1x256xi32>
    %1482 = arith.cmpi sge, %1480, %1481 : vector<1x256xi32>
    %c0_i32_601 = arith.constant 0 : i32
    %1483 = vector.broadcast %c0_i32_601 : i32 to vector<1x256xi32>
    %1484 = arith.addi %9, %1483 : vector<1x256xi32>
    %c16_i32_602 = arith.constant 16 : i32
    %1485 = vector.broadcast %c16_i32_602 : i32 to vector<1x256xi32>
    %1486 = arith.cmpi slt, %1484, %1485 : vector<1x256xi32>
    %1487 = arith.andi %1482, %1486 : vector<1x256xi1>
    %1488 = arith.andi %1427, %1487 : vector<1x256xi1>
    %c1_603 = arith.constant 1 : index
    %c67_604 = arith.constant 67 : index
    %1489 = vector.load %arg5[%c1_603, %c67_604] : memref<2x358xf32, #tpu.memory_space<vmem>>, vector<1x256xf32>
    %c80_605 = arith.constant 80 : index
    %1490 = memref.load %arg1[%c80_605] : memref<98xf32, #tpu.memory_space<smem>>
    %cst_606 = arith.constant 0.000000e+00 : f32
    %1491 = vector.broadcast %cst_606 : f32 to vector<1x256xf32>
    %1492 = arith.select %1488, %1489, %1491 : vector<1x256xi1>, vector<1x256xf32>
    %1493 = vector.broadcast %1490 : f32 to vector<1x256xf32>
    %1494 = arith.mulf %1492, %1493 : vector<1x256xf32>
    %1495 = arith.addf %1478, %1494 : vector<1x256xf32>
    %c1_i32_607 = arith.constant 1 : i32
    %1496 = vector.broadcast %c1_i32_607 : i32 to vector<1x256xi32>
    %1497 = arith.addi %9, %1496 : vector<1x256xi32>
    %c0_i32_608 = arith.constant 0 : i32
    %1498 = vector.broadcast %c0_i32_608 : i32 to vector<1x256xi32>
    %1499 = arith.cmpi sge, %1497, %1498 : vector<1x256xi32>
    %c1_i32_609 = arith.constant 1 : i32
    %1500 = vector.broadcast %c1_i32_609 : i32 to vector<1x256xi32>
    %1501 = arith.addi %9, %1500 : vector<1x256xi32>
    %c16_i32_610 = arith.constant 16 : i32
    %1502 = vector.broadcast %c16_i32_610 : i32 to vector<1x256xi32>
    %1503 = arith.cmpi slt, %1501, %1502 : vector<1x256xi32>
    %1504 = arith.andi %1499, %1503 : vector<1x256xi1>
    %1505 = arith.andi %1427, %1504 : vector<1x256xi1>
    %c1_611 = arith.constant 1 : index
    %c68_612 = arith.constant 68 : index
    %1506 = vector.load %arg5[%c1_611, %c68_612] : memref<2x358xf32, #tpu.memory_space<vmem>>, vector<1x256xf32>
    %c81_613 = arith.constant 81 : index
    %1507 = memref.load %arg1[%c81_613] : memref<98xf32, #tpu.memory_space<smem>>
    %cst_614 = arith.constant 0.000000e+00 : f32
    %1508 = vector.broadcast %cst_614 : f32 to vector<1x256xf32>
    %1509 = arith.select %1505, %1506, %1508 : vector<1x256xi1>, vector<1x256xf32>
    %1510 = vector.broadcast %1507 : f32 to vector<1x256xf32>
    %1511 = arith.mulf %1509, %1510 : vector<1x256xf32>
    %1512 = arith.addf %1495, %1511 : vector<1x256xf32>
    %c2_i32_615 = arith.constant 2 : i32
    %1513 = vector.broadcast %c2_i32_615 : i32 to vector<1x256xi32>
    %1514 = arith.addi %9, %1513 : vector<1x256xi32>
    %c0_i32_616 = arith.constant 0 : i32
    %1515 = vector.broadcast %c0_i32_616 : i32 to vector<1x256xi32>
    %1516 = arith.cmpi sge, %1514, %1515 : vector<1x256xi32>
    %c2_i32_617 = arith.constant 2 : i32
    %1517 = vector.broadcast %c2_i32_617 : i32 to vector<1x256xi32>
    %1518 = arith.addi %9, %1517 : vector<1x256xi32>
    %c16_i32_618 = arith.constant 16 : i32
    %1519 = vector.broadcast %c16_i32_618 : i32 to vector<1x256xi32>
    %1520 = arith.cmpi slt, %1518, %1519 : vector<1x256xi32>
    %1521 = arith.andi %1516, %1520 : vector<1x256xi1>
    %1522 = arith.andi %1427, %1521 : vector<1x256xi1>
    %c1_619 = arith.constant 1 : index
    %c69_620 = arith.constant 69 : index
    %1523 = vector.load %arg5[%c1_619, %c69_620] : memref<2x358xf32, #tpu.memory_space<vmem>>, vector<1x256xf32>
    %c82_621 = arith.constant 82 : index
    %1524 = memref.load %arg1[%c82_621] : memref<98xf32, #tpu.memory_space<smem>>
    %cst_622 = arith.constant 0.000000e+00 : f32
    %1525 = vector.broadcast %cst_622 : f32 to vector<1x256xf32>
    %1526 = arith.select %1522, %1523, %1525 : vector<1x256xi1>, vector<1x256xf32>
    %1527 = vector.broadcast %1524 : f32 to vector<1x256xf32>
    %1528 = arith.mulf %1526, %1527 : vector<1x256xf32>
    %1529 = arith.addf %1512, %1528 : vector<1x256xf32>
    %c3_i32_623 = arith.constant 3 : i32
    %1530 = vector.broadcast %c3_i32_623 : i32 to vector<1x256xi32>
    %1531 = arith.addi %9, %1530 : vector<1x256xi32>
    %c0_i32_624 = arith.constant 0 : i32
    %1532 = vector.broadcast %c0_i32_624 : i32 to vector<1x256xi32>
    %1533 = arith.cmpi sge, %1531, %1532 : vector<1x256xi32>
    %c3_i32_625 = arith.constant 3 : i32
    %1534 = vector.broadcast %c3_i32_625 : i32 to vector<1x256xi32>
    %1535 = arith.addi %9, %1534 : vector<1x256xi32>
    %c16_i32_626 = arith.constant 16 : i32
    %1536 = vector.broadcast %c16_i32_626 : i32 to vector<1x256xi32>
    %1537 = arith.cmpi slt, %1535, %1536 : vector<1x256xi32>
    %1538 = arith.andi %1533, %1537 : vector<1x256xi1>
    %1539 = arith.andi %1427, %1538 : vector<1x256xi1>
    %c1_627 = arith.constant 1 : index
    %c70_628 = arith.constant 70 : index
    %1540 = vector.load %arg5[%c1_627, %c70_628] : memref<2x358xf32, #tpu.memory_space<vmem>>, vector<1x256xf32>
    %c83_629 = arith.constant 83 : index
    %1541 = memref.load %arg1[%c83_629] : memref<98xf32, #tpu.memory_space<smem>>
    %cst_630 = arith.constant 0.000000e+00 : f32
    %1542 = vector.broadcast %cst_630 : f32 to vector<1x256xf32>
    %1543 = arith.select %1539, %1540, %1542 : vector<1x256xi1>, vector<1x256xf32>
    %1544 = vector.broadcast %1541 : f32 to vector<1x256xf32>
    %1545 = arith.mulf %1543, %1544 : vector<1x256xf32>
    %1546 = arith.addf %1529, %1545 : vector<1x256xf32>
    %c2_i32_631 = arith.constant 2 : i32
    %1547 = vector.broadcast %c2_i32_631 : i32 to vector<1x256xi32>
    %1548 = arith.addi %8, %1547 : vector<1x256xi32>
    %c0_i32_632 = arith.constant 0 : i32
    %1549 = vector.broadcast %c0_i32_632 : i32 to vector<1x256xi32>
    %1550 = arith.cmpi sge, %1548, %1549 : vector<1x256xi32>
    %c2_i32_633 = arith.constant 2 : i32
    %1551 = vector.broadcast %c2_i32_633 : i32 to vector<1x256xi32>
    %1552 = arith.addi %8, %1551 : vector<1x256xi32>
    %c16_i32_634 = arith.constant 16 : i32
    %1553 = vector.broadcast %c16_i32_634 : i32 to vector<1x256xi32>
    %1554 = arith.cmpi slt, %1552, %1553 : vector<1x256xi32>
    %1555 = arith.andi %1550, %1554 : vector<1x256xi1>
    %c-3_i32_635 = arith.constant -3 : i32
    %1556 = vector.broadcast %c-3_i32_635 : i32 to vector<1x256xi32>
    %1557 = arith.addi %9, %1556 : vector<1x256xi32>
    %c0_i32_636 = arith.constant 0 : i32
    %1558 = vector.broadcast %c0_i32_636 : i32 to vector<1x256xi32>
    %1559 = arith.cmpi sge, %1557, %1558 : vector<1x256xi32>
    %c-3_i32_637 = arith.constant -3 : i32
    %1560 = vector.broadcast %c-3_i32_637 : i32 to vector<1x256xi32>
    %1561 = arith.addi %9, %1560 : vector<1x256xi32>
    %c16_i32_638 = arith.constant 16 : i32
    %1562 = vector.broadcast %c16_i32_638 : i32 to vector<1x256xi32>
    %1563 = arith.cmpi slt, %1561, %1562 : vector<1x256xi32>
    %1564 = arith.andi %1559, %1563 : vector<1x256xi1>
    %1565 = arith.andi %1555, %1564 : vector<1x256xi1>
    %c1_639 = arith.constant 1 : index
    %c80_640 = arith.constant 80 : index
    %1566 = vector.load %arg5[%c1_639, %c80_640] : memref<2x358xf32, #tpu.memory_space<vmem>>, vector<1x256xf32>
    %c84_641 = arith.constant 84 : index
    %1567 = memref.load %arg1[%c84_641] : memref<98xf32, #tpu.memory_space<smem>>
    %cst_642 = arith.constant 0.000000e+00 : f32
    %1568 = vector.broadcast %cst_642 : f32 to vector<1x256xf32>
    %1569 = arith.select %1565, %1566, %1568 : vector<1x256xi1>, vector<1x256xf32>
    %1570 = vector.broadcast %1567 : f32 to vector<1x256xf32>
    %1571 = arith.mulf %1569, %1570 : vector<1x256xf32>
    %1572 = arith.addf %1546, %1571 : vector<1x256xf32>
    %c-2_i32_643 = arith.constant -2 : i32
    %1573 = vector.broadcast %c-2_i32_643 : i32 to vector<1x256xi32>
    %1574 = arith.addi %9, %1573 : vector<1x256xi32>
    %c0_i32_644 = arith.constant 0 : i32
    %1575 = vector.broadcast %c0_i32_644 : i32 to vector<1x256xi32>
    %1576 = arith.cmpi sge, %1574, %1575 : vector<1x256xi32>
    %c-2_i32_645 = arith.constant -2 : i32
    %1577 = vector.broadcast %c-2_i32_645 : i32 to vector<1x256xi32>
    %1578 = arith.addi %9, %1577 : vector<1x256xi32>
    %c16_i32_646 = arith.constant 16 : i32
    %1579 = vector.broadcast %c16_i32_646 : i32 to vector<1x256xi32>
    %1580 = arith.cmpi slt, %1578, %1579 : vector<1x256xi32>
    %1581 = arith.andi %1576, %1580 : vector<1x256xi1>
    %1582 = arith.andi %1555, %1581 : vector<1x256xi1>
    %c1_647 = arith.constant 1 : index
    %c81_648 = arith.constant 81 : index
    %1583 = vector.load %arg5[%c1_647, %c81_648] : memref<2x358xf32, #tpu.memory_space<vmem>>, vector<1x256xf32>
    %c85_649 = arith.constant 85 : index
    %1584 = memref.load %arg1[%c85_649] : memref<98xf32, #tpu.memory_space<smem>>
    %cst_650 = arith.constant 0.000000e+00 : f32
    %1585 = vector.broadcast %cst_650 : f32 to vector<1x256xf32>
    %1586 = arith.select %1582, %1583, %1585 : vector<1x256xi1>, vector<1x256xf32>
    %1587 = vector.broadcast %1584 : f32 to vector<1x256xf32>
    %1588 = arith.mulf %1586, %1587 : vector<1x256xf32>
    %1589 = arith.addf %1572, %1588 : vector<1x256xf32>
    %c-1_i32_651 = arith.constant -1 : i32
    %1590 = vector.broadcast %c-1_i32_651 : i32 to vector<1x256xi32>
    %1591 = arith.addi %9, %1590 : vector<1x256xi32>
    %c0_i32_652 = arith.constant 0 : i32
    %1592 = vector.broadcast %c0_i32_652 : i32 to vector<1x256xi32>
    %1593 = arith.cmpi sge, %1591, %1592 : vector<1x256xi32>
    %c-1_i32_653 = arith.constant -1 : i32
    %1594 = vector.broadcast %c-1_i32_653 : i32 to vector<1x256xi32>
    %1595 = arith.addi %9, %1594 : vector<1x256xi32>
    %c16_i32_654 = arith.constant 16 : i32
    %1596 = vector.broadcast %c16_i32_654 : i32 to vector<1x256xi32>
    %1597 = arith.cmpi slt, %1595, %1596 : vector<1x256xi32>
    %1598 = arith.andi %1593, %1597 : vector<1x256xi1>
    %1599 = arith.andi %1555, %1598 : vector<1x256xi1>
    %c1_655 = arith.constant 1 : index
    %c82_656 = arith.constant 82 : index
    %1600 = vector.load %arg5[%c1_655, %c82_656] : memref<2x358xf32, #tpu.memory_space<vmem>>, vector<1x256xf32>
    %c86_657 = arith.constant 86 : index
    %1601 = memref.load %arg1[%c86_657] : memref<98xf32, #tpu.memory_space<smem>>
    %cst_658 = arith.constant 0.000000e+00 : f32
    %1602 = vector.broadcast %cst_658 : f32 to vector<1x256xf32>
    %1603 = arith.select %1599, %1600, %1602 : vector<1x256xi1>, vector<1x256xf32>
    %1604 = vector.broadcast %1601 : f32 to vector<1x256xf32>
    %1605 = arith.mulf %1603, %1604 : vector<1x256xf32>
    %1606 = arith.addf %1589, %1605 : vector<1x256xf32>
    %c0_i32_659 = arith.constant 0 : i32
    %1607 = vector.broadcast %c0_i32_659 : i32 to vector<1x256xi32>
    %1608 = arith.addi %9, %1607 : vector<1x256xi32>
    %c0_i32_660 = arith.constant 0 : i32
    %1609 = vector.broadcast %c0_i32_660 : i32 to vector<1x256xi32>
    %1610 = arith.cmpi sge, %1608, %1609 : vector<1x256xi32>
    %c0_i32_661 = arith.constant 0 : i32
    %1611 = vector.broadcast %c0_i32_661 : i32 to vector<1x256xi32>
    %1612 = arith.addi %9, %1611 : vector<1x256xi32>
    %c16_i32_662 = arith.constant 16 : i32
    %1613 = vector.broadcast %c16_i32_662 : i32 to vector<1x256xi32>
    %1614 = arith.cmpi slt, %1612, %1613 : vector<1x256xi32>
    %1615 = arith.andi %1610, %1614 : vector<1x256xi1>
    %1616 = arith.andi %1555, %1615 : vector<1x256xi1>
    %c1_663 = arith.constant 1 : index
    %c83_664 = arith.constant 83 : index
    %1617 = vector.load %arg5[%c1_663, %c83_664] : memref<2x358xf32, #tpu.memory_space<vmem>>, vector<1x256xf32>
    %c87 = arith.constant 87 : index
    %1618 = memref.load %arg1[%c87] : memref<98xf32, #tpu.memory_space<smem>>
    %cst_665 = arith.constant 0.000000e+00 : f32
    %1619 = vector.broadcast %cst_665 : f32 to vector<1x256xf32>
    %1620 = arith.select %1616, %1617, %1619 : vector<1x256xi1>, vector<1x256xf32>
    %1621 = vector.broadcast %1618 : f32 to vector<1x256xf32>
    %1622 = arith.mulf %1620, %1621 : vector<1x256xf32>
    %1623 = arith.addf %1606, %1622 : vector<1x256xf32>
    %c1_i32_666 = arith.constant 1 : i32
    %1624 = vector.broadcast %c1_i32_666 : i32 to vector<1x256xi32>
    %1625 = arith.addi %9, %1624 : vector<1x256xi32>
    %c0_i32_667 = arith.constant 0 : i32
    %1626 = vector.broadcast %c0_i32_667 : i32 to vector<1x256xi32>
    %1627 = arith.cmpi sge, %1625, %1626 : vector<1x256xi32>
    %c1_i32_668 = arith.constant 1 : i32
    %1628 = vector.broadcast %c1_i32_668 : i32 to vector<1x256xi32>
    %1629 = arith.addi %9, %1628 : vector<1x256xi32>
    %c16_i32_669 = arith.constant 16 : i32
    %1630 = vector.broadcast %c16_i32_669 : i32 to vector<1x256xi32>
    %1631 = arith.cmpi slt, %1629, %1630 : vector<1x256xi32>
    %1632 = arith.andi %1627, %1631 : vector<1x256xi1>
    %1633 = arith.andi %1555, %1632 : vector<1x256xi1>
    %c1_670 = arith.constant 1 : index
    %c84_671 = arith.constant 84 : index
    %1634 = vector.load %arg5[%c1_670, %c84_671] : memref<2x358xf32, #tpu.memory_space<vmem>>, vector<1x256xf32>
    %c88 = arith.constant 88 : index
    %1635 = memref.load %arg1[%c88] : memref<98xf32, #tpu.memory_space<smem>>
    %cst_672 = arith.constant 0.000000e+00 : f32
    %1636 = vector.broadcast %cst_672 : f32 to vector<1x256xf32>
    %1637 = arith.select %1633, %1634, %1636 : vector<1x256xi1>, vector<1x256xf32>
    %1638 = vector.broadcast %1635 : f32 to vector<1x256xf32>
    %1639 = arith.mulf %1637, %1638 : vector<1x256xf32>
    %1640 = arith.addf %1623, %1639 : vector<1x256xf32>
    %c2_i32_673 = arith.constant 2 : i32
    %1641 = vector.broadcast %c2_i32_673 : i32 to vector<1x256xi32>
    %1642 = arith.addi %9, %1641 : vector<1x256xi32>
    %c0_i32_674 = arith.constant 0 : i32
    %1643 = vector.broadcast %c0_i32_674 : i32 to vector<1x256xi32>
    %1644 = arith.cmpi sge, %1642, %1643 : vector<1x256xi32>
    %c2_i32_675 = arith.constant 2 : i32
    %1645 = vector.broadcast %c2_i32_675 : i32 to vector<1x256xi32>
    %1646 = arith.addi %9, %1645 : vector<1x256xi32>
    %c16_i32_676 = arith.constant 16 : i32
    %1647 = vector.broadcast %c16_i32_676 : i32 to vector<1x256xi32>
    %1648 = arith.cmpi slt, %1646, %1647 : vector<1x256xi32>
    %1649 = arith.andi %1644, %1648 : vector<1x256xi1>
    %1650 = arith.andi %1555, %1649 : vector<1x256xi1>
    %c1_677 = arith.constant 1 : index
    %c85_678 = arith.constant 85 : index
    %1651 = vector.load %arg5[%c1_677, %c85_678] : memref<2x358xf32, #tpu.memory_space<vmem>>, vector<1x256xf32>
    %c89 = arith.constant 89 : index
    %1652 = memref.load %arg1[%c89] : memref<98xf32, #tpu.memory_space<smem>>
    %cst_679 = arith.constant 0.000000e+00 : f32
    %1653 = vector.broadcast %cst_679 : f32 to vector<1x256xf32>
    %1654 = arith.select %1650, %1651, %1653 : vector<1x256xi1>, vector<1x256xf32>
    %1655 = vector.broadcast %1652 : f32 to vector<1x256xf32>
    %1656 = arith.mulf %1654, %1655 : vector<1x256xf32>
    %1657 = arith.addf %1640, %1656 : vector<1x256xf32>
    %c3_i32_680 = arith.constant 3 : i32
    %1658 = vector.broadcast %c3_i32_680 : i32 to vector<1x256xi32>
    %1659 = arith.addi %9, %1658 : vector<1x256xi32>
    %c0_i32_681 = arith.constant 0 : i32
    %1660 = vector.broadcast %c0_i32_681 : i32 to vector<1x256xi32>
    %1661 = arith.cmpi sge, %1659, %1660 : vector<1x256xi32>
    %c3_i32_682 = arith.constant 3 : i32
    %1662 = vector.broadcast %c3_i32_682 : i32 to vector<1x256xi32>
    %1663 = arith.addi %9, %1662 : vector<1x256xi32>
    %c16_i32_683 = arith.constant 16 : i32
    %1664 = vector.broadcast %c16_i32_683 : i32 to vector<1x256xi32>
    %1665 = arith.cmpi slt, %1663, %1664 : vector<1x256xi32>
    %1666 = arith.andi %1661, %1665 : vector<1x256xi1>
    %1667 = arith.andi %1555, %1666 : vector<1x256xi1>
    %c1_684 = arith.constant 1 : index
    %c86_685 = arith.constant 86 : index
    %1668 = vector.load %arg5[%c1_684, %c86_685] : memref<2x358xf32, #tpu.memory_space<vmem>>, vector<1x256xf32>
    %c90 = arith.constant 90 : index
    %1669 = memref.load %arg1[%c90] : memref<98xf32, #tpu.memory_space<smem>>
    %cst_686 = arith.constant 0.000000e+00 : f32
    %1670 = vector.broadcast %cst_686 : f32 to vector<1x256xf32>
    %1671 = arith.select %1667, %1668, %1670 : vector<1x256xi1>, vector<1x256xf32>
    %1672 = vector.broadcast %1669 : f32 to vector<1x256xf32>
    %1673 = arith.mulf %1671, %1672 : vector<1x256xf32>
    %1674 = arith.addf %1657, %1673 : vector<1x256xf32>
    %c3_i32_687 = arith.constant 3 : i32
    %1675 = vector.broadcast %c3_i32_687 : i32 to vector<1x256xi32>
    %1676 = arith.addi %8, %1675 : vector<1x256xi32>
    %c0_i32_688 = arith.constant 0 : i32
    %1677 = vector.broadcast %c0_i32_688 : i32 to vector<1x256xi32>
    %1678 = arith.cmpi sge, %1676, %1677 : vector<1x256xi32>
    %c3_i32_689 = arith.constant 3 : i32
    %1679 = vector.broadcast %c3_i32_689 : i32 to vector<1x256xi32>
    %1680 = arith.addi %8, %1679 : vector<1x256xi32>
    %c16_i32_690 = arith.constant 16 : i32
    %1681 = vector.broadcast %c16_i32_690 : i32 to vector<1x256xi32>
    %1682 = arith.cmpi slt, %1680, %1681 : vector<1x256xi32>
    %1683 = arith.andi %1678, %1682 : vector<1x256xi1>
    %c-3_i32_691 = arith.constant -3 : i32
    %1684 = vector.broadcast %c-3_i32_691 : i32 to vector<1x256xi32>
    %1685 = arith.addi %9, %1684 : vector<1x256xi32>
    %c0_i32_692 = arith.constant 0 : i32
    %1686 = vector.broadcast %c0_i32_692 : i32 to vector<1x256xi32>
    %1687 = arith.cmpi sge, %1685, %1686 : vector<1x256xi32>
    %c-3_i32_693 = arith.constant -3 : i32
    %1688 = vector.broadcast %c-3_i32_693 : i32 to vector<1x256xi32>
    %1689 = arith.addi %9, %1688 : vector<1x256xi32>
    %c16_i32_694 = arith.constant 16 : i32
    %1690 = vector.broadcast %c16_i32_694 : i32 to vector<1x256xi32>
    %1691 = arith.cmpi slt, %1689, %1690 : vector<1x256xi32>
    %1692 = arith.andi %1687, %1691 : vector<1x256xi1>
    %1693 = arith.andi %1683, %1692 : vector<1x256xi1>
    %c1_695 = arith.constant 1 : index
    %c96_696 = arith.constant 96 : index
    %1694 = vector.load %arg5[%c1_695, %c96_696] : memref<2x358xf32, #tpu.memory_space<vmem>>, vector<1x256xf32>
    %c91 = arith.constant 91 : index
    %1695 = memref.load %arg1[%c91] : memref<98xf32, #tpu.memory_space<smem>>
    %cst_697 = arith.constant 0.000000e+00 : f32
    %1696 = vector.broadcast %cst_697 : f32 to vector<1x256xf32>
    %1697 = arith.select %1693, %1694, %1696 : vector<1x256xi1>, vector<1x256xf32>
    %1698 = vector.broadcast %1695 : f32 to vector<1x256xf32>
    %1699 = arith.mulf %1697, %1698 : vector<1x256xf32>
    %1700 = arith.addf %1674, %1699 : vector<1x256xf32>
    %c-2_i32_698 = arith.constant -2 : i32
    %1701 = vector.broadcast %c-2_i32_698 : i32 to vector<1x256xi32>
    %1702 = arith.addi %9, %1701 : vector<1x256xi32>
    %c0_i32_699 = arith.constant 0 : i32
    %1703 = vector.broadcast %c0_i32_699 : i32 to vector<1x256xi32>
    %1704 = arith.cmpi sge, %1702, %1703 : vector<1x256xi32>
    %c-2_i32_700 = arith.constant -2 : i32
    %1705 = vector.broadcast %c-2_i32_700 : i32 to vector<1x256xi32>
    %1706 = arith.addi %9, %1705 : vector<1x256xi32>
    %c16_i32_701 = arith.constant 16 : i32
    %1707 = vector.broadcast %c16_i32_701 : i32 to vector<1x256xi32>
    %1708 = arith.cmpi slt, %1706, %1707 : vector<1x256xi32>
    %1709 = arith.andi %1704, %1708 : vector<1x256xi1>
    %1710 = arith.andi %1683, %1709 : vector<1x256xi1>
    %c1_702 = arith.constant 1 : index
    %c97_703 = arith.constant 97 : index
    %1711 = vector.load %arg5[%c1_702, %c97_703] : memref<2x358xf32, #tpu.memory_space<vmem>>, vector<1x256xf32>
    %c92 = arith.constant 92 : index
    %1712 = memref.load %arg1[%c92] : memref<98xf32, #tpu.memory_space<smem>>
    %cst_704 = arith.constant 0.000000e+00 : f32
    %1713 = vector.broadcast %cst_704 : f32 to vector<1x256xf32>
    %1714 = arith.select %1710, %1711, %1713 : vector<1x256xi1>, vector<1x256xf32>
    %1715 = vector.broadcast %1712 : f32 to vector<1x256xf32>
    %1716 = arith.mulf %1714, %1715 : vector<1x256xf32>
    %1717 = arith.addf %1700, %1716 : vector<1x256xf32>
    %c-1_i32_705 = arith.constant -1 : i32
    %1718 = vector.broadcast %c-1_i32_705 : i32 to vector<1x256xi32>
    %1719 = arith.addi %9, %1718 : vector<1x256xi32>
    %c0_i32_706 = arith.constant 0 : i32
    %1720 = vector.broadcast %c0_i32_706 : i32 to vector<1x256xi32>
    %1721 = arith.cmpi sge, %1719, %1720 : vector<1x256xi32>
    %c-1_i32_707 = arith.constant -1 : i32
    %1722 = vector.broadcast %c-1_i32_707 : i32 to vector<1x256xi32>
    %1723 = arith.addi %9, %1722 : vector<1x256xi32>
    %c16_i32_708 = arith.constant 16 : i32
    %1724 = vector.broadcast %c16_i32_708 : i32 to vector<1x256xi32>
    %1725 = arith.cmpi slt, %1723, %1724 : vector<1x256xi32>
    %1726 = arith.andi %1721, %1725 : vector<1x256xi1>
    %1727 = arith.andi %1683, %1726 : vector<1x256xi1>
    %c1_709 = arith.constant 1 : index
    %c98_710 = arith.constant 98 : index
    %1728 = vector.load %arg5[%c1_709, %c98_710] : memref<2x358xf32, #tpu.memory_space<vmem>>, vector<1x256xf32>
    %c93 = arith.constant 93 : index
    %1729 = memref.load %arg1[%c93] : memref<98xf32, #tpu.memory_space<smem>>
    %cst_711 = arith.constant 0.000000e+00 : f32
    %1730 = vector.broadcast %cst_711 : f32 to vector<1x256xf32>
    %1731 = arith.select %1727, %1728, %1730 : vector<1x256xi1>, vector<1x256xf32>
    %1732 = vector.broadcast %1729 : f32 to vector<1x256xf32>
    %1733 = arith.mulf %1731, %1732 : vector<1x256xf32>
    %1734 = arith.addf %1717, %1733 : vector<1x256xf32>
    %c0_i32_712 = arith.constant 0 : i32
    %1735 = vector.broadcast %c0_i32_712 : i32 to vector<1x256xi32>
    %1736 = arith.addi %9, %1735 : vector<1x256xi32>
    %c0_i32_713 = arith.constant 0 : i32
    %1737 = vector.broadcast %c0_i32_713 : i32 to vector<1x256xi32>
    %1738 = arith.cmpi sge, %1736, %1737 : vector<1x256xi32>
    %c0_i32_714 = arith.constant 0 : i32
    %1739 = vector.broadcast %c0_i32_714 : i32 to vector<1x256xi32>
    %1740 = arith.addi %9, %1739 : vector<1x256xi32>
    %c16_i32_715 = arith.constant 16 : i32
    %1741 = vector.broadcast %c16_i32_715 : i32 to vector<1x256xi32>
    %1742 = arith.cmpi slt, %1740, %1741 : vector<1x256xi32>
    %1743 = arith.andi %1738, %1742 : vector<1x256xi1>
    %1744 = arith.andi %1683, %1743 : vector<1x256xi1>
    %c1_716 = arith.constant 1 : index
    %c99_717 = arith.constant 99 : index
    %1745 = vector.load %arg5[%c1_716, %c99_717] : memref<2x358xf32, #tpu.memory_space<vmem>>, vector<1x256xf32>
    %c94 = arith.constant 94 : index
    %1746 = memref.load %arg1[%c94] : memref<98xf32, #tpu.memory_space<smem>>
    %cst_718 = arith.constant 0.000000e+00 : f32
    %1747 = vector.broadcast %cst_718 : f32 to vector<1x256xf32>
    %1748 = arith.select %1744, %1745, %1747 : vector<1x256xi1>, vector<1x256xf32>
    %1749 = vector.broadcast %1746 : f32 to vector<1x256xf32>
    %1750 = arith.mulf %1748, %1749 : vector<1x256xf32>
    %1751 = arith.addf %1734, %1750 : vector<1x256xf32>
    %c1_i32_719 = arith.constant 1 : i32
    %1752 = vector.broadcast %c1_i32_719 : i32 to vector<1x256xi32>
    %1753 = arith.addi %9, %1752 : vector<1x256xi32>
    %c0_i32_720 = arith.constant 0 : i32
    %1754 = vector.broadcast %c0_i32_720 : i32 to vector<1x256xi32>
    %1755 = arith.cmpi sge, %1753, %1754 : vector<1x256xi32>
    %c1_i32_721 = arith.constant 1 : i32
    %1756 = vector.broadcast %c1_i32_721 : i32 to vector<1x256xi32>
    %1757 = arith.addi %9, %1756 : vector<1x256xi32>
    %c16_i32_722 = arith.constant 16 : i32
    %1758 = vector.broadcast %c16_i32_722 : i32 to vector<1x256xi32>
    %1759 = arith.cmpi slt, %1757, %1758 : vector<1x256xi32>
    %1760 = arith.andi %1755, %1759 : vector<1x256xi1>
    %1761 = arith.andi %1683, %1760 : vector<1x256xi1>
    %c1_723 = arith.constant 1 : index
    %c100_724 = arith.constant 100 : index
    %1762 = vector.load %arg5[%c1_723, %c100_724] : memref<2x358xf32, #tpu.memory_space<vmem>>, vector<1x256xf32>
    %c95 = arith.constant 95 : index
    %1763 = memref.load %arg1[%c95] : memref<98xf32, #tpu.memory_space<smem>>
    %cst_725 = arith.constant 0.000000e+00 : f32
    %1764 = vector.broadcast %cst_725 : f32 to vector<1x256xf32>
    %1765 = arith.select %1761, %1762, %1764 : vector<1x256xi1>, vector<1x256xf32>
    %1766 = vector.broadcast %1763 : f32 to vector<1x256xf32>
    %1767 = arith.mulf %1765, %1766 : vector<1x256xf32>
    %1768 = arith.addf %1751, %1767 : vector<1x256xf32>
    %c2_i32_726 = arith.constant 2 : i32
    %1769 = vector.broadcast %c2_i32_726 : i32 to vector<1x256xi32>
    %1770 = arith.addi %9, %1769 : vector<1x256xi32>
    %c0_i32_727 = arith.constant 0 : i32
    %1771 = vector.broadcast %c0_i32_727 : i32 to vector<1x256xi32>
    %1772 = arith.cmpi sge, %1770, %1771 : vector<1x256xi32>
    %c2_i32_728 = arith.constant 2 : i32
    %1773 = vector.broadcast %c2_i32_728 : i32 to vector<1x256xi32>
    %1774 = arith.addi %9, %1773 : vector<1x256xi32>
    %c16_i32_729 = arith.constant 16 : i32
    %1775 = vector.broadcast %c16_i32_729 : i32 to vector<1x256xi32>
    %1776 = arith.cmpi slt, %1774, %1775 : vector<1x256xi32>
    %1777 = arith.andi %1772, %1776 : vector<1x256xi1>
    %1778 = arith.andi %1683, %1777 : vector<1x256xi1>
    %c1_730 = arith.constant 1 : index
    %c101_731 = arith.constant 101 : index
    %1779 = vector.load %arg5[%c1_730, %c101_731] : memref<2x358xf32, #tpu.memory_space<vmem>>, vector<1x256xf32>
    %c96_732 = arith.constant 96 : index
    %1780 = memref.load %arg1[%c96_732] : memref<98xf32, #tpu.memory_space<smem>>
    %cst_733 = arith.constant 0.000000e+00 : f32
    %1781 = vector.broadcast %cst_733 : f32 to vector<1x256xf32>
    %1782 = arith.select %1778, %1779, %1781 : vector<1x256xi1>, vector<1x256xf32>
    %1783 = vector.broadcast %1780 : f32 to vector<1x256xf32>
    %1784 = arith.mulf %1782, %1783 : vector<1x256xf32>
    %1785 = arith.addf %1768, %1784 : vector<1x256xf32>
    %c3_i32_734 = arith.constant 3 : i32
    %1786 = vector.broadcast %c3_i32_734 : i32 to vector<1x256xi32>
    %1787 = arith.addi %9, %1786 : vector<1x256xi32>
    %c0_i32_735 = arith.constant 0 : i32
    %1788 = vector.broadcast %c0_i32_735 : i32 to vector<1x256xi32>
    %1789 = arith.cmpi sge, %1787, %1788 : vector<1x256xi32>
    %c3_i32_736 = arith.constant 3 : i32
    %1790 = vector.broadcast %c3_i32_736 : i32 to vector<1x256xi32>
    %1791 = arith.addi %9, %1790 : vector<1x256xi32>
    %c16_i32_737 = arith.constant 16 : i32
    %1792 = vector.broadcast %c16_i32_737 : i32 to vector<1x256xi32>
    %1793 = arith.cmpi slt, %1791, %1792 : vector<1x256xi32>
    %1794 = arith.andi %1789, %1793 : vector<1x256xi1>
    %1795 = arith.andi %1683, %1794 : vector<1x256xi1>
    %c1_738 = arith.constant 1 : index
    %c102_739 = arith.constant 102 : index
    %1796 = vector.load %arg5[%c1_738, %c102_739] : memref<2x358xf32, #tpu.memory_space<vmem>>, vector<1x256xf32>
    %c97_740 = arith.constant 97 : index
    %1797 = memref.load %arg1[%c97_740] : memref<98xf32, #tpu.memory_space<smem>>
    %cst_741 = arith.constant 0.000000e+00 : f32
    %1798 = vector.broadcast %cst_741 : f32 to vector<1x256xf32>
    %1799 = arith.select %1795, %1796, %1798 : vector<1x256xi1>, vector<1x256xf32>
    %1800 = vector.broadcast %1797 : f32 to vector<1x256xf32>
    %1801 = arith.mulf %1799, %1800 : vector<1x256xf32>
    %1802 = arith.addf %1785, %1801 : vector<1x256xf32>
    %1803 = arith.negf %1802 : vector<1x256xf32>
    %1804 = math.exp %1803 : vector<1x256xf32>
    %cst_742 = arith.constant 1.000000e+00 : f32
    %1805 = vector.broadcast %cst_742 : f32 to vector<1x256xf32>
    %1806 = arith.addf %1805, %1804 : vector<1x256xf32>
    %1807 = arith.divf %1805, %1806 : vector<1x256xf32>
    %1808 = vector.broadcast %1807 : vector<1x256xf32> to vector<4x256xf32>
    %1809 = arith.mulf %1, %1808 : vector<4x256xf32>
    %c0_743 = arith.constant 0 : index
    %c0_744 = arith.constant 0 : index
    %c0_745 = arith.constant 0 : index
    %1810 = vector.load %arg4[%c0_743, %c0_744, %c0_745] : memref<1x4x256xf32, #tpu.memory_space<vmem>>, vector<1x4x256xf32>
    %1811 = vector.shape_cast %1810 : vector<1x4x256xf32> to vector<4x256xf32>
    %1812 = vector.shape_cast %1809 : vector<4x256xf32> to vector<1x4x256xf32>
    tpu.vector_store %arg4[%c0_743, %c0_744, %c0_745], %1812 {strides = array<i32>} : memref<1x4x256xf32, #tpu.memory_space<vmem>>, vector<1x4x256xf32>,
    return
  }
  func.func @transform_0(%arg0: i32) -> i32 {
    %c0_i32 = arith.constant 0 : i32
    %c0_i32_0 = arith.constant 0 : i32
    return %c0_i32 : i32
  }
  func.func @transform_1(%arg0: i32) -> (i32, i32) {
    %c0_i32 = arith.constant 0 : i32
    %c0_i32_0 = arith.constant 0 : i32
    %c0_i32_1 = arith.constant 0 : i32
    return %c0_i32, %c0_i32_0 : i32, i32
  }
  func.func @transform_2(%arg0: i32) -> (i32, i32, i32) {
    %c0_i32 = arith.constant 0 : i32
    %c0_i32_0 = arith.constant 0 : i32
    %c0_i32_1 = arith.constant 0 : i32
    return %arg0, %c0_i32, %c0_i32_0 : i32, i32, i32
  }
  func.func @transform_3(%arg0: i32) -> (i32, i32, i32) {
    %c0_i32 = arith.constant 0 : i32
    %c0_i32_0 = arith.constant 0 : i32
    %c0_i32_1 = arith.constant 0 : i32
    return %arg0, %c0_i32, %c0_i32_0 : i32, i32, i32
  }
}

</mosaic_0001>

<bundles_post_ra>
// kernel: spatial_attention.1
= control target key start
LH: loop header
LB: loop body
LE: loop exit
PB: predicated region body
PF: predicated region fallthrough
CT: control target
= control target key end

     0   :  { %8 = vsyncpa [#allocation4], 0  ;;  %s1773_s12 = smov 0   ;;  %s3181_s0 = inlined_call_operand.vmem [shape: f32[98], index: 0, kind: input, shape index: {}]   ;;  %s3182_s1 = inlined_call_operand.vmem [shape: s32[2,256], index: 1, kind: input, shape index: {}]   ;;  %s3183_s2 = inlined_call_operand.vmem [shape: f32[2,4,256], index: 2, kind: input, shape index: {}]   ;;  %s3184_s3 = inlined_call_operand.vmem [shape: f32[2,4,256], index: 3, kind: output, shape index: {}]  }
   0x1 LB: > { %s1486_s13 = sadd.s32 4294967295, %s1700_s12   ;;  %p1488_p0 = scmp.ge.s32.totalorder %s1700_s12, 1  ;;  %s1700_s12 = sphi %s1773_s12, %s14_s12  }
   0x2   : > { %p113_p1 = scmp.lt.s32.totalorder %s1700_s12, 3  ;;  %s126_s16 = sshll.u32 %s3181_s0, 4  ;;  %s127_s16 = int_to_ptr.vmem [resolvable:$true] %s126_s16 }
   0x3   : > { %p1608_p3 = scmp.eq.s32.totalorder %s1486_s13, 0  ;;  %s1675_s18 = scalar_lea.vmem %s127_s16, 16 }
   0x4   : > { %p1784_p2 = pnand %p1488_p0, %p113_p1  ;;  %p1676_p6 = scmp.ne.s32.totalorder %s127_s16, %s1675_s18 }
   0x5   : > { %p1683_p10 = scmp.lt.s32.totalorder %s127_s16, %s127_s16  ;;  %p1684_p11 = scmp.lt.s32.totalorder %s1675_s18, %s1675_s18 }
   0x6   : > { %p1604_p4 = pneg %p1784_p2 }
   0x7   : > { %p1685_p12 = por %p1684_p11, %p1683_p10 }
   0x8   : > { %p1605_p5 = pnand %p1608_p3, %p1604_p4 }
   0xa   : > { %p1677_p7 = pneg %p1605_p5 }
   0xc   : > { %p1678_p8 = pnand %p1677_p7, %p1676_p6 }
   0xe   : > { %p1679_p9 = pneg %p1678_p8 }
  0x10   : > { %p1686_p13 = pnand %p1685_p12, %p1679_p9 }
  0x12   : > { %1689 = shalt.err (!%p1686_p13)
}
  0x13   : > { %s1702_s19 = smov [#allocation3]   ;;  %150 = sbr.rel (%p1784_p2) target bundleno = 591 (0x24f), region = 32 }
  0x14   : > { %1607 = dma.vmem_to_smem (!%p1605_p5), %s127_s16, 16, %s1702_s19, [#allocation4]  }
  0x18   : > { %1695 = dma.done.wait (%p1608_p3), [#allocation4], 16  }
  0x19   : > { %1697 = vsyncadd (%p1608_p3), [#allocation4], 4294967280 }
  0x1a   : > { %156 = sfence }
  0x1b   : > { %p175_p0 = scmp.lt.s32.totalorder %s1486_s13, 1  ;;  %vm189_vm0 = vcmask 1043456   ;;  %v1703_v9 = vmov 1966171168   ;;  %v210_v11 = vlaneseq  ;;  %s1704_s24 = smov 51   ;;  %v3316_v43 = vmov 0 }
  0x1c   : > { %v208_v10 = vunpack.c.l.s4 %v1703_v9  ;;  %vm3216_vm3 = vcmask 416768   ;;  %s1705_s25 = smov 126   ;;  %s1706_s26 = smov 127   ;;  %v1934_v48 = vld [vmem:[%s3182_s1] ss:$2 sm:$0x3] }
  0x1d   : > { %s3494_s13 = smov (!%p175_p0, %s1486_s13), 1  ;;  %v1808_v17 = vshrl.u32 %v210_v11, 7  ;;  %vm1814_vm1 = vcmp.ge.s32.totalorder %v210_v11, 51  ;;  %vm1818_vm2 = vcmp.lt.s32.totalorder %v210_v11, 307  ;;  %s1707_s27 = smov 125   ;;  %v273_v50 = vadd.s32 4294967293, %v1934_v48 }
  0x1e   : > { %s3185_s20 = sshll.u32 %s3494_s13, 3  ;;  %v209_v16 = vunpack.c.0.s8 %v208_v10  ;;  %v3317_v43 = vsel %vm1818_vm2, 4294967295, %v3316_v43  ;;  %vm3215_vm4 = vmand %vm1814_vm1, %vm1818_vm2  ;;  %s1708_s28 = smov 124   ;;  %v1497_v49 = vld [vmem:[%s3182_s1 + $0x1] ss:$2 sm:$0x3] }
  0x1f   : > { %s1803_s23 = scalar_lea.vmem %s3183_s2, %s3185_s20  ;;  %s1709_s29 = smov 123   ;;  %v277_v51 = vadd.s32 4294967293, %v1497_v49  ;;  %v306_v52 = vadd.s32 4294967295, %v1497_v49  ;;  %v288_v53 = vadd.s32 4294967294, %v1497_v49  ;;  %vm274_vm5 = vcmp.ge.s32.totalorder %v273_v50, 0 }
  0x20   : > { %v185_v0 = vld [vmem:[%s1803_s23] sm:$0xff]  ;;  %v212_v21 = vsub.s32 %v209_v16, %v1808_v17  ;;  %s1710_s30 = smov 122   ;;  %s1711_s4 = smov 112   ;;  %vm275_vm6 = vcmp.lt.s32.totalorder %v273_v50, 16  ;;  %v3318_v54 = vmov 0  ;;  %v337_v56 = vadd.s32 1, %v1497_v49 }
  0x21   : > { %v187_v1 = vcombine.high %v185_v0, %v185_v0  ;;  %v190_v2 = vsel %vm189_vm0, %v185_v0, 0.0  ;;  %v232_v25 = vsel %vm189_vm0, %v185_v0, -inf  ;;  %s1712_s5 = smov 111   ;;  %s1713_s6 = smov 110   ;;  %vm278_vm7 = vcmp.ge.s32.totalorder %v277_v51, 0  ;;  %vm1944_vm11 = vmand %vm274_vm5, %vm275_vm6 }
  0x22   : > { %v191_v3 = vrot.slane %v190_v2, 4  ;;  %v233_v27 = vrot.slane %v232_v25, 4  ;;  %s1714_s7 = smov 109   ;;  %s1715_s8 = smov 108   ;;  %vm279_vm8 = vcmp.lt.s32.totalorder %v277_v51, 16  ;;  %vm307_vm9 = vcmp.ge.s32.totalorder %v306_v52, 0 }
  0x23   : > { %v197_v4 = vsel %vm189_vm0, %v187_v1, 0.0  ;;  %v239_v26 = vsel %vm189_vm0, %v187_v1, -inf  ;;  %s1716_s9 = smov 107   ;;  %s1717_s10 = smov 106   ;;  %vm308_vm10 = vcmp.lt.s32.totalorder %v306_v52, 16  ;;  %v3319_v54 = vsel %vm1944_vm11, 4294967295, %v3318_v54  ;;  %vm1950_vm14 = vmand %vm278_vm7, %vm279_vm8 }
  0x24   : > { %v192_v5 = vadd.f32 %v191_v3, %v190_v2  ;;  %v198_v6 = vrot.slane %v197_v4, 4  ;;  %v240_v28 = vrot.slane %v239_v26, 4  ;;  %v234_v29 = vmax.f32 %v232_v25, %v233_v27  ;;  %s1718_s11 = smov 96   ;;  %s1719_s14 = smov 95   ;;  %vm1954_vm15 = vmand %vm307_vm9, %vm308_vm10 }
  0x25   : > { %s1720_s15 = smov 94   ;;  %s3211_s16 = smov 93   ;;  %vm289_vm12 = vcmp.ge.s32.totalorder %v288_v53, 0  ;;  %vm290_vm13 = vcmp.lt.s32.totalorder %v288_v53, 16  ;;  %vm3217_vm5 = vmand %vm1944_vm11, %vm1950_vm14  ;;  %vm322_vm6 = vcmp.ge.s32.totalorder %v1497_v49, 0  ;;  %vm338_vm8 = vcmp.ge.s32.totalorder %v337_v56, 0 }
  0x26   : > { %v193_v7 = vrot.slane %v192_v5, 2  ;;  %v199_v8 = vadd.f32 %v198_v6, %v197_v4  ;;  %v241_v30 = vmax.f32 %v239_v26, %v240_v28  ;;  %v235_v31 = vrot.slane %v234_v29, 2  ;;  %s3213_s17 = smov 92   ;;  %s3186_s18 = smov 91   ;;  %vm1958_vm0 = vmand %vm289_vm12, %vm290_vm13 }
  0x27   : > { %s3187_s19 = smov 90   ;;  %s3188_s21 = smov 80   ;;  %vm339_vm9 = vcmp.lt.s32.totalorder %v337_v56, 16  ;;  %v353_v59 = vadd.s32 2, %v1497_v49  ;;  %v369_v61 = vadd.s32 3, %v1497_v49  ;;  %vm3219_vm12 = vcmask 1031168  }
  0x28   : > { %v194_v12 = vadd.f32 %v193_v7, %v192_v5  ;;  %v200_v13 = vrot.slane %v199_v8, 2  ;;  %v242_v32 = vrot.slane %v241_v30, 2  ;;  %v236_v33 = vmax.f32 %v234_v29, %v235_v31  ;;  %s3189_s22 = smov 79   ;;  %s3191_s20 = smov 77   ;;  %vm1988_vm10 = vmand %vm338_vm8, %vm339_vm9 }
  0x29   : > { %vm3218_vm13 = vcmask 1039360   ;;  %v3326_v1 = vmov 0  ;;  %vm371_vm7 = vcmp.lt.s32.totalorder %v369_v61, 16  ;;  %vm3337_vm2 = vcmask 1022976  }
  0x2a   : > { %v195_v14 = vrot.slane %v194_v12, 1  ;;  %v201_v15 = vadd.f32 %v200_v13, %v199_v8  ;;  %v243_v34 = vmax.f32 %v241_v30, %v242_v32  ;;  %v237_v35 = vrot.slane %v236_v33, 1 }
  0x2b   : > { %v385_v8 = vadd.s32 4294967294, %v1934_v48 }
  0x2c   : > { %v196_v18 = vadd.f32 %v195_v14, %v194_v12  ;;  %v202_v19 = vrot.slane %v201_v15, 1  ;;  %v244_v36 = vrot.slane %v243_v34, 1  ;;  %v238_v37 = vmax.f32 %v236_v33, %v237_v35 }
  0x2d   : > { %vm386_vm8 = vcmp.ge.s32.totalorder %v385_v8, 0  ;;  %vm387_vm9 = vcmp.lt.s32.totalorder %v385_v8, 16 }
  0x2e   : > { %v203_v20 = vadd.f32 %v202_v19, %v201_v15  ;;  %v245_v38 = vmax.f32 %v243_v34, %v244_v36 }
  0x30   : > { %v206_v22 = vcombine.low %v196_v18, %v203_v20  ;;  %v248_v39 = vcombine.low %v238_v37, %v245_v38  ;;  %v3341_v37 = vmov 0 }
  0x32   : > { %v213_v23 = vrot.slane %v206_v22, %v212_v21  ;;  %v255_v40 = vrot.slane %v248_v39, %v212_v21 }
  0x34   : > { %v220_v24 = vrot.slane %v213_v23, %v212_v21  ;;  %v262_v41 = vrot.slane %v255_v40, %v212_v21 }
  0x36   : > { %221 = vrot.lane.b32.xlu0 %v220_v24, %s1704_s24 }
  0xa8   : > { %v222_v44 = vpop.permute.xlu0 %221 }
  0xa9   : > { %v223_v45 = vrot.slane %v222_v44, 7 }
  0xab   : > { %v225_v46 = vsel %vm3216_vm3, %v223_v45, %v222_v44 }
  0xac   : > { %231 = vst.msk [vmem:[#allocation2] ss:$2 sm:$0x7] %vm3215_vm4, %v225_v46  ;;  %vm323_vm4 = vcmp.lt.s32.totalorder %v1497_v49, 16 }
  0xad   : > { %vm1978_vm3 = vmand %vm322_vm6, %vm323_vm4  ;;  %vm354_vm4 = vcmp.ge.s32.totalorder %v353_v59, 0  ;;  %vm355_vm6 = vcmp.lt.s32.totalorder %v353_v59, 16 }
  0xae   : > { %v3327_v1 = vsel %vm1978_vm3, 4294967295, %v3326_v1 }
  0xb3   : > { %v1832_v47 = vld [vmem:[#allocation2] ss:$2 sm:$0x7] }
  0xb4   : > { %312 = vrot.lane.b32.xlu1 %v1832_v47, %s1705_s25  ;;  %296 = vrot.lane.b32.xlu0 %v1832_v47, %s1706_s26  ;;  %v282_v60 = vld [vmem:[#allocation2] ss:$2 sm:$0x3] }
  0xb5   : > { %v284_v7 = vsel %vm3217_vm5, %v282_v60, 0.0  ;;  %vm3330_vm5 = vmand %vm1944_vm11, %vm1954_vm15 }
  0xb8   : > { %327 = vrot.lane.b32.xlu1 %v1832_v47, %s1707_s27  ;;  %343 = vrot.lane.b32.xlu0 %v1832_v47, %s1708_s28 }
  0xbc   : > { %359 = vrot.lane.b32.xlu1 %v1832_v47, %s1709_s29  ;;  %375 = vrot.lane.b32.xlu0 %v1832_v47, %s1710_s30 }
  0xc0   : > { %391 = vrot.lane.b32.xlu1 %v1832_v47, %s1711_s4  ;;  %403 = vrot.lane.b32.xlu0 %v1832_v47, %s1712_s5 }
  0xc4   : > { %415 = vrot.lane.b32.xlu1 %v1832_v47, %s1713_s6  ;;  %427 = vrot.lane.b32.xlu0 %v1832_v47, %s1714_s7 }
  0xc8   : > { %439 = vrot.lane.b32.xlu1 %v1832_v47, %s1715_s8  ;;  %451 = vrot.lane.b32.xlu0 %v1832_v47, %s1716_s9 }
  0xcc   : > { %463 = vrot.lane.b32.xlu1 %v1832_v47, %s1717_s10  ;;  %479 = vrot.lane.b32.xlu0 %v1832_v47, %s1718_s11 }
  0xd0   : > { %491 = vrot.lane.b32.xlu1 %v1832_v47, %s1719_s14  ;;  %263 = vrot.lane.b32.xlu0 %v262_v41, %s1704_s24  ;;  %s3190_s24 = smov 78  }
  0xd4   : > { %503 = vrot.lane.b32.xlu1 %v1832_v47, %s1720_s15  ;;  %515 = vrot.lane.b32.xlu0 %v1832_v47, %s3211_s16  ;;  %s1942_s16 = sld [smem:[#allocation3 + $0x2]] }
  0xd8   : > { %527 = vrot.lane.b32.xlu1 %v1832_v47, %s3213_s17  ;;  %539 = vrot.lane.b32.xlu0 %v1832_v47, %s3186_s18  ;;  %s3192_s18 = smov 76   ;;  %s1948_s17 = sld [smem:[#allocation3 + $0x1]] }
  0xda   : > { %v319_v2 = vstv %s1942_s16  ;;  %s2006_s16 = sld [smem:[#allocation3 + $0x6]] }
  0xdc   : > { %551 = vrot.lane.b32.xlu1 %v1832_v47, %s3187_s19  ;;  %566 = vrot.lane.b32.xlu0 %v1832_v47, %s3188_s21  ;;  %s3193_s19 = smov 75   ;;  %s3194_s21 = smov 74  }
  0xde   : > { %v303_v4 = vstv %s1948_s17  ;;  %s2028_s17 = sld [smem:[#allocation3 + $0x7]] }
  0xe0   : > { %578 = vrot.lane.b32.xlu1 %v1832_v47, %s3189_s22  ;;  %590 = vrot.lane.b32.xlu0 %v1832_v47, %s3190_s24  ;;  %s3195_s22 = smov 64   ;;  %s3196_s24 = smov 63   ;;  %v382_v41 = vstv %s2006_s16 }
  0xe1   : > { %s2097_s16 = sld [smem:[#allocation3 + $0xc]] }
  0xe4   : > { %602 = vrot.lane.b32.xlu1 %v1832_v47, %s3191_s20  ;;  %614 = vrot.lane.b32.xlu0 %v1832_v47, %s3192_s18  ;;  %s3197_s20 = smov 62   ;;  %s3198_s18 = smov 61   ;;  %v398_v53 = vstv %s2028_s17 }
  0xe5   : > { %s2130_s17 = sld [smem:[#allocation3 + $0xe]] }
  0xe8   : > { %626 = vrot.lane.b32.xlu1 %v1832_v47, %s3193_s19  ;;  %638 = vrot.lane.b32.xlu0 %v1832_v47, %s3194_s21  ;;  %s3199_s19 = smov 60   ;;  %s3200_s21 = smov 59  }
  0xec   : > { %654 = vrot.lane.b32.xlu1 %v1832_v47, %s3195_s22  ;;  %666 = vrot.lane.b32.xlu0 %v1832_v47, %s3196_s24  ;;  %s3201_s22 = smov 58   ;;  %s3202_s24 = smov 48  }
  0xf0   : > { %678 = vrot.lane.b32.xlu1 %v1832_v47, %s3197_s20  ;;  %690 = vrot.lane.b32.xlu0 %v1832_v47, %s3198_s18  ;;  %s3203_s20 = smov 47   ;;  %s3204_s18 = smov 46  }
  0xf4   : > { %702 = vrot.lane.b32.xlu1 %v1832_v47, %s3199_s19  ;;  %714 = vrot.lane.b32.xlu0 %v1832_v47, %s3200_s21  ;;  %s3205_s19 = smov 45   ;;  %s3206_s21 = smov 44  }
  0xf8   : > { %726 = vrot.lane.b32.xlu1 %v1832_v47, %s3201_s22  ;;  %742 = vrot.lane.b32.xlu0 %v1832_v47, %s3202_s24  ;;  %s3207_s22 = smov 43   ;;  %s3208_s24 = smov 42  }
  0xfc   : > { %754 = vrot.lane.b32.xlu1 %v1832_v47, %s3203_s20  ;;  %766 = vrot.lane.b32.xlu0 %v1832_v47, %s3204_s18  ;;  %s3209_s20 = smov 32   ;;  %s3210_s18 = smov 31  }
 0x100   : > { %778 = vrot.lane.b32.xlu1 %v1832_v47, %s3205_s19  ;;  %790 = vrot.lane.b32.xlu0 %v1832_v47, %s3206_s21  ;;  %s3212_s19 = smov 30   ;;  %s1749_s21 = smov 29  }
 0x104   : > { %802 = vrot.lane.b32.xlu1 %v1832_v47, %s3207_s22  ;;  %814 = vrot.lane.b32.xlu0 %v1832_v47, %s3208_s24  ;;  %s1750_s22 = smov 28   ;;  %s3214_s24 = smov 27  }
 0x108   : > { %830 = vrot.lane.b32.xlu1 %v1832_v47, %s3209_s20  ;;  %842 = vrot.lane.b32.xlu0 %v1832_v47, %s3210_s18  ;;  %s3220_s20 = smov 26   ;;  %s1970_s18 = sld [smem:[#allocation3 + $0x3]] }
 0x10c   : > { %854 = vrot.lane.b32.xlu1 %v1832_v47, %s3212_s19  ;;  %866 = vrot.lane.b32.xlu0 %v1832_v47, %s1749_s21  ;;  %s1982_s19 = sld [smem:[#allocation3 + $0x4]] }
 0x10e   : > { %v334_v21 = vstv %s1970_s18  ;;  %s2060_s18 = sld [smem:[#allocation3 + $0x9]] }
 0x110   : > { %878 = vrot.lane.b32.xlu1 %v1832_v47, %s1750_s22  ;;  %890 = vrot.lane.b32.xlu0 %v1832_v47, %s3214_s24  ;;  %s1940_s24 = sld [smem:[#allocation3]] }
 0x112   : > { %v350_v28 = vstv %s1982_s19  ;;  %s2069_s19 = sld [smem:[#allocation3 + $0xa]] }
 0x114   : > { %902 = vrot.lane.b32.xlu1 %v1832_v47, %s3220_s20  ;;  %s2037_s20 = sld [smem:[#allocation3 + $0x8]] }
 0x116   : > { %v285_v62 = vstv %s1940_s24  ;;  %s1997_s24 = sld [smem:[#allocation3 + $0x5]] }
 0x117   : > { %v286_v15 = vmul.f32 %v285_v62, %v284_v7 }
 0x11a   : > { %v410_v56 = vstv %s2037_s20  ;;  %s2121_s20 = sld [smem:[#allocation3 + $0xd]] }
 0x11c   : > { %v366_v35 = vstv %s1997_s24  ;;  %s2094_s24 = sld [smem:[#allocation3 + $0xb]] }
 0x126   : > { %v313_v63 = vpop.permute.xlu1 %312  ;;  %v297_v0 = vpop.permute.xlu0 %296 }
 0x127   : > { %v314_v3 = vrot.slane %v313_v63, 1  ;;  %v298_v5 = vrot.slane %v297_v0, 1 }
 0x129   : > { %v316_v9 = vsel %vm3219_vm12, %v313_v63, %v314_v3  ;;  %v300_v10 = vsel %vm3218_vm13, %v297_v0, %v298_v5  ;;  %vm3331_vm13 = vmand %vm1944_vm11, %vm1958_vm0 }
 0x12a   : > { %v318_v11 = vsel %vm3330_vm5, %v316_v9, 0.0  ;;  %v302_v12 = vsel %vm3331_vm13, %v300_v10, 0.0  ;;  %v328_v13 = vpop.permute.xlu1 %327  ;;  %v344_v14 = vpop.permute.xlu0 %343  ;;  %vm2024_vm5 = vmand %vm354_vm4, %vm355_vm6  ;;  %vm3334_vm13 = vcmp.ge.s32.totalorder %v369_v61, 0  ;;  %vm3338_vm4 = vcmask 1014784  }
 0x12b   : > { %v304_v16 = vmul.f32 %v303_v4, %v302_v12  ;;  %v329_v18 = vrot.slane %v328_v13, 1  ;;  %v345_v19 = vrot.slane %v344_v14, 1  ;;  %vm2033_vm12 = vmand %vm3334_vm13, %vm371_vm7  ;;  %v320_v23 = vmul.f32 %v319_v2, %v318_v11 }
 0x12c   : > { %vm3339_vm6 = vmand %vm1944_vm11, %vm1978_vm3  ;;  %vm3222_vm13 = vcmask 1006592   ;;  %v473_v4 = vadd.s32 4294967295, %v1934_v48  ;;  %v422_v10 = vstv %s2060_s18  ;;  %v434_v11 = vstv %s2069_s19  ;;  %s2146_s18 = sld [smem:[#allocation3 + $0xf]] }
 0x12d   : > { %v305_v24 = vadd.f32 %v304_v16, %v286_v15  ;;  %v331_v25 = vsel %vm3337_vm2, %v328_v13, %v329_v18  ;;  %v347_v26 = vsel %vm3338_vm4, %v344_v14, %v345_v19  ;;  %vm3340_vm7 = vmand %vm1944_vm11, %vm1988_vm10  ;;  %s2171_s19 = sld [smem:[#allocation3 + $0x10]] }
 0x12e   : > { %v333_v27 = vsel %vm3339_vm6, %v331_v25, 0.0  ;;  %v349_v29 = vsel %vm3340_vm7, %v347_v26, 0.0  ;;  %vm3223_vm2 = vmand %vm1944_vm11, %vm2024_vm5  ;;  %v360_v30 = vpop.permute.xlu1 %359  ;;  %v376_v31 = vpop.permute.xlu0 %375  ;;  %vm3225_vm6 = vcmask 998400  }
 0x12f   : > { %v321_v32 = vadd.f32 %v320_v23, %v305_v24  ;;  %v335_v33 = vmul.f32 %v334_v21, %v333_v27  ;;  %v361_v34 = vrot.slane %v360_v30, 1  ;;  %vm3224_vm4 = vmand %vm1944_vm11, %vm2033_vm12  ;;  %v377_v36 = vrot.slane %v376_v31, 1 }
 0x130   : > { %vm2065_vm7 = vmand %vm386_vm8, %vm387_vm9  ;;  %v351_v39 = vmul.f32 %v350_v28, %v349_v29  ;;  %vm3227_vm8 = vcmask 916480   ;;  %vm3228_vm9 = vcmask 908288   ;;  %v446_v27 = vstv %s2094_s24  ;;  %s2178_s24 = sld [smem:[#allocation3 + $0x11]] }
 0x131   : > { %v3342_v37 = vsel %vm2065_vm7, 4294967295, %v3341_v37  ;;  %v336_v38 = vadd.f32 %v335_v33, %v321_v32  ;;  %v363_v40 = vsel %vm3222_vm13, %v360_v30, %v361_v34  ;;  %v379_v45 = vsel %vm3225_vm6, %v376_v31, %v377_v36  ;;  %vm3226_vm13 = vmand %vm2065_vm7, %vm1950_vm14 }
 0x132   : > { %v365_v44 = vsel %vm3223_vm2, %v363_v40, 0.0  ;;  %v392_v46 = vpop.permute.xlu1 %391  ;;  %v404_v47 = vpop.permute.xlu0 %403  ;;  %v381_v51 = vsel %vm3224_vm4, %v379_v45, 0.0  ;;  %vm3229_vm2 = vmand %vm2065_vm7, %vm1958_vm0  ;;  %vm3230_vm4 = vcmask 900096   ;;  %vm3232_vm6 = vcmask 891904  }
 0x133   : > { %v352_v49 = vadd.f32 %v351_v39, %v336_v38  ;;  %v367_v50 = vmul.f32 %v366_v35, %v365_v44  ;;  %v393_v52 = vrot.slane %v392_v46, 1  ;;  %v405_v59 = vrot.slane %v404_v47, 1 }
 0x134   : > { %v383_v61 = vmul.f32 %v382_v41, %v381_v51  ;;  %v458_v32 = vstv %s2097_s16  ;;  %vm3239_vm11 = vcmask 867328   ;;  %v470_v45 = vstv %s2121_s20  ;;  %s2198_s16 = sld [smem:[#allocation3 + $0x12]] }
 0x135   : > { %v368_v60 = vadd.f32 %v367_v50, %v352_v49  ;;  %v395_v62 = vsel %vm3227_vm8, %v392_v46, %v393_v52  ;;  %v407_v0 = vsel %vm3228_vm9, %v404_v47, %v405_v59  ;;  %vm474_vm9 = vcmp.ge.s32.totalorder %v473_v4, 0  ;;  %s2211_s20 = sld [smem:[#allocation3 + $0x13]] }
 0x136   : > { %v397_v63 = vsel %vm3226_vm13, %v395_v62, 0.0  ;;  %v416_v2 = vpop.permute.xlu1 %415  ;;  %v428_v3 = vpop.permute.xlu0 %427  ;;  %v409_v8 = vsel %vm3229_vm2, %v407_v0, 0.0  ;;  %vm3231_vm13 = vmand %vm2065_vm7, %vm1954_vm15  ;;  %vm475_vm8 = vcmp.lt.s32.totalorder %v473_v4, 16  ;;  %vm3344_vm2 = vcmask 883712  }
 0x137   : > { %v384_v5 = vadd.f32 %v383_v61, %v368_v60  ;;  %v399_v7 = vmul.f32 %v398_v53, %v397_v63  ;;  %v417_v9 = vrot.slane %v416_v2, 1  ;;  %v429_v12 = vrot.slane %v428_v3, 1 }
 0x138   : > { %v411_v14 = vmul.f32 %v410_v56, %v409_v8  ;;  %v486_v52 = vstv %s2130_s17  ;;  %v498_v0 = vstv %s2146_s18  ;;  %s2224_s17 = sld [smem:[#allocation3 + $0x14]] }
 0x139   : > { %v400_v13 = vadd.f32 %v399_v7, %v384_v5  ;;  %v419_v15 = vsel %vm3230_vm4, %v416_v2, %v417_v9  ;;  %v431_v18 = vsel %vm3232_vm6, %v428_v3, %v429_v12  ;;  %vm3343_vm4 = vmand %vm2065_vm7, %vm1978_vm3  ;;  %vm3347_vm6 = vcmask 875520   ;;  %s2228_s18 = sld [smem:[#allocation3 + $0x15]] }
 0x13a   : > { %v421_v16 = vsel %vm3231_vm13, %v419_v15, 0.0  ;;  %v440_v19 = vpop.permute.xlu1 %439  ;;  %v452_v21 = vpop.permute.xlu0 %451  ;;  %v433_v25 = vsel %vm3343_vm4, %v431_v18, 0.0  ;;  %vm3243_vm13 = vmand %vm2065_vm7, %vm1988_vm10  ;;  %vm3240_vm3 = vcmask 785408   ;;  %v510_v15 = vstv %s2171_s19  ;;  %s2251_s19 = sld [smem:[#allocation3 + $0x16]] }
 0x13b   : > { %v412_v23 = vadd.f32 %v411_v14, %v400_v13  ;;  %v423_v24 = vmul.f32 %v422_v10, %v421_v16  ;;  %v441_v26 = vrot.slane %v440_v19, 1  ;;  %v453_v28 = vrot.slane %v452_v21, 1  ;;  %vm2152_vm4 = vmand %vm474_vm9, %vm475_vm8 }
 0x13c   : > { %v435_v30 = vmul.f32 %v434_v11, %v433_v25  ;;  %vm3238_vm8 = vmand %vm2065_vm7, %vm2033_vm12  ;;  %vm3241_vm9 = vcmask 777216   ;;  %v522_v16 = vstv %s2178_s24  ;;  %s2287_s24 = sld [smem:[#allocation3 + $0x17]] }
 0x13d   : > { %v424_v29 = vadd.f32 %v423_v24, %v412_v23  ;;  %v443_v31 = vsel %vm3344_vm2, %v440_v19, %v441_v26  ;;  %v455_v35 = vsel %vm3347_vm6, %v452_v21, %v453_v28  ;;  %vm3348_vm2 = vmand %vm2065_vm7, %vm2024_vm5  ;;  %vm3248_vm7 = vcmask 744448  }
 0x13e   : > { %v445_v34 = vsel %vm3243_vm13, %v443_v31, 0.0  ;;  %v464_v36 = vpop.permute.xlu1 %463  ;;  %v480_v38 = vpop.permute.xlu0 %479  ;;  %v457_v41 = vsel %vm3348_vm2, %v455_v35, 0.0  ;;  %vm3237_vm6 = vmand %vm2152_vm4, %vm1950_vm14  ;;  %v534_v28 = vstv %s2198_s16  ;;  %s2486_s16 = sld [smem:[#allocation3 + $0x22]] }
 0x13f   : > { %v436_v39 = vadd.f32 %v435_v30, %v424_v29  ;;  %v447_v40 = vmul.f32 %v446_v27, %v445_v34  ;;  %v465_v44 = vrot.slane %v464_v36, 1  ;;  %v481_v46 = vrot.slane %v480_v38, 1  ;;  %vm3242_vm2 = vmand %vm2152_vm4, %vm1958_vm0 }
 0x140   : > { %v459_v49 = vmul.f32 %v458_v32, %v457_v41 }
 0x141   : > { %v448_v47 = vadd.f32 %v447_v40, %v436_v39  ;;  %v467_v50 = vsel %vm3239_vm11, %v464_v36, %v465_v44  ;;  %v483_v53 = vsel %vm3240_vm3, %v480_v38, %v481_v46  ;;  %vm3278_vm11 = vcmask 769024  }
 0x142   : > { %v469_v51 = vsel %vm3238_vm8, %v467_v50, 0.0  ;;  %v492_v56 = vpop.permute.xlu1 %491  ;;  %v264_v59 = vpop.permute.xlu0 %263  ;;  %v485_v62 = vsel %vm3237_vm6, %v483_v53, 0.0  ;;  %vm3349_vm6 = vcmask 416768   ;;  %vm3246_vm3 = vcmask 760832  }
 0x143   : > { %v460_v60 = vadd.f32 %v459_v49, %v448_v47  ;;  %v471_v61 = vmul.f32 %v470_v45, %v469_v51  ;;  %v493_v63 = vrot.slane %v492_v56, 1  ;;  %v265_v2 = vrot.slane %v264_v59, 7 }
 0x144   : > { %v487_v4 = vmul.f32 %v486_v52, %v485_v62  ;;  %vm3251_vm8 = vcmask 752640   ;;  %v546_v38 = vstv %s2211_s20  ;;  %v558_v47 = vstv %s2224_s17  ;;  %s3364_s20 = smov 77   ;;  %s3365_s17 = smov 78  }
 0x145   : > { %v472_v3 = vadd.f32 %v471_v61, %v460_v60  ;;  %v495_v5 = vsel %vm3241_vm9, %v492_v56, %v493_v63  ;;  %v266_v8 = vsel %vm3349_vm6, %v265_v2, %v264_v59  ;;  %vm3350_vm9 = vnez %v3317_v43 }
 0x146   : > { %v497_v7 = vsel %vm3242_vm2, %v495_v5, 0.0  ;;  %v504_v9 = vpop.permute.xlu1 %503  ;;  %v516_v10 = vpop.permute.xlu0 %515  ;;  %vm3351_vm2 = vmand %vm1814_vm1, %vm3350_vm9  ;;  %vm3352_vm6 = vnez %v3327_v1  ;;  %v573_v53 = vstv %s2228_s18  ;;  %s3366_s18 = smov 75  }
 0x147   : > { %v488_v11 = vadd.f32 %v487_v4, %v472_v3  ;;  %v499_v12 = vmul.f32 %v498_v0, %v497_v7  ;;  %269 = vst.msk [vmem:[#allocation2 + $0x1] ss:$2 sm:$0x7] %vm3351_vm2, %v266_v8  ;;  %v505_v13 = vrot.slane %v504_v9, 1  ;;  %vm3247_vm13 = vmand %vm2152_vm4, %vm3352_vm6  ;;  %v517_v14 = vrot.slane %v516_v10, 1 }
 0x148   : > { %vm3353_vm1 = vmand %vm2152_vm4, %vm1954_vm15  ;;  %vm561_vm2 = vcmp.ge.s32.totalorder %v1934_v48, 0  ;;  %v585_v3 = vstv %s2251_s19  ;;  %s3367_s19 = smov 76  }
 0x149   : > { %v507_v18 = vsel %vm3278_vm11, %v504_v9, %v505_v13  ;;  %v519_v19 = vsel %vm3246_vm3, %v516_v10, %v517_v14  ;;  %vm3250_vm9 = vmand %vm2152_vm4, %vm1988_vm10  ;;  %vm562_vm3 = vcmp.lt.s32.totalorder %v1934_v48, 16  ;;  %v500_v24 = vadd.f32 %v499_v12, %v488_v11 }
 0x14a   : > { %v509_v42 = vsel %vm3353_vm1, %v507_v18, 0.0  ;;  %v521_v43 = vsel %vm3247_vm13, %v519_v19, 0.0  ;;  %v528_v21 = vpop.permute.xlu1 %527  ;;  %v540_v23 = vpop.permute.xlu0 %539  ;;  %vm3249_vm1 = vmand %vm2152_vm4, %vm2024_vm5 }
 0x14b   : > { %v511_v25 = vmul.f32 %v510_v15, %v509_v42  ;;  %v529_v26 = vrot.slane %v528_v21, 1  ;;  %v541_v27 = vrot.slane %v540_v23, 1  ;;  %v523_v30 = vmul.f32 %v522_v16, %v521_v43  ;;  %vm2255_vm13 = vmand %vm561_vm2, %vm562_vm3 }
 0x14c   : > { %vm3264_vm3 = vmand %vm2152_vm4, %vm2033_vm12  ;;  %vm3254_vm2 = vcmask 654336   ;;  %v597_v16 = vstv %s2287_s24  ;;  %s2513_s24 = sld [smem:[#allocation3 + $0x23]] }
 0x14d   : > { %v512_v29 = vadd.f32 %v511_v25, %v500_v24  ;;  %v531_v31 = vsel %vm3251_vm8, %v528_v21, %v529_v26  ;;  %v543_v32 = vsel %vm3248_vm7, %v540_v23, %v541_v27  ;;  %vm3252_vm7 = vcmask 736256  }
 0x14e   : > { %v2259_v35 = vld [vmem:[#allocation2 + $0x1] ss:$2 sm:$0x7]  ;;  %v533_v36 = vsel %vm3250_vm9, %v531_v31, 0.0  ;;  %v545_v39 = vsel %vm3249_vm1, %v543_v32, 0.0  ;;  %v552_v40 = vpop.permute.xlu1 %551  ;;  %v567_v41 = vpop.permute.xlu0 %566  ;;  %vm3253_vm1 = vmand %vm2255_vm13, %vm1950_vm14  ;;  %vm3261_vm9 = vcmask 646144  }
 0x14f   : > { %v524_v44 = vadd.f32 %v523_v30, %v512_v29  ;;  %v535_v45 = vmul.f32 %v534_v28, %v533_v36  ;;  %v553_v46 = vrot.slane %v552_v40, 1  ;;  %931 = vrot.lane.b32.xlu1 %v2259_v35, %s1705_s25  ;;  %921 = vrot.lane.b32.xlu0 %v2259_v35, %s1706_s26  ;;  %v568_v49 = vrot.slane %v567_v41, 1  ;;  %s2308_s25 = sld [smem:[#allocation3 + $0x18]] }
 0x150   : > { %v547_v51 = vmul.f32 %v546_v38, %v545_v39  ;;  %vm3256_vm8 = vcmask 637952   ;;  %s2337_s26 = sld [smem:[#allocation3 + $0x19]]  ;;  %v648_v30 = vadd.s32 1, %v1934_v48 }
 0x151   : > { %v536_v50 = vadd.f32 %v535_v45, %v524_v44  ;;  %v555_v52 = vsel %vm3252_vm7, %v552_v40, %v553_v46  ;;  %v570_v59 = vsel %vm3254_vm2, %v567_v41, %v568_v49  ;;  %vm3255_vm7 = vmand %vm2255_vm13, %vm1958_vm0  ;;  %vm3259_vm2 = vcmask 629760  }
 0x152   : > { %v557_v56 = vsel %vm3264_vm3, %v555_v52, 0.0  ;;  %v579_v60 = vpop.permute.xlu1 %578  ;;  %v591_v61 = vpop.permute.xlu0 %590  ;;  %v572_v0 = vsel %vm3253_vm1, %v570_v59, 0.0  ;;  %vm3257_vm1 = vmand %vm2255_vm13, %vm1954_vm15  ;;  %v3356_v49 = vmov 0  ;;  %vm3277_vm3 = vcmask 523264  }
 0x153   : > { %v548_v62 = vadd.f32 %v547_v51, %v536_v50  ;;  %v559_v63 = vmul.f32 %v558_v47, %v557_v56  ;;  %v580_v2 = vrot.slane %v579_v60, 1  ;;  %951 = vrot.lane.b32.xlu1 %v2259_v35, %s1708_s28  ;;  %941 = vrot.lane.b32.xlu0 %v2259_v35, %s1707_s27  ;;  %v592_v4 = vrot.slane %v591_v61, 1  ;;  %s2345_s27 = sld [smem:[#allocation3 + $0x1a]] }
 0x154   : > { %v574_v7 = vmul.f32 %v573_v53, %v572_v0  ;;  %s2372_s28 = sld [smem:[#allocation3 + $0x1b]] }
 0x155   : > { %v560_v5 = vadd.f32 %v559_v63, %v548_v62  ;;  %v582_v8 = vsel %vm3261_vm9, %v579_v60, %v580_v2  ;;  %v594_v10 = vsel %vm3256_vm8, %v591_v61, %v592_v4  ;;  %v609_v23 = vstv %s2308_s25  ;;  %s2525_s25 = sld [smem:[#allocation3 + $0x24]] }
 0x156   : > { %v584_v9 = vsel %vm3255_vm7, %v582_v8, 0.0  ;;  %v603_v11 = vpop.permute.xlu1 %602  ;;  %v615_v15 = vpop.permute.xlu0 %614  ;;  %vm3258_vm7 = vmand %vm2255_vm13, %vm3352_vm6  ;;  %v596_v18 = vsel %vm3257_vm1, %v594_v10, 0.0  ;;  %vm3260_vm8 = vcmask 621568   ;;  %vm3262_vm1 = vcmask 613376  }
 0x157   : > { %v575_v12 = vadd.f32 %v574_v7, %v560_v5  ;;  %v586_v13 = vmul.f32 %v585_v3, %v584_v9  ;;  %v604_v14 = vrot.slane %v603_v11, 1  ;;  %971 = vrot.lane.b32.xlu1 %v2259_v35, %s1710_s30  ;;  %961 = vrot.lane.b32.xlu0 %v2259_v35, %s1709_s29  ;;  %v616_v43 = vrot.slane %v615_v15, 1  ;;  %s2380_s29 = sld [smem:[#allocation3 + $0x1c]] }
 0x158   : > { %v598_v25 = vmul.f32 %v597_v16, %v596_v18  ;;  %v621_v36 = vstv %s2337_s26  ;;  %vm650_vm9 = vcmp.lt.s32.totalorder %v648_v30, 16  ;;  %s2410_s30 = sld [smem:[#allocation3 + $0x1d]]  ;;  %s3370_s26 = smov 64  }
 0x159   : > { %v606_v19 = vsel %vm3259_vm2, %v603_v11, %v604_v14  ;;  %v587_v42 = vadd.f32 %v586_v13, %v575_v12  ;;  %v618_v29 = vsel %vm3260_vm8, %v615_v15, %v616_v43  ;;  %vm3265_vm2 = vmand %vm2255_vm13, %vm2024_vm5  ;;  %vm649_vm8 = vcmp.ge.s32.totalorder %v648_v30, 0 }
 0x15a   : > { %v627_v21 = vpop.permute.xlu1 %626  ;;  %v608_v24 = vsel %vm3258_vm7, %v606_v19, 0.0  ;;  %vm3263_vm7 = vmand %vm2255_vm13, %vm1988_vm10  ;;  %v639_v31 = vpop.permute.xlu0 %638  ;;  %v633_v44 = vstv %s2345_s27  ;;  %v645_v59 = vstv %s2372_s28  ;;  %s3371_s27 = smov 74   ;;  %s3372_s28 = smov 62  }
 0x15b   : > { %991 = vrot.lane.b32.xlu1 %v2259_v35, %s1712_s5  ;;  %981 = vrot.lane.b32.xlu0 %v2259_v35, %s1711_s4  ;;  %v628_v26 = vrot.slane %v627_v21, 1  ;;  %v599_v27 = vadd.f32 %v598_v25, %v587_v42  ;;  %v610_v28 = vmul.f32 %v609_v23, %v608_v24  ;;  %v620_v38 = vsel %vm3263_vm7, %v618_v29, 0.0  ;;  %vm2386_vm7 = vmand %vm649_vm8, %vm650_vm9  ;;  %s2418_s4 = sld [smem:[#allocation3 + $0x1e]]  ;;  %s3358_s5 = smov 92  }
 0x15c   : > { %v640_v41 = vrot.slane %v639_v31, 1  ;;  %v622_v46 = vmul.f32 %v621_v36, %v620_v38  ;;  %v3357_v49 = vsel %vm2386_vm7, 4294967295, %v3356_v49  ;;  %vm3267_vm8 = vmand %vm2386_vm7, %vm1950_vm14  ;;  %vm3269_vm9 = vcmask 515072  }
 0x15d   : > { %v630_v32 = vsel %vm3262_vm1, %v627_v21, %v628_v26  ;;  %v611_v40 = vadd.f32 %v610_v28, %v599_v27  ;;  %vm3268_vm1 = vcmask 605184   ;;  %v661_v0 = vstv %s2380_s29  ;;  %s3373_s29 = smov 63  }
 0x15e   : > { %v655_v39 = vpop.permute.xlu1 %654  ;;  %v632_v45 = vsel %vm3265_vm2, %v630_v32, 0.0  ;;  %vm3266_vm2 = vmand %vm2255_vm13, %vm2033_vm12  ;;  %v642_v52 = vsel %vm3268_vm1, %v639_v31, %v640_v41  ;;  %v667_v53 = vpop.permute.xlu0 %666  ;;  %v673_v11 = vstv %s2410_s30  ;;  %s2551_s30 = sld [smem:[#allocation3 + $0x25]] }
 0x15f   : > { %1011 = vrot.lane.b32.xlu1 %v2259_v35, %s1714_s7  ;;  %1001 = vrot.lane.b32.xlu0 %v2259_v35, %s1713_s6  ;;  %v656_v47 = vrot.slane %v655_v39, 1  ;;  %v623_v50 = vadd.f32 %v622_v46, %v611_v40  ;;  %v634_v51 = vmul.f32 %v633_v44, %v632_v45  ;;  %v644_v60 = vsel %vm3266_vm2, %v642_v52, 0.0  ;;  %s3359_s6 = smov 93   ;;  %vm3271_vm1 = vmand %vm2386_vm7, %vm1954_vm15  ;;  %s2444_s7 = sld [smem:[#allocation3 + $0x1f]] }
 0x160   : > { %v668_v63 = vrot.slane %v667_v53, 1  ;;  %v646_v3 = vmul.f32 %v645_v59, %v644_v60  ;;  %vm3272_vm2 = vcmask 506880  }
 0x161   : > { %v658_v56 = vsel %vm3277_vm3, %v655_v39, %v656_v47  ;;  %v635_v62 = vadd.f32 %v634_v51, %v623_v50  ;;  %v685_v16 = vstv %s2418_s4  ;;  %v736_v39 = vadd.s32 2, %v1934_v48  ;;  %s2559_s4 = sld [smem:[#allocation3 + $0x26]] }
 0x162   : > { %v679_v61 = vpop.permute.xlu1 %678  ;;  %v660_v2 = vsel %vm3267_vm8, %v658_v56, 0.0  ;;  %vm3270_vm8 = vmand %vm2386_vm7, %vm1958_vm0  ;;  %v670_v8 = vsel %vm3269_vm9, %v667_v53, %v668_v63  ;;  %v691_v9 = vpop.permute.xlu0 %690  ;;  %vm3273_vm9 = vcmask 498688   ;;  %v733_v56 = vstv %s2486_s16  ;;  %s3381_s16 = smov 46  }
 0x163   : > { %1031 = vrot.lane.b32.xlu1 %v2259_v35, %s1716_s9  ;;  %1021 = vrot.lane.b32.xlu0 %v2259_v35, %s1715_s8  ;;  %v680_v4 = vrot.slane %v679_v61, 1  ;;  %v647_v5 = vadd.f32 %v646_v3, %v635_v62  ;;  %v662_v7 = vmul.f32 %v661_v0, %v660_v2  ;;  %v672_v12 = vsel %vm3270_vm8, %v670_v8, 0.0  ;;  %s2452_s8 = sld [smem:[#allocation3 + $0x20]]  ;;  %s3360_s9 = smov 90  }
 0x164   : > { %v692_v15 = vrot.slane %v691_v9, 1  ;;  %v674_v19 = vmul.f32 %v673_v11, %v672_v12  ;;  %vm3276_vm8 = vcmask 490496   ;;  %vm737_vm3 = vcmp.ge.s32.totalorder %v736_v39, 0 }
 0x165   : > { %v682_v10 = vsel %vm3272_vm2, %v679_v61, %v680_v4  ;;  %v663_v14 = vadd.f32 %v662_v7, %v647_v5  ;;  %vm3275_vm2 = vmand %vm2386_vm7, %vm1988_vm10  ;;  %v697_v26 = vstv %s2444_s7  ;;  %vm738_vm11 = vcmp.lt.s32.totalorder %v736_v39, 16  ;;  %s3376_s7 = smov 58  }
 0x166   : > { %v703_v13 = vpop.permute.xlu1 %702  ;;  %v684_v18 = vsel %vm3271_vm1, %v682_v10, 0.0  ;;  %vm3274_vm1 = vmand %vm2386_vm7, %vm3352_vm6  ;;  %v694_v23 = vsel %vm3273_vm9, %v691_v9, %v692_v15  ;;  %v715_v24 = vpop.permute.xlu0 %714  ;;  %vm3279_vm9 = vcmask 482304   ;;  %v749_v5 = vstv %s2513_s24  ;;  %s3386_s24 = smov 32  }
 0x167   : > { %1051 = vrot.lane.b32.xlu1 %v2259_v35, %s1718_s11  ;;  %1041 = vrot.lane.b32.xlu0 %v2259_v35, %s1717_s10  ;;  %s3361_s10 = smov 91   ;;  %v704_v42 = vrot.slane %v703_v13, 1  ;;  %v675_v43 = vadd.f32 %v674_v19, %v663_v14  ;;  %v686_v21 = vmul.f32 %v685_v16, %v684_v18  ;;  %s3362_s11 = smov 79   ;;  %v696_v27 = vsel %vm3274_vm1, %v694_v23, 0.0 }
 0x168   : > { %v716_v30 = vrot.slane %v715_v24, 1  ;;  %v698_v36 = vmul.f32 %v697_v26, %v696_v27  ;;  %vm3280_vm1 = vcmask 474112   ;;  %v761_v11 = vstv %s2525_s25  ;;  %s3387_s25 = smov 42  }
 0x169   : > { %v706_v25 = vsel %vm3276_vm8, %v703_v13, %v704_v42  ;;  %v687_v29 = vadd.f32 %v686_v21, %v675_v43  ;;  %v709_v31 = vstv %s2452_s8  ;;  %vm3291_vm8 = vmand %vm2386_vm7, %vm2033_vm12  ;;  %s3377_s8 = smov 59   ;;  %v773_v43 = vstv %s2551_s30  ;;  %s1542_s30 = sld [smem:[#allocation3 + $0x2d]] }
 0x16a   : > { %v727_v28 = vpop.permute.xlu1 %726  ;;  %v708_v32 = vsel %vm3275_vm2, %v706_v25, 0.0  ;;  %vm3281_vm2 = vmand %vm2386_vm7, %vm2024_vm5  ;;  %v718_v44 = vsel %vm3279_vm9, %v715_v24, %v716_v30  ;;  %v743_v45 = vpop.permute.xlu0 %742  ;;  %v785_v26 = vstv %s2559_s4  ;;  %vm3307_vm7 = vcmask 261120   ;;  %s3391_s4 = smov 27  }
 0x16b   : > { %1071 = vrot.lane.b32.xlu1 %v2259_v35, %s1720_s15  ;;  %1061 = vrot.lane.b32.xlu0 %v2259_v35, %s1719_s14  ;;  %s3363_s14 = smov 80   ;;  %s2478_s15 = sld [smem:[#allocation3 + $0x21]]  ;;  %v728_v38 = vrot.slane %v727_v28, 1  ;;  %v699_v40 = vadd.f32 %v698_v36, %v687_v29  ;;  %v710_v41 = vmul.f32 %v709_v31, %v708_v32  ;;  %v720_v50 = vsel %vm3281_vm2, %v718_v44, 0.0  ;;  %vm2521_vm9 = vmand %vm737_vm3, %vm738_vm11 }
 0x16c   : > { %v744_v53 = vrot.slane %v743_v45, 1  ;;  %vm3285_vm2 = vcmask 384000   ;;  %vm3283_vm11 = vmand %vm2521_vm9, %vm1950_vm14  ;;  %v824_v36 = vadd.s32 3, %v1934_v48 }
 0x16d   : > { %v730_v46 = vsel %vm3280_vm1, %v727_v28, %v728_v38  ;;  %v711_v52 = vadd.f32 %v710_v41, %v699_v40  ;;  %vm3282_vm1 = vcmask 392192   ;;  %vm3284_vm3 = vmand %vm2521_vm9, %vm1958_vm0 }
 0x16e   : > { %v755_v51 = vpop.permute.xlu1 %754  ;;  %v732_v59 = vsel %vm3291_vm8, %v730_v46, 0.0  ;;  %v746_v2 = vsel %vm3282_vm1, %v743_v45, %v744_v53  ;;  %v767_v3 = vpop.permute.xlu0 %766  ;;  %vm3286_vm1 = vcmask 375808   ;;  %vm826_vm8 = vcmp.lt.s32.totalorder %v824_v36, 16 }
 0x16f   : > { %1091 = vrot.lane.b32.xlu1 %v2259_v35, %s3358_s5  ;;  %1081 = vrot.lane.b32.xlu0 %v2259_v35, %s3359_s6  ;;  %v756_v62 = vrot.slane %v755_v51, 1  ;;  %v734_v0 = vmul.f32 %v733_v56, %v732_v59  ;;  %v748_v7 = vsel %vm3283_vm11, %v746_v2, 0.0  ;;  %v768_v10 = vrot.slane %v767_v3, 1  ;;  %s3374_s5 = smov 60   ;;  %s3375_s6 = smov 61  }
 0x170   : > { %v750_v13 = vmul.f32 %v749_v5, %v748_v7  ;;  %vm3289_vm11 = vcmask 367616  }
 0x171   : > { %v721_v47 = vstv %s2478_s15  ;;  %v758_v4 = vsel %vm3285_vm2, %v755_v51, %v756_v62  ;;  %v770_v18 = vsel %vm3286_vm1, %v767_v3, %v768_v10  ;;  %vm3288_vm2 = vmand %vm2521_vm9, %vm3352_vm6  ;;  %vm3290_vm1 = vcmask 359424   ;;  %s3380_s15 = smov 45  }
 0x172   : > { %v722_v61 = vmul.f32 %v721_v47, %v720_v50  ;;  %v779_v8 = vpop.permute.xlu1 %778  ;;  %v760_v12 = vsel %vm3284_vm3, %v758_v4, 0.0  ;;  %vm3287_vm3 = vmand %vm2521_vm9, %vm1954_vm15  ;;  %v791_v19 = vpop.permute.xlu0 %790 }
 0x173   : > { %1111 = vrot.lane.b32.xlu1 %v2259_v35, %s3360_s9  ;;  %1101 = vrot.lane.b32.xlu0 %v2259_v35, %s3361_s10  ;;  %v780_v14 = vrot.slane %v779_v8, 1  ;;  %v762_v16 = vmul.f32 %v761_v11, %v760_v12  ;;  %v772_v21 = vsel %vm3287_vm3, %v770_v18, 0.0  ;;  %s2585_s9 = sld [smem:[#allocation3 + $0x27]]  ;;  %v792_v25 = vrot.slane %v791_v19, 1 }
 0x174   : > { %v723_v63 = vadd.f32 %v722_v61, %v711_v52  ;;  %s2593_s10 = sld [smem:[#allocation3 + $0x28]]  ;;  %v774_v28 = vmul.f32 %v773_v43, %v772_v21  ;;  %vm3292_vm3 = vcmask 351232   ;;  %v1413_v52 = vsub.s32 1, %v1808_v17 }
 0x175   : > { %v782_v42 = vsel %vm3289_vm11, %v779_v8, %v780_v14  ;;  %v794_v32 = vsel %vm3290_vm1, %v791_v19, %v792_v25  ;;  %vm3296_vm11 = vmand %vm2521_vm9, %vm2024_vm5  ;;  %vm825_vm1 = vcmp.ge.s32.totalorder %v824_v36, 0 }
 0x176   : > { %v735_v9 = vadd.f32 %v734_v0, %v723_v63  ;;  %v803_v23 = vpop.permute.xlu1 %802  ;;  %v784_v27 = vsel %vm3288_vm2, %v782_v42, 0.0  ;;  %vm3293_vm2 = vmand %vm2521_vm9, %vm1988_vm10  ;;  %v815_v38 = vpop.permute.xlu0 %814 }
 0x177   : > { %1131 = vrot.lane.b32.xlu1 %v2259_v35, %s3362_s11  ;;  %1121 = vrot.lane.b32.xlu0 %v2259_v35, %s3363_s14  ;;  %s3378_s11 = smov 47   ;;  %s3379_s14 = smov 48   ;;  %v804_v29 = vrot.slane %v803_v23, 1  ;;  %v786_v31 = vmul.f32 %v785_v26, %v784_v27  ;;  %v796_v48 = vsel %vm3293_vm2, %v794_v32, 0.0  ;;  %v816_v45 = vrot.slane %v815_v38, 1  ;;  %vm2634_vm2 = vmand %vm825_vm1, %vm826_vm8 }
 0x178   : > { %v751_v15 = vadd.f32 %v750_v13, %v735_v9  ;;  %vm3298_vm1 = vmand %vm2634_vm2, %vm1950_vm14  ;;  %vm3300_vm8 = vcmask 252928  }
 0x179   : > { %v806_v39 = vsel %vm3292_vm3, %v803_v23, %v804_v29  ;;  %v797_v40 = vstv %s2585_s9  ;;  %vm3299_vm3 = vcmask 343040   ;;  %v873_v29 = vstv %s1542_s30  ;;  %s1548_s9 = sld [smem:[#allocation3 + $0x33]] }
 0x17a   : > { %v763_v24 = vadd.f32 %v762_v16, %v751_v15  ;;  %v831_v41 = vpop.permute.xlu1 %830  ;;  %v809_v46 = vstv %s2593_s10  ;;  %v808_v47 = vsel %vm3296_vm11, %v806_v39, 0.0  ;;  %v798_v50 = vmul.f32 %v797_v40, %v796_v48  ;;  %vm3297_vm11 = vmand %vm2521_vm9, %vm2033_vm12  ;;  %v843_v61 = vpop.permute.xlu0 %842  ;;  %s2742_s10 = sld [smem:[#allocation3 + $0x34]] }
 0x17b   : > { %1151 = vrot.lane.b32.xlu1 %v2259_v35, %s3364_s20  ;;  %1141 = vrot.lane.b32.xlu0 %v2259_v35, %s3365_s17  ;;  %s2620_s20 = sld [smem:[#allocation3 + $0x29]]  ;;  %v832_v51 = vrot.slane %v831_v41, 1  ;;  %v810_v56 = vmul.f32 %v809_v46, %v808_v47  ;;  %v818_v59 = vsel %vm3299_vm3, %v815_v38, %v816_v45  ;;  %v844_v4 = vrot.slane %v843_v61, 1  ;;  %vm3303_vm3 = vmand %vm2634_vm2, %vm1954_vm15 }
 0x17c   : > { %v775_v30 = vadd.f32 %v774_v28, %v763_v24  ;;  %s2628_s17 = sld [smem:[#allocation3 + $0x2a]]  ;;  %v820_v0 = vsel %vm3297_vm11, %v818_v59, 0.0  ;;  %vm3302_vm11 = vcmask 244736  }
 0x17d   : > { %v834_v62 = vsel %vm3307_vm7, %v831_v41, %v832_v51  ;;  %v846_v12 = vsel %vm3300_vm8, %v843_v61, %v844_v4  ;;  %vm3304_vm8 = vcmask 236544   ;;  %vm3310_vm7 = vmand %vm2634_vm2, %vm2033_vm12  ;;  %s2868_s30 = sld [smem:[#allocation3 + $0x43]] }
 0x17e   : > { %v787_v44 = vadd.f32 %v786_v31, %v775_v30  ;;  %v855_v2 = vpop.permute.xlu1 %854  ;;  %v836_v7 = vsel %vm3298_vm1, %v834_v62, 0.0  ;;  %vm3301_vm1 = vmand %vm2634_vm2, %vm1958_vm0  ;;  %v867_v13 = vpop.permute.xlu0 %866 }
 0x17f   : > { %1171 = vrot.lane.b32.xlu1 %v2259_v35, %s3366_s18  ;;  %1161 = vrot.lane.b32.xlu0 %v2259_v35, %s3367_s19  ;;  %s3382_s18 = smov 43   ;;  %s3383_s19 = smov 44   ;;  %v856_v9 = vrot.slane %v855_v2, 1  ;;  %v848_v16 = vsel %vm3301_vm1, %v846_v12, 0.0  ;;  %v868_v42 = vrot.slane %v867_v13, 1  ;;  %vm3305_vm1 = vcmask 228352  }
 0x180   : > { %v799_v53 = vadd.f32 %v798_v50, %v787_v44 }
 0x181   : > { %v821_v63 = vstv %s2620_s20  ;;  %v858_v14 = vsel %vm3302_vm11, %v855_v2, %v856_v9  ;;  %vm3306_vm11 = vmand %vm2634_vm2, %vm3352_vm6  ;;  %v870_v27 = vsel %vm3304_vm8, %v867_v13, %v868_v42  ;;  %vm3309_vm8 = vcmask 220160   ;;  %s2783_s20 = sld [smem:[#allocation3 + $0x39]] }
 0x182   : > { %v811_v3 = vadd.f32 %v810_v56, %v799_v53  ;;  %v837_v5 = vstv %s2628_s17  ;;  %v822_v8 = vmul.f32 %v821_v63, %v820_v0  ;;  %v879_v18 = vpop.permute.xlu1 %878  ;;  %v860_v21 = vsel %vm3303_vm3, %v858_v14, 0.0  ;;  %v891_v28 = vpop.permute.xlu0 %890  ;;  %vm3312_vm3 = vmand %vm2634_vm2, %vm1988_vm10  ;;  %v912_v63 = vld [vmem:[#allocation2 + $0x1] ss:$2 sm:$0x3]  ;;  %s2785_s17 = sld [smem:[#allocation3 + $0x3a]] }
 0x183   : > { %1191 = vrot.lane.b32.xlu1 %v2259_v35, %s3370_s26  ;;  %1181 = vrot.lane.b32.xlu0 %v2259_v35, %s3371_s27  ;;  %s2658_s26 = sld [smem:[#allocation3 + $0x2b]]  ;;  %v838_v11 = vmul.f32 %v837_v5, %v836_v7  ;;  %v880_v24 = vrot.slane %v879_v18, 1  ;;  %v872_v30 = vsel %vm3306_vm11, %v870_v27, 0.0  ;;  %v892_v36 = vrot.slane %v891_v28, 1  ;;  %vm3308_vm11 = vmand %vm2634_vm2, %vm2024_vm5 }
 0x184   : > { %s2666_s27 = sld [smem:[#allocation3 + $0x2c]]  ;;  %v823_v10 = vadd.f32 %v822_v8, %v811_v3  ;;  %v874_v40 = vmul.f32 %v873_v29, %v872_v30  ;;  %v937_v13 = vstv %s1548_s9 }
 0x185   : > { %v894_v45 = vsel %vm3309_vm8, %v891_v28, %v892_v36  ;;  %s2940_s9 = sld [smem:[#allocation3 + $0x4b]] }
 0x186   : > { %v839_v19 = vadd.f32 %v838_v11, %v823_v10  ;;  %v903_v31 = vpop.permute.xlu1 %902  ;;  %v896_v50 = vsel %vm3308_vm11, %v894_v45, 0.0  ;;  %vm3392_vm11 = vnez %v3319_v54 }
 0x187   : > { %1211 = vrot.lane.b32.xlu1 %v2259_v35, %s3372_s28  ;;  %1201 = vrot.lane.b32.xlu0 %v2259_v35, %s3373_s29  ;;  %s3388_s28 = smov 30   ;;  %s3389_s29 = smov 31   ;;  %v904_v48 = vrot.slane %v903_v31, 1  ;;  %vm3393_vm8 = vmand %vm3392_vm11, %vm1950_vm14 }
 0x188   : > { %v914_v2 = vsel %vm3393_vm8, %v912_v63, 0.0  ;;  %vm3396_vm8 = vmand %vm3392_vm11, %vm1954_vm15 }
 0x189   : > { %v849_v15 = vstv %s2658_s26  ;;  %s2832_s26 = sld [smem:[#allocation3 + $0x3f]] }
 0x18a   : > { %v861_v43 = vstv %s2666_s27  ;;  %v850_v23 = vmul.f32 %v849_v15, %v848_v16  ;;  %s2840_s27 = sld [smem:[#allocation3 + $0x40]] }
 0x18b   : > { %1231 = vrot.lane.b32.xlu1 %v2259_v35, %s3374_s5  ;;  %1221 = vrot.lane.b32.xlu0 %v2259_v35, %s3375_s6  ;;  %v862_v26 = vmul.f32 %v861_v43, %v860_v21  ;;  %s1544_s5 = sld [smem:[#allocation3 + $0x2f]] }
 0x18c   : > { %v851_v25 = vadd.f32 %v850_v23, %v839_v19  ;;  %s1545_s6 = sld [smem:[#allocation3 + $0x30]]  ;;  %v947_v23 = vstv %s2742_s10 }
 0x18d   : > { %s2948_s10 = sld [smem:[#allocation3 + $0x4c]] }
 0x18e   : > { %v863_v32 = vadd.f32 %v862_v26, %v851_v25 }
 0x18f   : > { %1251 = vrot.lane.b32.xlu1 %v2259_v35, %s3376_s7  ;;  %1241 = vrot.lane.b32.xlu0 %v2259_v35, %s3377_s8  ;;  %s1546_s7 = sld [smem:[#allocation3 + $0x31]] }
 0x190   : > { %v875_v41 = vadd.f32 %v874_v40, %v863_v32  ;;  %s1547_s8 = sld [smem:[#allocation3 + $0x32]] }
 0x191   : > { %v897_v47 = vstv %s1544_s5  ;;  %s2904_s5 = sld [smem:[#allocation3 + $0x47]] }
 0x192   : > { %v909_v53 = vstv %s1545_s6  ;;  %v898_v59 = vmul.f32 %v897_v47, %v896_v50  ;;  %s2912_s6 = sld [smem:[#allocation3 + $0x48]] }
 0x193   : > { %1271 = vrot.lane.b32.xlu1 %v2259_v35, %s3378_s11  ;;  %1261 = vrot.lane.b32.xlu0 %v2259_v35, %s3379_s14  ;;  %s2749_s11 = sld [smem:[#allocation3 + $0x35]] }
 0x194   : > { %s2753_s14 = sld [smem:[#allocation3 + $0x36]] }
 0x195   : > { %v915_v3 = vstv %s1546_s7  ;;  %s2922_s7 = sld [smem:[#allocation3 + $0x49]] }
 0x196   : > { %v927_v9 = vstv %s1547_s8  ;;  %v916_v11 = vmul.f32 %v915_v3, %v914_v2  ;;  %s2930_s8 = sld [smem:[#allocation3 + $0x4a]] }
 0x197   : > { %1291 = vrot.lane.b32.xlu1 %v2259_v35, %s3380_s15  ;;  %1281 = vrot.lane.b32.xlu0 %v2259_v35, %s3381_s16  ;;  %s2765_s15 = sld [smem:[#allocation3 + $0x37]] }
 0x198   : > { %s2770_s16 = sld [smem:[#allocation3 + $0x38]] }
 0x199   : > { %v957_v28 = vstv %s2749_s11  ;;  %s2958_s11 = sld [smem:[#allocation3 + $0x4d]] }
 0x19b   : > { %1311 = vrot.lane.b32.xlu1 %v2259_v35, %s3382_s18  ;;  %1301 = vrot.lane.b32.xlu0 %v2259_v35, %s3383_s19  ;;  %s2791_s18 = sld [smem:[#allocation3 + $0x3b]] }
 0x19c   : > { %s2803_s19 = sld [smem:[#allocation3 + $0x3c]] }
 0x19d   : > { %v977_v45 = vstv %s2765_s15  ;;  %s2976_s15 = sld [smem:[#allocation3 + $0x4f]] }
 0x19f   : > { %1331 = vrot.lane.b32.xlu1 %v2259_v35, %s3386_s24  ;;  %1321 = vrot.lane.b32.xlu0 %v2259_v35, %s3387_s25  ;;  %s2809_s24 = sld [smem:[#allocation3 + $0x3d]] }
 0x1a0   : > { %s2822_s25 = sld [smem:[#allocation3 + $0x3e]] }
 0x1a3   : > { %1351 = vrot.lane.b32.xlu1 %v2259_v35, %s3388_s28  ;;  %1341 = vrot.lane.b32.xlu0 %v2259_v35, %s3389_s29  ;;  %s2850_s28 = sld [smem:[#allocation3 + $0x41]] }
 0x1a4   : > { %s2858_s29 = sld [smem:[#allocation3 + $0x42]] }
 0x1a7   : > { %1371 = vrot.lane.b32.xlu1 %v2259_v35, %s1750_s22  ;;  %1361 = vrot.lane.b32.xlu0 %v2259_v35, %s1749_s21  ;;  %s1543_s21 = sld [smem:[#allocation3 + $0x2e]]  ;;  %s3390_s22 = smov 26  }
 0x1ab   : > { %1391 = vrot.lane.b32.xlu1 %v2259_v35, %s3390_s22  ;;  %1381 = vrot.lane.b32.xlu0 %v2259_v35, %s3391_s4  ;;  %v882_v35 = vsel %vm3305_vm1, %v879_v18, %v880_v24  ;;  %vm3311_vm1 = vcmask 211968   ;;  %s2886_s22 = sld [smem:[#allocation3 + $0x45]] }
 0x1ac   : > { %v884_v39 = vsel %vm3312_vm3, %v882_v35, 0.0  ;;  %v906_v46 = vsel %vm3311_vm1, %v903_v31, %v904_v48  ;;  %vm3395_vm1 = vcmask 1039360   ;;  %vm3397_vm3 = vmand %vm3392_vm11, %vm1958_vm0  ;;  %s2894_s4 = sld [smem:[#allocation3 + $0x46]] }
 0x1ad   : > { %v885_v38 = vstv %s1543_s21  ;;  %v908_v56 = vsel %vm3310_vm7, %v906_v46, 0.0  ;;  %vm3394_vm7 = vcmask 1031168   ;;  %s2876_s21 = sld [smem:[#allocation3 + $0x44]] }
 0x1ae   : > { %v886_v44 = vmul.f32 %v885_v38, %v884_v39  ;;  %v910_v62 = vmul.f32 %v909_v53, %v908_v56 }
 0x1b0   : > { %v887_v51 = vadd.f32 %v886_v44, %v875_v41  ;;  %v967_v44 = vstv %s2753_s14  ;;  %s2966_s14 = sld [smem:[#allocation3 + $0x4e]] }
 0x1b2   : > { %v899_v61 = vadd.f32 %v898_v59, %v887_v51 }
 0x1b4   : > { %v911_v5 = vadd.f32 %v910_v62, %v899_v61 }
 0x1b6   : > { %v917_v19 = vadd.f32 %v916_v11, %v911_v5  ;;  %v1207_v34 = vstv %s2966_s14 }
 0x1c1   : > { %v932_v0 = vpop.permute.xlu1 %931  ;;  %v922_v4 = vpop.permute.xlu0 %921 }
 0x1c2   : > { %v933_v7 = vrot.slane %v932_v0, 1  ;;  %v923_v8 = vrot.slane %v922_v4, 1 }
 0x1c4   : > { %v934_v10 = vsel %vm3394_vm7, %v932_v0, %v933_v7  ;;  %v924_v12 = vsel %vm3395_vm1, %v922_v4, %v923_v8  ;;  %vm3398_vm7 = vcmask 1014784   ;;  %vm3399_vm1 = vcmask 1022976  }
 0x1c5   : > { %v936_v14 = vsel %vm3396_vm8, %v934_v10, 0.0  ;;  %v926_v15 = vsel %vm3397_vm3, %v924_v12, 0.0  ;;  %v952_v16 = vpop.permute.xlu1 %951  ;;  %v942_v18 = vpop.permute.xlu0 %941  ;;  %vm3400_vm3 = vmand %vm3392_vm11, %vm1988_vm10  ;;  %v987_v0 = vstv %s2770_s16  ;;  %v997_v4 = vstv %s2783_s20  ;;  %s2984_s16 = sld [smem:[#allocation3 + $0x50]] }
 0x1c6   : > { %v928_v42 = vmul.f32 %v927_v9, %v926_v15  ;;  %v953_v43 = vrot.slane %v952_v16, 1  ;;  %v943_v21 = vrot.slane %v942_v18, 1  ;;  %v938_v24 = vmul.f32 %v937_v13, %v936_v14  ;;  %vm3401_vm8 = vmand %vm3392_vm11, %vm3352_vm6  ;;  %s2994_s20 = sld [smem:[#allocation3 + $0x51]] }
 0x1c7   : > { %v1007_v14 = vstv %s2785_s17  ;;  %s3002_s17 = sld [smem:[#allocation3 + $0x52]] }
 0x1c8   : > { %v929_v25 = vadd.f32 %v928_v42, %v917_v19  ;;  %v954_v26 = vsel %vm3398_vm7, %v952_v16, %v953_v43  ;;  %v944_v27 = vsel %vm3399_vm1, %v942_v18, %v943_v21  ;;  %vm3402_vm7 = vcmask 998400  }
 0x1c9   : > { %v956_v35 = vsel %vm3400_vm3, %v954_v26, 0.0  ;;  %v946_v29 = vsel %vm3401_vm8, %v944_v27, 0.0  ;;  %v972_v30 = vpop.permute.xlu1 %971  ;;  %v962_v31 = vpop.permute.xlu0 %961  ;;  %vm3403_vm1 = vcmask 1006592   ;;  %vm3404_vm3 = vmand %vm3392_vm11, %vm2033_vm12  ;;  %v1017_v42 = vstv %s2791_s18  ;;  %s3012_s18 = sld [smem:[#allocation3 + $0x53]] }
 0x1ca   : > { %v939_v32 = vadd.f32 %v938_v24, %v929_v25  ;;  %v948_v36 = vmul.f32 %v947_v23, %v946_v29  ;;  %v973_v38 = vrot.slane %v972_v30, 1  ;;  %v963_v39 = vrot.slane %v962_v31, 1  ;;  %vm3405_vm8 = vmand %vm3392_vm11, %vm2024_vm5 }
 0x1cb   : > { %v958_v40 = vmul.f32 %v957_v28, %v956_v35  ;;  %vm3408_vm11 = vnez %v3342_v37  ;;  %v1027_v35 = vstv %s2803_s19  ;;  %v1067_v37 = vstv %s2840_s27  ;;  %s3020_s19 = sld [smem:[#allocation3 + $0x54]] }
 0x1cc   : > { %v949_v48 = vadd.f32 %v948_v36, %v939_v32  ;;  %v974_v41 = vsel %vm3402_vm7, %v972_v30, %v973_v38  ;;  %v964_v46 = vsel %vm3403_vm1, %v962_v31, %v963_v39  ;;  %vm3406_vm7 = vcmask 908288   ;;  %s3056_s27 = sld [smem:[#allocation3 + $0x58]] }
 0x1cd   : > { %v992_v47 = vpop.permute.xlu1 %991  ;;  %v982_v50 = vpop.permute.xlu0 %981  ;;  %v976_v51 = vsel %vm3404_vm3, %v974_v41, 0.0  ;;  %v966_v56 = vsel %vm3405_vm8, %v964_v46, 0.0  ;;  %vm3407_vm1 = vcmask 916480   ;;  %vm3409_vm3 = vmand %vm3408_vm11, %vm1958_vm0  ;;  %v1037_v36 = vstv %s2809_s24  ;;  %s3030_s24 = sld [smem:[#allocation3 + $0x55]] }
 0x1ce   : > { %v959_v53 = vadd.f32 %v958_v40, %v949_v48  ;;  %v993_v59 = vrot.slane %v992_v47, 1  ;;  %v968_v61 = vmul.f32 %v967_v44, %v966_v56  ;;  %v983_v62 = vrot.slane %v982_v50, 1  ;;  %vm3410_vm8 = vmand %vm3408_vm11, %vm1950_vm14 }
 0x1cf   : > { %v978_v2 = vmul.f32 %v977_v45, %v976_v51 }
 0x1d0   : > { %v994_v63 = vsel %vm3406_vm7, %v992_v47, %v993_v59  ;;  %v969_v3 = vadd.f32 %v968_v61, %v959_v53  ;;  %v984_v5 = vsel %vm3407_vm1, %v982_v50, %v983_v62  ;;  %vm3411_vm7 = vcmask 891904  }
 0x1d1   : > { %v1012_v54 = vpop.permute.xlu1 %1011  ;;  %v1002_v7 = vpop.permute.xlu0 %1001  ;;  %v996_v8 = vsel %vm3409_vm3, %v994_v63, 0.0  ;;  %v986_v9 = vsel %vm3410_vm8, %v984_v5, 0.0  ;;  %vm3412_vm1 = vcmask 900096   ;;  %vm3413_vm3 = vmand %vm3408_vm11, %vm1954_vm15  ;;  %v1047_v47 = vstv %s2822_s25  ;;  %s3038_s25 = sld [smem:[#allocation3 + $0x56]] }
 0x1d2   : > { %v1013_v10 = vrot.slane %v1012_v54, 1  ;;  %v1003_v11 = vrot.slane %v1002_v7, 1  ;;  %v979_v12 = vadd.f32 %v978_v2, %v969_v3  ;;  %v988_v13 = vmul.f32 %v987_v0, %v986_v9  ;;  %vm3414_vm8 = vmand %vm3408_vm11, %vm3352_vm6 }
 0x1d3   : > { %v998_v18 = vmul.f32 %v997_v4, %v996_v8  ;;  %v1057_v59 = vstv %s2832_s26  ;;  %s3048_s26 = sld [smem:[#allocation3 + $0x57]] }
 0x1d4   : > { %v1014_v15 = vsel %vm3411_vm7, %v1012_v54, %v1013_v10  ;;  %v1004_v16 = vsel %vm3412_vm1, %v1002_v7, %v1003_v11  ;;  %v989_v19 = vadd.f32 %v988_v13, %v979_v12  ;;  %vm3415_vm7 = vcmask 875520  }
 0x1d5   : > { %v1006_v43 = vsel %vm3413_vm3, %v1004_v16, 0.0  ;;  %v1032_v21 = vpop.permute.xlu1 %1031  ;;  %v1022_v23 = vpop.permute.xlu0 %1021  ;;  %v1016_v24 = vsel %vm3414_vm8, %v1014_v15, 0.0  ;;  %vm3416_vm1 = vcmask 883712   ;;  %vm3417_vm3 = vmand %vm3408_vm11, %vm1988_vm10  ;;  %v1077_v10 = vstv %s2850_s28  ;;  %s3066_s28 = sld [smem:[#allocation3 + $0x59]] }
 0x1d6   : > { %v1008_v25 = vmul.f32 %v1007_v14, %v1006_v43  ;;  %v1033_v26 = vrot.slane %v1032_v21, 1  ;;  %v1023_v27 = vrot.slane %v1022_v23, 1  ;;  %v999_v28 = vadd.f32 %v998_v18, %v989_v19  ;;  %vm3418_vm8 = vmand %vm3408_vm11, %vm2024_vm5 }
 0x1d7   : > { %v1018_v31 = vmul.f32 %v1017_v42, %v1016_v24  ;;  %v1087_v42 = vstv %s2858_s29  ;;  %s3074_s29 = sld [smem:[#allocation3 + $0x5a]] }
 0x1d8   : > { %v1034_v29 = vsel %vm3415_vm7, %v1032_v21, %v1033_v26  ;;  %v1024_v30 = vsel %vm3416_vm1, %v1022_v23, %v1023_v27  ;;  %v1009_v32 = vadd.f32 %v1008_v25, %v999_v28  ;;  %vm3419_vm7 = vcmask 785408  }
 0x1d9   : > { %v1026_v38 = vsel %vm3417_vm3, %v1024_v30, 0.0  ;;  %v1052_v39 = vpop.permute.xlu1 %1051  ;;  %v1042_v40 = vpop.permute.xlu0 %1041  ;;  %v1036_v48 = vsel %vm3418_vm8, %v1034_v29, 0.0  ;;  %vm3420_vm1 = vcmask 867328   ;;  %vm3421_vm3 = vmand %vm3408_vm11, %vm2033_vm12  ;;  %vm3423_vm11 = vcmask 769024  }
 0x1da   : > { %v1028_v41 = vmul.f32 %v1027_v35, %v1026_v38  ;;  %v1053_v44 = vrot.slane %v1052_v39, 1  ;;  %v1043_v45 = vrot.slane %v1042_v40, 1  ;;  %v1019_v46 = vadd.f32 %v1018_v31, %v1009_v32  ;;  %vm3422_vm8 = vmand %vm2152_vm4, %vm1950_vm14 }
 0x1db   : > { %v1038_v53 = vmul.f32 %v1037_v36, %v1036_v48  ;;  %v1097_v25 = vstv %s2868_s30  ;;  %v1107_v36 = vstv %s2876_s21  ;;  %s3084_s30 = sld [smem:[#allocation3 + $0x5b]] }
 0x1dc   : > { %v1054_v50 = vsel %vm3419_vm7, %v1052_v39, %v1053_v44  ;;  %v1044_v51 = vsel %vm3420_vm1, %v1042_v40, %v1043_v45  ;;  %v1029_v56 = vadd.f32 %v1028_v41, %v1019_v46  ;;  %vm3424_vm7 = vcmask 777216   ;;  %vm3425_vm1 = vmand %vm2152_vm4, %vm1958_vm0  ;;  %s3092_s21 = sld [smem:[#allocation3 + $0x5c]] }
 0x1dd   : > { %v1046_v61 = vsel %vm3421_vm3, %v1044_v51, 0.0  ;;  %v1072_v62 = vpop.permute.xlu1 %1071  ;;  %v1062_v63 = vpop.permute.xlu0 %1061  ;;  %v1056_v0 = vsel %vm3422_vm8, %v1054_v50, 0.0  ;;  %vm3426_vm3 = vmand %vm2152_vm4, %vm1954_vm15  ;;  %vm3427_vm8 = vcmask 752640   ;;  %v1117_v41 = vstv %s2886_s22  ;;  %s3102_s22 = sld [smem:[#allocation3 + $0x5d]] }
 0x1de   : > { %v1048_v2 = vmul.f32 %v1047_v47, %v1046_v61  ;;  %v1073_v3 = vrot.slane %v1072_v62, 1  ;;  %v1063_v4 = vrot.slane %v1062_v63, 1  ;;  %v1039_v5 = vadd.f32 %v1038_v53, %v1029_v56 }
 0x1df   : > { %v1058_v8 = vmul.f32 %v1057_v59, %v1056_v0  ;;  %v1127_v59 = vstv %s2894_s4  ;;  %s3110_s4 = sld [smem:[#allocation3 + $0x5e]] }
 0x1e0   : > { %v1074_v54 = vsel %vm3423_vm11, %v1072_v62, %v1073_v3  ;;  %v1064_v7 = vsel %vm3424_vm7, %v1062_v63, %v1063_v4  ;;  %v1049_v9 = vadd.f32 %v1048_v2, %v1039_v5  ;;  %vm3428_vm11 = vcmask 760832   ;;  %vm3429_vm7 = vmand %vm2152_vm4, %vm3352_vm6 }
 0x1e1   : > { %v1066_v11 = vsel %vm3425_vm1, %v1064_v7, 0.0  ;;  %v1092_v12 = vpop.permute.xlu1 %1091  ;;  %v1082_v13 = vpop.permute.xlu0 %1081  ;;  %v1076_v14 = vsel %vm3426_vm3, %v1074_v54, 0.0  ;;  %vm3430_vm1 = vmand %vm2152_vm4, %vm1988_vm10  ;;  %vm3431_vm3 = vcmask 736256   ;;  %v1137_v2 = vstv %s2904_s5  ;;  %s3120_s5 = sld [smem:[#allocation3 + $0x5f]] }
 0x1e2   : > { %v1068_v15 = vmul.f32 %v1067_v37, %v1066_v11  ;;  %v1093_v16 = vrot.slane %v1092_v12, 1  ;;  %v1083_v18 = vrot.slane %v1082_v13, 1  ;;  %v1059_v19 = vadd.f32 %v1058_v8, %v1049_v9 }
 0x1e3   : > { %v1078_v23 = vmul.f32 %v1077_v10, %v1076_v14  ;;  %v1147_v9 = vstv %s2912_s6  ;;  %v1157_v14 = vstv %s2922_s7  ;;  %v1347_v60 = vstv %s3092_s21  ;;  %s3128_s6 = sld [smem:[#allocation3 + $0x60]] }
 0x1e4   : > { %v1094_v43 = vsel %vm3427_vm8, %v1092_v12, %v1093_v16  ;;  %v1084_v21 = vsel %vm3428_vm11, %v1082_v13, %v1083_v18  ;;  %v1069_v24 = vadd.f32 %v1068_v15, %v1059_v19  ;;  %vm3432_vm8 = vcmask 744448   ;;  %vm3433_vm11 = vmand %vm2152_vm4, %vm2024_vm5  ;;  %s1594_s7 = sld [smem:[#allocation3 + $0x61]] }
 0x1e5   : > { %v1086_v26 = vsel %vm3429_vm7, %v1084_v21, 0.0  ;;  %v1112_v27 = vpop.permute.xlu1 %1111  ;;  %v1102_v28 = vpop.permute.xlu0 %1101  ;;  %v1096_v35 = vsel %vm3430_vm1, %v1094_v43, 0.0  ;;  %vm3434_vm7 = vmand %vm2152_vm4, %vm2033_vm12  ;;  %vm3435_vm1 = vcmask 646144  }
 0x1e6   : > { %v1088_v29 = vmul.f32 %v1087_v42, %v1086_v26  ;;  %v1113_v30 = vrot.slane %v1112_v27, 1  ;;  %v1103_v31 = vrot.slane %v1102_v28, 1  ;;  %v1079_v32 = vadd.f32 %v1078_v23, %v1069_v24  ;;  %vm3437_vm4 = vmand %vm2255_vm13, %vm1950_vm14 }
 0x1e7   : > { %v1098_v40 = vmul.f32 %v1097_v25, %v1096_v35  ;;  %v1167_v24 = vstv %s2930_s8  ;;  %v1177_v35 = vstv %s2940_s9  ;;  %s3492_s8 = sshll.u32 %s3494_s13, 3 }
 0x1e8   : > { %v1114_v38 = vsel %vm3431_vm3, %v1112_v27, %v1113_v30  ;;  %v1104_v39 = vsel %vm3432_vm8, %v1102_v28, %v1103_v31  ;;  %v1089_v48 = vadd.f32 %v1088_v29, %v1079_v32  ;;  %vm3436_vm3 = vcmask 654336   ;;  %vm3438_vm8 = vmand %vm2255_vm13, %vm1958_vm0 }
 0x1e9   : > { %v1106_v44 = vsel %vm3433_vm11, %v1104_v39, 0.0  ;;  %v1132_v45 = vpop.permute.xlu1 %1131  ;;  %v1122_v46 = vpop.permute.xlu0 %1121  ;;  %v1116_v47 = vsel %vm3434_vm7, %v1114_v38, 0.0  ;;  %vm3439_vm11 = vcmask 629760   ;;  %vm3440_vm7 = vcmask 637952  }
 0x1ea   : > { %v1108_v50 = vmul.f32 %v1107_v36, %v1106_v44  ;;  %v1133_v51 = vrot.slane %v1132_v45, 1  ;;  %v1123_v53 = vrot.slane %v1122_v46, 1  ;;  %v1099_v56 = vadd.f32 %v1098_v40, %v1089_v48 }
 0x1eb   : > { %v1118_v63 = vmul.f32 %v1117_v41, %v1116_v47  ;;  %v1187_v48 = vstv %s2948_s10  ;;  %v1197_v47 = vstv %s2958_s11  ;;  %v1397_v6 = vstv %s1594_s7  ;;  %s184_s11 = scalar_lea.vmem %s3184_s3, %s3492_s8 }
 0x1ec   : > { %v1134_v61 = vsel %vm3435_vm1, %v1132_v45, %v1133_v51  ;;  %v1124_v62 = vsel %vm3436_vm3, %v1122_v46, %v1123_v53  ;;  %v1109_v0 = vadd.f32 %v1108_v50, %v1099_v56  ;;  %vm3441_vm1 = vmand %vm2255_vm13, %vm1954_vm15 }
 0x1ed   : > { %v1126_v33 = vsel %vm3437_vm4, %v1124_v62, 0.0  ;;  %v1152_v3 = vpop.permute.xlu1 %1151  ;;  %v1142_v4 = vpop.permute.xlu0 %1141  ;;  %v1136_v5 = vsel %vm3438_vm8, %v1134_v61, 0.0  ;;  %vm3442_vm3 = vmand %vm2255_vm13, %vm3352_vm6  ;;  %vm3443_vm4 = vcmask 613376   ;;  %vm3444_vm8 = vcmask 621568  }
 0x1ee   : > { %v1128_v37 = vmul.f32 %v1127_v59, %v1126_v33  ;;  %v1153_v54 = vrot.slane %v1152_v3, 1  ;;  %v1143_v7 = vrot.slane %v1142_v4, 1  ;;  %v1119_v8 = vadd.f32 %v1118_v63, %v1109_v0 }
 0x1ef   : > { %v1138_v12 = vmul.f32 %v1137_v2, %v1136_v5 }
 0x1f0   : > { %v1154_v10 = vsel %vm3439_vm11, %v1152_v3, %v1153_v54  ;;  %v1144_v11 = vsel %vm3440_vm7, %v1142_v4, %v1143_v7  ;;  %v1129_v13 = vadd.f32 %v1128_v37, %v1119_v8  ;;  %vm3445_vm11 = vmand %vm2255_vm13, %vm1988_vm10  ;;  %v1217_v4 = vstv %s2976_s15 }
 0x1f1   : > { %v1146_v15 = vsel %vm3441_vm1, %v1144_v11, 0.0  ;;  %v1172_v16 = vpop.permute.xlu1 %1171  ;;  %v1162_v18 = vpop.permute.xlu0 %1161  ;;  %v1156_v19 = vsel %vm3442_vm3, %v1154_v10, 0.0  ;;  %vm3446_vm7 = vmand %vm2255_vm13, %vm2024_vm5  ;;  %vm3447_vm1 = vcmask 523264   ;;  %vm3448_vm3 = vcmask 605184  }
 0x1f2   : > { %v1148_v42 = vmul.f32 %v1147_v9, %v1146_v15  ;;  %v1173_v43 = vrot.slane %v1172_v16, 1  ;;  %v1163_v21 = vrot.slane %v1162_v18, 1  ;;  %v1139_v23 = vadd.f32 %v1138_v12, %v1129_v13 }
 0x1f3   : > { %v1158_v27 = vmul.f32 %v1157_v14, %v1156_v19  ;;  %v1227_v12 = vstv %s2984_s16 }
 0x1f4   : > { %v1174_v25 = vsel %vm3443_vm4, %v1172_v16, %v1173_v43  ;;  %v1164_v26 = vsel %vm3444_vm8, %v1162_v18, %v1163_v21  ;;  %v1149_v28 = vadd.f32 %v1148_v42, %v1139_v23  ;;  %vm3449_vm4 = vmand %vm2255_vm13, %vm2033_vm12  ;;  %vm3450_vm8 = vnez %v3357_v49 }
 0x1f5   : > { %v1166_v29 = vsel %vm3445_vm11, %v1164_v26, 0.0  ;;  %v1192_v30 = vpop.permute.xlu1 %1191  ;;  %v1182_v31 = vpop.permute.xlu0 %1181  ;;  %v1176_v32 = vsel %vm3446_vm7, %v1174_v25, 0.0  ;;  %vm3451_vm11 = vmand %vm3450_vm8, %vm1950_vm14  ;;  %vm3452_vm13 = vcmask 506880   ;;  %vm3453_vm7 = vcmask 515072  }
 0x1f6   : > { %v1168_v36 = vmul.f32 %v1167_v24, %v1166_v29  ;;  %v1193_v38 = vrot.slane %v1192_v30, 1  ;;  %v1183_v39 = vrot.slane %v1182_v31, 1  ;;  %v1159_v40 = vadd.f32 %v1158_v27, %v1149_v28 }
 0x1f7   : > { %v1178_v45 = vmul.f32 %v1177_v35, %v1176_v32  ;;  %v1237_v18 = vstv %s2994_s20  ;;  %v1247_v27 = vstv %s3002_s17 }
 0x1f8   : > { %v1194_v41 = vsel %vm3447_vm1, %v1192_v30, %v1193_v38  ;;  %v1184_v44 = vsel %vm3448_vm3, %v1182_v31, %v1183_v39  ;;  %v1169_v46 = vadd.f32 %v1168_v36, %v1159_v40  ;;  %vm3454_vm1 = vmand %vm3450_vm8, %vm1958_vm0  ;;  %v1257_v31 = vstv %s3012_s18 }
 0x1f9   : > { %v1186_v50 = vsel %vm3449_vm4, %v1184_v44, 0.0  ;;  %v1212_v51 = vpop.permute.xlu1 %1211  ;;  %v1202_v53 = vpop.permute.xlu0 %1201  ;;  %v1196_v56 = vsel %vm3451_vm11, %v1194_v41, 0.0  ;;  %vm3455_vm3 = vmand %vm3450_vm8, %vm1954_vm15  ;;  %vm3456_vm4 = vcmask 490496   ;;  %vm3457_vm11 = vcmask 498688  }
 0x1fa   : > { %v1188_v59 = vmul.f32 %v1187_v48, %v1186_v50  ;;  %v1213_v61 = vrot.slane %v1212_v51, 1  ;;  %v1203_v62 = vrot.slane %v1202_v53, 1  ;;  %v1179_v63 = vadd.f32 %v1178_v45, %v1169_v46 }
 0x1fb   : > { %v1198_v33 = vmul.f32 %v1197_v47, %v1196_v56  ;;  %v1267_v45 = vstv %s3020_s19 }
 0x1fc   : > { %v1214_v0 = vsel %vm3452_vm13, %v1212_v51, %v1213_v61  ;;  %v1204_v2 = vsel %vm3453_vm7, %v1202_v53, %v1203_v62  ;;  %v1189_v3 = vadd.f32 %v1188_v59, %v1179_v63  ;;  %vm3458_vm13 = vmand %vm3450_vm8, %vm3352_vm6  ;;  %v1277_v53 = vstv %s3030_s24 }
 0x1fd   : > { %v1206_v5 = vsel %vm3454_vm1, %v1204_v2, 0.0  ;;  %v1232_v37 = vpop.permute.xlu1 %1231  ;;  %v1222_v54 = vpop.permute.xlu0 %1221  ;;  %v1216_v7 = vsel %vm3455_vm3, %v1214_v0, 0.0  ;;  %vm3459_vm7 = vmand %vm3450_vm8, %vm1988_vm10  ;;  %vm3460_vm1 = vcmask 474112   ;;  %vm3461_vm3 = vcmask 482304  }
 0x1fe   : > { %v1208_v8 = vmul.f32 %v1207_v34, %v1206_v5  ;;  %v1233_v9 = vrot.slane %v1232_v37, 1  ;;  %v1223_v10 = vrot.slane %v1222_v54, 1  ;;  %v1199_v11 = vadd.f32 %v1198_v33, %v1189_v3 }
 0x1ff   : > { %v1218_v15 = vmul.f32 %v1217_v4, %v1216_v7  ;;  %v1287_v2 = vstv %s3038_s25 }
 0x200   : > { %v1234_v13 = vsel %vm3456_vm4, %v1232_v37, %v1233_v9  ;;  %v1224_v14 = vsel %vm3457_vm11, %v1222_v54, %v1223_v10  ;;  %v1209_v16 = vadd.f32 %v1208_v8, %v1199_v11  ;;  %vm3462_vm4 = vmand %vm3450_vm8, %vm2024_vm5  ;;  %v1297_v37 = vstv %s3048_s26 }
 0x201   : > { %v1226_v19 = vsel %vm3458_vm13, %v1224_v14, 0.0  ;;  %v1252_v42 = vpop.permute.xlu1 %1251  ;;  %v1242_v43 = vpop.permute.xlu0 %1241  ;;  %v1236_v21 = vsel %vm3459_vm7, %v1234_v13, 0.0  ;;  %vm3463_vm11 = vmand %vm3450_vm8, %vm2033_vm12  ;;  %vm3464_vm13 = vcmask 384000   ;;  %vm3465_vm7 = vcmask 392192  }
 0x202   : > { %v1228_v23 = vmul.f32 %v1227_v12, %v1226_v19  ;;  %v1253_v24 = vrot.slane %v1252_v42, 1  ;;  %v1243_v25 = vrot.slane %v1242_v43, 1  ;;  %v1219_v26 = vadd.f32 %v1218_v15, %v1209_v16  ;;  %vm3466_vm8 = vmand %vm2521_vm9, %vm1950_vm14 }
 0x203   : > { %v1238_v29 = vmul.f32 %v1237_v18, %v1236_v21  ;;  %v1307_v14 = vstv %s3056_s27 }
 0x204   : > { %v1254_v28 = vsel %vm3460_vm1, %v1252_v42, %v1253_v24  ;;  %v1244_v35 = vsel %vm3461_vm3, %v1242_v43, %v1243_v25  ;;  %v1229_v30 = vadd.f32 %v1228_v23, %v1219_v26  ;;  %vm3467_vm1 = vmand %vm2521_vm9, %vm1958_vm0  ;;  %vm3468_vm3 = vcmask 367616  }
 0x205   : > { %v1246_v32 = vsel %vm3462_vm4, %v1244_v35, 0.0  ;;  %v1272_v36 = vpop.permute.xlu1 %1271  ;;  %v1262_v38 = vpop.permute.xlu0 %1261  ;;  %v1256_v39 = vsel %vm3463_vm11, %v1254_v28, 0.0  ;;  %vm3469_vm4 = vcmask 375808   ;;  %vm3470_vm11 = vmand %vm2521_vm9, %vm1954_vm15  ;;  %v1317_v42 = vstv %s3066_s28 }
 0x206   : > { %v1248_v40 = vmul.f32 %v1247_v27, %v1246_v32  ;;  %v1273_v48 = vrot.slane %v1272_v36, 1  ;;  %v1263_v41 = vrot.slane %v1262_v38, 1  ;;  %v1239_v44 = vadd.f32 %v1238_v29, %v1229_v30 }
 0x207   : > { %v1258_v50 = vmul.f32 %v1257_v31, %v1256_v39  ;;  %v1327_v35 = vstv %s3074_s29 }
 0x208   : > { %v1274_v46 = vsel %vm3464_vm13, %v1272_v36, %v1273_v48  ;;  %v1264_v47 = vsel %vm3465_vm7, %v1262_v38, %v1263_v41  ;;  %v1249_v51 = vadd.f32 %v1248_v40, %v1239_v44  ;;  %vm3471_vm13 = vmand %vm2521_vm9, %vm3352_vm6  ;;  %vm3472_vm7 = vcmask 351232  }
 0x209   : > { %v1266_v49 = vsel %vm3466_vm8, %v1264_v47, 0.0  ;;  %v1292_v56 = vpop.permute.xlu1 %1291  ;;  %v1282_v59 = vpop.permute.xlu0 %1281  ;;  %v1276_v61 = vsel %vm3467_vm1, %v1274_v46, 0.0  ;;  %vm3473_vm8 = vcmask 359424   ;;  %vm3474_vm1 = vmand %vm2521_vm9, %vm1988_vm10  ;;  %v1337_v36 = vstv %s3084_s30 }
 0x20a   : > { %v1268_v62 = vmul.f32 %v1267_v45, %v1266_v49  ;;  %v1293_v63 = vrot.slane %v1292_v56, 1  ;;  %v1283_v34 = vrot.slane %v1282_v59, 1  ;;  %v1259_v0 = vadd.f32 %v1258_v50, %v1249_v51 }
 0x20b   : > { %v1278_v4 = vmul.f32 %v1277_v53, %v1276_v61  ;;  %v1357_v49 = vstv %s3102_s22 }
 0x20c   : > { %v1294_v33 = vsel %vm3468_vm3, %v1292_v56, %v1293_v63  ;;  %v1284_v3 = vsel %vm3469_vm4, %v1282_v59, %v1283_v34  ;;  %v1269_v5 = vadd.f32 %v1268_v62, %v1259_v0  ;;  %vm3475_vm3 = vmand %vm2521_vm9, %vm2024_vm5  ;;  %vm3476_vm4 = vcmask 261120  }
 0x20d   : > { %v1286_v54 = vsel %vm3470_vm11, %v1284_v3, 0.0  ;;  %v1312_v7 = vpop.permute.xlu1 %1311  ;;  %v1302_v8 = vpop.permute.xlu0 %1301  ;;  %v1296_v9 = vsel %vm3471_vm13, %v1294_v33, 0.0  ;;  %vm3477_vm11 = vcmask 343040   ;;  %vm3478_vm13 = vmand %vm2521_vm9, %vm2033_vm12  ;;  %vm3480_vm9 = vcmask 244736  }
 0x20e   : > { %v1288_v10 = vmul.f32 %v1287_v2, %v1286_v54  ;;  %v1313_v11 = vrot.slane %v1312_v7, 1  ;;  %v1303_v12 = vrot.slane %v1302_v8, 1  ;;  %v1279_v13 = vadd.f32 %v1278_v4, %v1269_v5 }
 0x20f   : > { %v1298_v18 = vmul.f32 %v1297_v37, %v1296_v9  ;;  %v1367_v2 = vstv %s3110_s4  ;;  %v1377_v5 = vstv %s3120_s5 }
 0x210   : > { %v1314_v15 = vsel %vm3472_vm7, %v1312_v7, %v1313_v11  ;;  %v1304_v16 = vsel %vm3473_vm8, %v1302_v8, %v1303_v12  ;;  %v1289_v19 = vadd.f32 %v1288_v10, %v1279_v13  ;;  %vm3479_vm7 = vmand %vm2634_vm2, %vm1950_vm14  ;;  %vm3481_vm8 = vcmask 252928  }
 0x211   : > { %v1306_v43 = vsel %vm3474_vm1, %v1304_v16, 0.0  ;;  %v1332_v21 = vpop.permute.xlu1 %1331  ;;  %v1322_v23 = vpop.permute.xlu0 %1321  ;;  %v1316_v24 = vsel %vm3475_vm3, %v1314_v15, 0.0  ;;  %vm3482_vm14 = vmand %vm2634_vm2, %vm1958_vm0  ;;  %vm3484_vm3 = vcmask 228352   ;;  %v1387_v12 = vstv %s3128_s6 }
 0x212   : > { %v1308_v25 = vmul.f32 %v1307_v14, %v1306_v43  ;;  %v1333_v26 = vrot.slane %v1332_v21, 1  ;;  %v1323_v27 = vrot.slane %v1322_v23, 1  ;;  %v1299_v28 = vadd.f32 %v1298_v18, %v1289_v19  ;;  %vm3483_vm1 = vmand %vm2634_vm2, %vm1954_vm15 }
 0x213   : > { %v1318_v31 = vmul.f32 %v1317_v42, %v1316_v24  ;;  %vm3486_vm15 = vmand %vm2634_vm2, %vm3352_vm6 }
 0x214   : > { %v1334_v29 = vsel %vm3476_vm4, %v1332_v21, %v1333_v26  ;;  %v1324_v30 = vsel %vm3477_vm11, %v1322_v23, %v1323_v27  ;;  %v1309_v32 = vadd.f32 %v1308_v25, %v1299_v28  ;;  %vm3485_vm4 = vcmask 236544   ;;  %vm3487_vm0 = vmand %vm2634_vm2, %vm1988_vm10 }
 0x215   : > { %v1326_v38 = vsel %vm3478_vm13, %v1324_v30, 0.0  ;;  %v1352_v39 = vpop.permute.xlu1 %1351  ;;  %v1342_v40 = vpop.permute.xlu0 %1341  ;;  %v1336_v48 = vsel %vm3479_vm7, %v1334_v29, 0.0  ;;  %vm3488_vm11 = vcmask 211968   ;;  %vm3489_vm13 = vcmask 220160   ;;  %vm3490_vm6 = vmand %vm2634_vm2, %vm2024_vm5  ;;  %v1674_v29 = vld [vmem:[%s1803_s23] sm:$0xff] }
 0x216   : > { %v1328_v41 = vmul.f32 %v1327_v35, %v1326_v38  ;;  %v1353_v44 = vrot.slane %v1352_v39, 1  ;;  %v1343_v45 = vrot.slane %v1342_v40, 1  ;;  %v1319_v46 = vadd.f32 %v1318_v31, %v1309_v32  ;;  %vm3491_vm10 = vmand %vm2634_vm2, %vm2033_vm12 }
 0x217   : > { %v1338_v51 = vmul.f32 %v1337_v36, %v1336_v48  ;;  %v1409_v26 = vsub.s32 0, %v1808_v17 }
 0x218   : > { %v1354_v47 = vsel %vm3480_vm9, %v1352_v39, %v1353_v44  ;;  %v1344_v50 = vsel %vm3481_vm8, %v1342_v40, %v1343_v45  ;;  %v1329_v53 = vadd.f32 %v1328_v41, %v1319_v46 }
 0x219   : > { %v1346_v55 = vsel %vm3482_vm14, %v1344_v50, 0.0  ;;  %v1372_v56 = vpop.permute.xlu1 %1371  ;;  %v1362_v59 = vpop.permute.xlu0 %1361  ;;  %v1356_v61 = vsel %vm3483_vm1, %v1354_v47, 0.0 }
 0x21a   : > { %v1348_v62 = vmul.f32 %v1347_v60, %v1346_v55  ;;  %v1373_v63 = vrot.slane %v1372_v56, 1  ;;  %v1363_v34 = vrot.slane %v1362_v59, 1  ;;  %v1339_v0 = vadd.f32 %v1338_v51, %v1329_v53 }
 0x21b   : > { %v1358_v3 = vmul.f32 %v1357_v49, %v1356_v61 }
 0x21c   : > { %v1374_v33 = vsel %vm3484_vm3, %v1372_v56, %v1373_v63  ;;  %v1364_v58 = vsel %vm3485_vm4, %v1362_v59, %v1363_v34  ;;  %v1349_v4 = vadd.f32 %v1348_v62, %v1339_v0 }
 0x21d   : > { %v1366_v57 = vsel %vm3486_vm15, %v1364_v58, 0.0  ;;  %v1392_v37 = vpop.permute.xlu1 %1391  ;;  %v1382_v54 = vpop.permute.xlu0 %1381  ;;  %v1376_v7 = vsel %vm3487_vm0, %v1374_v33, 0.0 }
 0x21e   : > { %v1368_v8 = vmul.f32 %v1367_v2, %v1366_v57  ;;  %v1393_v9 = vrot.slane %v1392_v37, 1  ;;  %v1383_v10 = vrot.slane %v1382_v54, 1  ;;  %v1359_v11 = vadd.f32 %v1358_v3, %v1349_v4 }
 0x21f   : > { %v1378_v1 = vmul.f32 %v1377_v5, %v1376_v7 }
 0x220   : > { %v1394_v13 = vsel %vm3488_vm11, %v1392_v37, %v1393_v9  ;;  %v1384_v14 = vsel %vm3489_vm13, %v1382_v54, %v1383_v10  ;;  %v1369_v15 = vadd.f32 %v1368_v8, %v1359_v11 }
 0x221   : > { %v1386_v16 = vsel %vm3490_vm6, %v1384_v14, 0.0  ;;  %v1396_v18 = vsel %vm3491_vm10, %v1394_v13, 0.0 }
 0x222   : > { %v1388_v19 = vmul.f32 %v1387_v12, %v1386_v16  ;;  %v1379_v42 = vadd.f32 %v1378_v1, %v1369_v15  ;;  %v1398_v43 = vmul.f32 %v1397_v6, %v1396_v18 }
 0x224   : > { %v1389_v21 = vadd.f32 %v1388_v19, %v1379_v42 }
 0x226   : > { %v1399_v23 = vadd.f32 %v1398_v43, %v1389_v21 }
 0x228   : > { %v1595_v24 = vmul.f32 -1.442695, %v1399_v23 }
 0x22a   : > { %1670 = vpow2.f32 %v1595_v24 }
 0x237   : > { %v1671_v25 = vpop.eup %1670 }
 0x238   : > { %v1403_v20 = vadd.f32 1.0, %v1671_v25 }
 0x23a   : > { %1672 = vrcp.f32 %v1403_v20 }
 0x247   : > { %v1673_v27 = vpop.eup %1672 }
 0x248   : > { %v1410_v22 = vrot.slane %v1673_v27, %v1409_v26  ;;  %v1414_v28 = vrot.slane %v1673_v27, %v1413_v52 }
 0x24a   : > { %v1415_v35 = vcombine.low %v1410_v22, %v1414_v28 }
 0x24c   : > { %v1417_v30 = vmul.f32 %v1674_v29, %v1415_v35 }
 0x24e   : > { %1418 = vst [vmem:[%s184_s11] sm:$0xff] %v1417_v30 }
 0x24f PF: > { %s14_s12 = sadd.s32 1, %s1700_s12  }
 0x250   : > { %p11_p1 = scmp.ge.s32.totalorder %s14_s12, 4  }
 0x252   :  { %13 = sbr.rel (!%p11_p1) target bundleno = 1 (0x1), region = 69 }
 0x257   :  { %1440 = vsyncpa [#allocation4], 1 }
 0x258   :  { %1442 = vsyncpa [#allocation4 + $0x1], 1 }

</bundles_post_ra>
